<compile_context>
chip_gen: v6e
topology: v6e:2x2x1
jax: 0.10.0
libtpu: 0.0.40
codegen_flags: <defaults>
</compile_context>

<pallas_src>
import functools
import math

import jax
import jax.numpy as jnp
import numpy as np
from jax import lax
from jax.experimental import pallas as pl
from jax.experimental.pallas import tpu as pltpu

NEG_SLOPE = 0.01          # nn.LeakyReLU default
DEFAULT_BLOCK_M = 256     # row tile for the fused matmul kernel (multiple of 8)


# ---------------------------------------------------------------------------
# Pallas kernel: fused (X @ W + b) with optional LeakyReLU epilogue.
#   x: [bm, K] (bf16 or f32), w: [K, N], b: [1, N] f32, out: [bm, N].
# The accumulate and the bias/LeakyReLU epilogue are f32; cast happens on store.
# ---------------------------------------------------------------------------
def _matmul_bias_act_kernel(x_ref, w_ref, b_ref, o_ref, *, leaky):
    acc = jnp.dot(x_ref[...], w_ref[...], preferred_element_type=jnp.float32)
    acc = acc + b_ref[...]                       # (1, N) broadcasts over rows
    if leaky:
        acc = jnp.where(acc >= 0.0, acc, NEG_SLOPE * acc)
    o_ref[...] = acc.astype(o_ref.dtype)


def pallas_linear(x, w, b, *, leaky, out_dtype=None, block_m=DEFAULT_BLOCK_M):
    """x: [M, K], w: [K, N] (pre-transposed), b: [1, N] f32  ->  [M, N]."""
    M, K = x.shape
    Kw, N = w.shape
    assert K == Kw and b.shape == (1, N)
    out_dtype = x.dtype if out_dtype is None else out_dtype

    # Full-K / full-N blocks; only the M axis is tiled.  A block equal to the
    # full array dim is exempt from the (8, 128) divisibility rule, so no
    # padding (and no output slicing) is needed.
    if M <= block_m:
        bm, grid_m = M, 1
    else:
        bm, grid_m = block_m, pl.cdiv(M, block_m)

    return pl.pallas_call(
        functools.partial(_matmul_bias_act_kernel, leaky=leaky),
        out_shape=jax.ShapeDtypeStruct((M, N), out_dtype),
        grid=(grid_m,),
        in_specs=[
            pl.BlockSpec((bm, K), lambda i: (i, 0)),   # row tile of x (pipelined)
            pl.BlockSpec((K, N), lambda i: (0, 0)),    # weight stays resident
            pl.BlockSpec((1, N), lambda i: (0, 0)),    # bias stays resident
        ],
        out_specs=pl.BlockSpec((bm, N), lambda i: (i, 0)),
        compiler_params=pltpu.CompilerParams(
            dimension_semantics=("parallel",),         # rows shard over TCs on v7x
            vmem_limit_bytes=32 * 1024 * 1024,
        ),
    )(x, w, b)


# ---------------------------------------------------------------------------
# Conv2d (valid padding, stride s) via NHWC im2col + the fused Pallas matmul.
# ---------------------------------------------------------------------------
def _im2col_nhwc(x, kh, kw, stride):
    """x: [B, H, W, C] -> ([B*OH*OW, KH*KW*C] in (KH, KW, C) feature order, OH, OW)."""
    B, H, W, C = x.shape
    OH = (H - kh) // stride + 1
    OW = (W - kw) // stride + 1
    cols = []
    for i in range(kh):
        for j in range(kw):
            cols.append(x[:, i:i + stride * OH:stride, j:j + stride * OW:stride, :])
    col = jnp.concatenate(cols, axis=-1)                     # [B, OH, OW, KH*KW*C]
    return col.reshape(B * OH * OW, kh * kw * C), OH, OW


def conv2d_leaky_nhwc(x, w_mat, b, stride, kh, kw, out_dtype):
    """x: [B, H, W, C]; w_mat: [KH*KW*C, OC] (pre-laid-out); -> [B, OH, OW, OC]."""
    B = x.shape[0]
    col, OH, OW = _im2col_nhwc(x, kh, kw, stride)
    y = pallas_linear(col, w_mat, b, leaky=True, out_dtype=out_dtype)
    return y.reshape(B, OH, OW, w_mat.shape[1])


# ---------------------------------------------------------------------------
# Parameters: torch-layout init + one-time kernel-ready re-layout.
# ---------------------------------------------------------------------------
def _kaiming_uniform(key, shape, fan_in, a):
    gain = math.sqrt(2.0 / (1.0 + a * a))
    bound = math.sqrt(3.0) * gain / math.sqrt(fan_in)
    return jax.random.uniform(key, shape, jnp.float32, -bound, bound)


def init_params(key, output_size):
    """Params in the original torch layout ([OC, IC, KH, KW] convs, [out, in] linears).

    Weights follow the module's kaiming_uniform init.  Biases get small random
    values (torch zero-inits them; non-zero values exercise the fused bias path
    without changing forward-pass semantics)."""
    ks = jax.random.split(key, 12)

    def u(k, shape):
        return jax.random.uniform(k, shape, jnp.float32, -0.05, 0.05)

    p = {}
    p["c1_w"] = _kaiming_uniform(ks[0], (32, 4, 8, 8), 4 * 8 * 8, 0.0)
    p["c1_b"] = u(ks[1], (32,))
    p["c2_w"] = _kaiming_uniform(ks[2], (64, 32, 4, 4), 32 * 4 * 4, 0.0)
    p["c2_b"] = u(ks[3], (64,))
    p["c3_w"] = _kaiming_uniform(ks[4], (64, 64, 3, 3), 64 * 3 * 3, 0.0)
    p["c3_b"] = u(ks[5], (64,))
    p["fc_w"] = _kaiming_uniform(ks[6], (512, 7 * 7 * 64), 7 * 7 * 64, 1.0)
    p["fc_b"] = u(ks[7], (512,))
    p["actor_w"] = _kaiming_uniform(ks[8], (output_size, 512), 512, 1.0)
    p["actor_b"] = u(ks[9], (output_size,))
    p["critic_w"] = _kaiming_uniform(ks[10], (1, 512), 512, 1.0)
    p["critic_b"] = u(ks[11], (1,))
    return p


def prepare_params(params, compute_dtype=jnp.bfloat16):
    """One-time re-layout of torch-layout params into kernel-ready form.

    * conv weight [OC, IC, KH, KW] -> [KH*KW*IC, OC]  ((KH, KW, C) patch order, NHWC)
    * fc weight   [512, 64*7*7 (C,H,W)] -> [7*7*64 (H,W,C), 512]
    * actor+critic fused into one [512, output_size + 1] matrix
    * matmul operands cast to compute_dtype; biases kept f32 as [1, N].
    Call this ONCE outside jit and reuse the result for every forward.
    """
    cdt = compute_dtype

    def conv_w(w):
        OC, IC, KH, KW = w.shape
        return jnp.transpose(w, (2, 3, 1, 0)).reshape(KH * KW * IC, OC).astype(cdt)

    def bias2d(b):
        return b.reshape(1, -1).astype(jnp.float32)

    p = {
        "c1_w": conv_w(params["c1_w"]), "c1_b": bias2d(params["c1_b"]),
        "c2_w": conv_w(params["c2_w"]), "c2_b": bias2d(params["c2_b"]),
        "c3_w": conv_w(params["c3_w"]), "c3_b": bias2d(params["c3_b"]),
    }

    fc_w = params["fc_w"]                                    # [512, 64*7*7] in (C, H, W)
    fc_w = fc_w.reshape(fc_w.shape[0], 64, 7, 7)             # [512, C, H, W]
    fc_w = jnp.transpose(fc_w, (0, 2, 3, 1)).reshape(fc_w.shape[0], 7 * 7 * 64)
    p["fc_w"] = jnp.transpose(fc_w).astype(cdt)              # [3136 (H,W,C), 512]
    p["fc_b"] = bias2d(params["fc_b"])

    head_w = jnp.concatenate([params["actor_w"], params["critic_w"]], axis=0)  # [out+1, 512]
    p["head_w"] = jnp.transpose(head_w).astype(cdt)                            # [512, out+1]
    p["head_b"] = bias2d(jnp.concatenate([params["actor_b"], params["critic_b"]]))
    return p


# ---------------------------------------------------------------------------
# Forward pass (matches CnnActorCriticNetwork.forward)
# ---------------------------------------------------------------------------
def cnn_actor_critic_forward(prepped, state):
    """state: [B, 4, 84, 84] f32 (NCHW, like the torch module) -> (policy, value)."""
    cdt = prepped["c1_w"].dtype
    B = state.shape[0]

    x = jnp.transpose(state, (0, 2, 3, 1)).astype(cdt)                         # NCHW->NHWC once
    x = conv2d_leaky_nhwc(x, prepped["c1_w"], prepped["c1_b"], 4, 8, 8, cdt)   # [B,20,20,32]
    x = conv2d_leaky_nhwc(x, prepped["c2_w"], prepped["c2_b"], 2, 4, 4, cdt)   # [B, 9, 9,64]
    x = conv2d_leaky_nhwc(x, prepped["c3_w"], prepped["c3_b"], 1, 3, 3, cdt)   # [B, 7, 7,64]

    feat_in = x.reshape(B, -1)                                                 # (H,W,C) flatten
    feat = pallas_linear(feat_in, prepped["fc_w"], prepped["fc_b"],
                         leaky=True, out_dtype=cdt)                            # [B, 512]

    heads = pallas_linear(feat, prepped["head_w"], prepped["head_b"],
                          leaky=False, out_dtype=jnp.float32)                  # [B, out+1]
    n_actions = prepped["head_w"].shape[1] - 1
    policy = heads[:, :n_actions]
    value = heads[:, n_actions:]
    return policy, value


# ---------------------------------------------------------------------------
# Pure-JAX reference (NCHW, torch-layout params) for correctness checks.
# `compute_dtype` emulates the kernel's mixed precision: operands cast to it,
# f32 accumulate, f32 bias+LeakyReLU, intermediates stored in compute_dtype.
# ---------------------------------------------------------------------------
def _ref_forward(params, state, compute_dtype=jnp.float32):
    cdt = compute_dtype

    def leaky(v):
        return jnp.where(v >= 0.0, v, NEG_SLOPE * v)

    def conv(x, w, b, s):
        y = lax.conv_general_dilated(
            x.astype(cdt), w.astype(cdt), window_strides=(s, s), padding="VALID",
            dimension_numbers=("NCHW", "OIHW", "NCHW"),
            preferred_element_type=jnp.float32)
        return leaky(y + b[None, :, None, None]).astype(cdt)

    def dense(v, w, b):
        return jnp.dot(v.astype(cdt), w.T.astype(cdt),
                       preferred_element_type=jnp.float32) + b

    x = conv(state, params["c1_w"], params["c1_b"], 4)
    x = conv(x, params["c2_w"], params["c2_b"], 2)
    x = conv(x, params["c3_w"], params["c3_b"], 1)
    x = x.reshape(x.shape[0], -1)                            # torch (C, H, W) flatten
    feat = leaky(dense(x, params["fc_w"], params["fc_b"])).astype(cdt)
    policy = dense(feat, params["actor_w"], params["actor_b"])
    value = dense(feat, params["critic_w"], params["critic_b"])
    return policy, value


if __name__ == "__main__":
    B, C, H, W = 2, 4, 84, 84        # 84x84 input is implied by the hard-coded 7*7*64
    output_size = 7                  # small action space

    key = jax.random.PRNGKey(0)
    k_param, k_state = jax.random.split(key)
    params = init_params(k_param, output_size)
    state = jax.random.normal(k_state, (B, C, H, W), jnp.float32)

    fwd = jax.jit(cnn_actor_critic_forward)

    # --- default fast path: bf16 matmul operands, f32 accumulate -------------
    prepped_bf16 = prepare_params(params, compute_dtype=jnp.bfloat16)
    policy, value = jax.block_until_ready(fwd(prepped_bf16, state))
    assert policy.shape == (B, output_size) and policy.dtype == jnp.float32
    assert value.shape == (B, 1) and value.dtype == jnp.float32
    ref_p, ref_v = _ref_forward(params, state, compute_dtype=jnp.bfloat16)
    np.testing.assert_allclose(np.asarray(policy), np.asarray(ref_p), rtol=5e-3, atol=5e-3)
    np.testing.assert_allclose(np.asarray(value), np.asarray(ref_v), rtol=5e-3, atol=5e-3)

    # --- pure f32 path (exact semantics of the torch module) -----------------
    prepped_f32 = prepare_params(params, compute_dtype=jnp.float32)
    policy32, value32 = jax.block_until_ready(fwd(prepped_f32, state))
    ref_p32, ref_v32 = _ref_forward(params, state, compute_dtype=jnp.float32)
    np.testing.assert_allclose(np.asarray(policy32), np.asarray(ref_p32), rtol=1e-2, atol=1e-2)
    np.testing.assert_allclose(np.asarray(value32), np.asarray(ref_v32), rtol=1e-2, atol=1e-2)

    print("KERNEL_OK")
</pallas_src>

<mosaic_0001>
module attributes {stable_mosaic.version = 11 : i64} {
  func.func @_matmul_bias_act_kernel(%arg0: i32, %arg1: memref<256x256xbf16, #tpu.memory_space<vmem>>, %arg2: memref<256x32xbf16, #tpu.memory_space<vmem>>, %arg3: memref<1x32xf32, #tpu.memory_space<vmem>>, %arg4: memref<256x32xbf16, #tpu.memory_space<vmem>>) attributes {dimension_semantics = [#tpu.dimension_semantics<parallel>], iteration_bounds = array<i64: 4>, scalar_prefetch = 0 : i64, scratch_operands = 0 : i64, tpu.core_type = #tpu.core_type<tc>, window_params = [{transform_indices = @transform_0, window_bounds = array<i64: 256, 256>}, {pipeline_mode = #tpu.pipeline_mode<synchronous>, transform_indices = @transform_1, window_bounds = array<i64: 256, 32>}, {pipeline_mode = #tpu.pipeline_mode<synchronous>, transform_indices = @transform_2, window_bounds = array<i64: 1, 32>}, {transform_indices = @transform_3, window_bounds = array<i64: 256, 32>}]} {
    %c0 = arith.constant 0 : index
    %c0_0 = arith.constant 0 : index
    %0 = vector.load %arg1[%c0, %c0_0] : memref<256x256xbf16, #tpu.memory_space<vmem>>, vector<256x256xbf16>
    %c0_1 = arith.constant 0 : index
    %c0_2 = arith.constant 0 : index
    %1 = vector.load %arg2[%c0_1, %c0_2] : memref<256x32xbf16, #tpu.memory_space<vmem>>, vector<256x32xbf16>
    %cst = arith.constant dense<0.000000e+00> : vector<256x32xf32>
    %2 = tpu.matmul %0, %1, %cst {dimension_numbers = #tpu.dot_dimension_numbers<[1], [0], [0], [1], [0, 0, 1, 1], [], []>} : vector<256x256xbf16>, vector<256x32xbf16>, vector<256x32xf32> -> vector<256x32xf32>
    %c0_3 = arith.constant 0 : index
    %c0_4 = arith.constant 0 : index
    %3 = vector.load %arg3[%c0_3, %c0_4] : memref<1x32xf32, #tpu.memory_space<vmem>>, vector<1x32xf32>
    %4 = vector.broadcast %3 : vector<1x32xf32> to vector<256x32xf32>
    %5 = arith.addf %2, %4 : vector<256x32xf32>
    %cst_5 = arith.constant 0.000000e+00 : f32
    %6 = vector.broadcast %cst_5 : f32 to vector<256x32xf32>
    %7 = arith.cmpf oge, %5, %6 : vector<256x32xf32>
    %cst_6 = arith.constant 0.00999999977 : f32
    %8 = vector.broadcast %cst_6 : f32 to vector<256x32xf32>
    %9 = arith.mulf %8, %5 : vector<256x32xf32>
    %10 = arith.select %7, %5, %9 : vector<256x32xi1>, vector<256x32xf32>
    %11 = arith.truncf %10 : vector<256x32xf32> to vector<256x32xbf16>
    %c0_7 = arith.constant 0 : index
    %c0_8 = arith.constant 0 : index
    %12 = vector.load %arg4[%c0_7, %c0_8] : memref<256x32xbf16, #tpu.memory_space<vmem>>, vector<256x32xbf16>
    tpu.vector_store %arg4[%c0_7, %c0_8], %11 {strides = array<i32>} : memref<256x32xbf16, #tpu.memory_space<vmem>>, vector<256x32xbf16>,
    return
  }
  func.func @transform_0(%arg0: i32) -> (i32, i32) {
    %c0_i32 = arith.constant 0 : i32
    %c0_i32_0 = arith.constant 0 : i32
    return %arg0, %c0_i32 : i32, i32
  }
  func.func @transform_1(%arg0: i32) -> (i32, i32) {
    %c0_i32 = arith.constant 0 : i32
    %c0_i32_0 = arith.constant 0 : i32
    %c0_i32_1 = arith.constant 0 : i32
    return %c0_i32, %c0_i32_0 : i32, i32
  }
  func.func @transform_2(%arg0: i32) -> (i32, i32) {
    %c0_i32 = arith.constant 0 : i32
    %c0_i32_0 = arith.constant 0 : i32
    %c0_i32_1 = arith.constant 0 : i32
    return %c0_i32, %c0_i32_0 : i32, i32
  }
  func.func @transform_3(%arg0: i32) -> (i32, i32) {
    %c0_i32 = arith.constant 0 : i32
    %c0_i32_0 = arith.constant 0 : i32
    return %arg0, %c0_i32 : i32, i32
  }
}

module attributes {stable_mosaic.version = 11 : i64} {
  func.func @_matmul_bias_act_kernel(%arg0: i32, %arg1: memref<162x512xbf16, #tpu.memory_space<vmem>>, %arg2: memref<512x64xbf16, #tpu.memory_space<vmem>>, %arg3: memref<1x64xf32, #tpu.memory_space<vmem>>, %arg4: memref<162x64xbf16, #tpu.memory_space<vmem>>) attributes {dimension_semantics = [#tpu.dimension_semantics<parallel>], iteration_bounds = array<i64: 1>, scalar_prefetch = 0 : i64, scratch_operands = 0 : i64, tpu.core_type = #tpu.core_type<tc>, window_params = [{transform_indices = @transform_0, window_bounds = array<i64: 162, 512>}, {pipeline_mode = #tpu.pipeline_mode<synchronous>, transform_indices = @transform_1, window_bounds = array<i64: 512, 64>}, {pipeline_mode = #tpu.pipeline_mode<synchronous>, transform_indices = @transform_2, window_bounds = array<i64: 1, 64>}, {transform_indices = @transform_3, window_bounds = array<i64: 162, 64>}]} {
    %c0 = arith.constant 0 : index
    %c0_0 = arith.constant 0 : index
    %0 = vector.load %arg1[%c0, %c0_0] : memref<162x512xbf16, #tpu.memory_space<vmem>>, vector<162x512xbf16>
    %c0_1 = arith.constant 0 : index
    %c0_2 = arith.constant 0 : index
    %1 = vector.load %arg2[%c0_1, %c0_2] : memref<512x64xbf16, #tpu.memory_space<vmem>>, vector<512x64xbf16>
    %cst = arith.constant dense<0.000000e+00> : vector<162x64xf32>
    %2 = tpu.matmul %0, %1, %cst {dimension_numbers = #tpu.dot_dimension_numbers<[1], [0], [0], [1], [0, 0, 1, 1], [], []>} : vector<162x512xbf16>, vector<512x64xbf16>, vector<162x64xf32> -> vector<162x64xf32>
    %c0_3 = arith.constant 0 : index
    %c0_4 = arith.constant 0 : index
    %3 = vector.load %arg3[%c0_3, %c0_4] : memref<1x64xf32, #tpu.memory_space<vmem>>, vector<1x64xf32>
    %4 = vector.broadcast %3 : vector<1x64xf32> to vector<162x64xf32>
    %5 = arith.addf %2, %4 : vector<162x64xf32>
    %cst_5 = arith.constant 0.000000e+00 : f32
    %6 = vector.broadcast %cst_5 : f32 to vector<162x64xf32>
    %7 = arith.cmpf oge, %5, %6 : vector<162x64xf32>
    %cst_6 = arith.constant 0.00999999977 : f32
    %8 = vector.broadcast %cst_6 : f32 to vector<162x64xf32>
    %9 = arith.mulf %8, %5 : vector<162x64xf32>
    %10 = arith.select %7, %5, %9 : vector<162x64xi1>, vector<162x64xf32>
    %11 = arith.truncf %10 : vector<162x64xf32> to vector<162x64xbf16>
    %c0_7 = arith.constant 0 : index
    %c0_8 = arith.constant 0 : index
    %12 = vector.load %arg4[%c0_7, %c0_8] : memref<162x64xbf16, #tpu.memory_space<vmem>>, vector<162x64xbf16>
    tpu.vector_store %arg4[%c0_7, %c0_8], %11 {strides = array<i32>} : memref<162x64xbf16, #tpu.memory_space<vmem>>, vector<162x64xbf16>,
    return
  }
  func.func @transform_0(%arg0: i32) -> (i32, i32) {
    %c0_i32 = arith.constant 0 : i32
    %c0_i32_0 = arith.constant 0 : i32
    return %arg0, %c0_i32 : i32, i32
  }
  func.func @transform_1(%arg0: i32) -> (i32, i32) {
    %c0_i32 = arith.constant 0 : i32
    %c0_i32_0 = arith.constant 0 : i32
    %c0_i32_1 = arith.constant 0 : i32
    return %c0_i32, %c0_i32_0 : i32, i32
  }
  func.func @transform_2(%arg0: i32) -> (i32, i32) {
    %c0_i32 = arith.constant 0 : i32
    %c0_i32_0 = arith.constant 0 : i32
    %c0_i32_1 = arith.constant 0 : i32
    return %c0_i32, %c0_i32_0 : i32, i32
  }
  func.func @transform_3(%arg0: i32) -> (i32, i32) {
    %c0_i32 = arith.constant 0 : i32
    %c0_i32_0 = arith.constant 0 : i32
    return %arg0, %c0_i32 : i32, i32
  }
}

module attributes {stable_mosaic.version = 11 : i64} {
  func.func @_matmul_bias_act_kernel(%arg0: i32, %arg1: memref<98x576xbf16, #tpu.memory_space<vmem>>, %arg2: memref<576x64xbf16, #tpu.memory_space<vmem>>, %arg3: memref<1x64xf32, #tpu.memory_space<vmem>>, %arg4: memref<98x64xbf16, #tpu.memory_space<vmem>>) attributes {dimension_semantics = [#tpu.dimension_semantics<parallel>], iteration_bounds = array<i64: 1>, scalar_prefetch = 0 : i64, scratch_operands = 0 : i64, tpu.core_type = #tpu.core_type<tc>, window_params = [{transform_indices = @transform_0, window_bounds = array<i64: 98, 576>}, {pipeline_mode = #tpu.pipeline_mode<synchronous>, transform_indices = @transform_1, window_bounds = array<i64: 576, 64>}, {pipeline_mode = #tpu.pipeline_mode<synchronous>, transform_indices = @transform_2, window_bounds = array<i64: 1, 64>}, {transform_indices = @transform_3, window_bounds = array<i64: 98, 64>}]} {
    %c0 = arith.constant 0 : index
    %c0_0 = arith.constant 0 : index
    %0 = vector.load %arg1[%c0, %c0_0] : memref<98x576xbf16, #tpu.memory_space<vmem>>, vector<98x576xbf16>
    %c0_1 = arith.constant 0 : index
    %c0_2 = arith.constant 0 : index
    %1 = vector.load %arg2[%c0_1, %c0_2] : memref<576x64xbf16, #tpu.memory_space<vmem>>, vector<576x64xbf16>
    %cst = arith.constant dense<0.000000e+00> : vector<98x64xf32>
    %2 = tpu.matmul %0, %1, %cst {dimension_numbers = #tpu.dot_dimension_numbers<[1], [0], [0], [1], [0, 0, 1, 1], [], []>} : vector<98x576xbf16>, vector<576x64xbf16>, vector<98x64xf32> -> vector<98x64xf32>
    %c0_3 = arith.constant 0 : index
    %c0_4 = arith.constant 0 : index
    %3 = vector.load %arg3[%c0_3, %c0_4] : memref<1x64xf32, #tpu.memory_space<vmem>>, vector<1x64xf32>
    %4 = vector.broadcast %3 : vector<1x64xf32> to vector<98x64xf32>
    %5 = arith.addf %2, %4 : vector<98x64xf32>
    %cst_5 = arith.constant 0.000000e+00 : f32
    %6 = vector.broadcast %cst_5 : f32 to vector<98x64xf32>
    %7 = arith.cmpf oge, %5, %6 : vector<98x64xf32>
    %cst_6 = arith.constant 0.00999999977 : f32
    %8 = vector.broadcast %cst_6 : f32 to vector<98x64xf32>
    %9 = arith.mulf %8, %5 : vector<98x64xf32>
    %10 = arith.select %7, %5, %9 : vector<98x64xi1>, vector<98x64xf32>
    %11 = arith.truncf %10 : vector<98x64xf32> to vector<98x64xbf16>
    %c0_7 = arith.constant 0 : index
    %c0_8 = arith.constant 0 : index
    %12 = vector.load %arg4[%c0_7, %c0_8] : memref<98x64xbf16, #tpu.memory_space<vmem>>, vector<98x64xbf16>
    tpu.vector_store %arg4[%c0_7, %c0_8], %11 {strides = array<i32>} : memref<98x64xbf16, #tpu.memory_space<vmem>>, vector<98x64xbf16>,
    return
  }
  func.func @transform_0(%arg0: i32) -> (i32, i32) {
    %c0_i32 = arith.constant 0 : i32
    %c0_i32_0 = arith.constant 0 : i32
    return %arg0, %c0_i32 : i32, i32
  }
  func.func @transform_1(%arg0: i32) -> (i32, i32) {
    %c0_i32 = arith.constant 0 : i32
    %c0_i32_0 = arith.constant 0 : i32
    %c0_i32_1 = arith.constant 0 : i32
    return %c0_i32, %c0_i32_0 : i32, i32
  }
  func.func @transform_2(%arg0: i32) -> (i32, i32) {
    %c0_i32 = arith.constant 0 : i32
    %c0_i32_0 = arith.constant 0 : i32
    %c0_i32_1 = arith.constant 0 : i32
    return %c0_i32, %c0_i32_0 : i32, i32
  }
  func.func @transform_3(%arg0: i32) -> (i32, i32) {
    %c0_i32 = arith.constant 0 : i32
    %c0_i32_0 = arith.constant 0 : i32
    return %arg0, %c0_i32 : i32, i32
  }
}

module attributes {stable_mosaic.version = 11 : i64} {
  func.func @_matmul_bias_act_kernel(%arg0: i32, %arg1: memref<2x3136xbf16, #tpu.memory_space<vmem>>, %arg2: memref<3136x512xbf16, #tpu.memory_space<vmem>>, %arg3: memref<1x512xf32, #tpu.memory_space<vmem>>, %arg4: memref<2x512xbf16, #tpu.memory_space<vmem>>) attributes {dimension_semantics = [#tpu.dimension_semantics<parallel>], iteration_bounds = array<i64: 1>, scalar_prefetch = 0 : i64, scratch_operands = 0 : i64, tpu.core_type = #tpu.core_type<tc>, window_params = [{transform_indices = @transform_0, window_bounds = array<i64: 2, 3136>}, {pipeline_mode = #tpu.pipeline_mode<synchronous>, transform_indices = @transform_1, window_bounds = array<i64: 3136, 512>}, {pipeline_mode = #tpu.pipeline_mode<synchronous>, transform_indices = @transform_2, window_bounds = array<i64: 1, 512>}, {transform_indices = @transform_3, window_bounds = array<i64: 2, 512>}]} {
    %c0 = arith.constant 0 : index
    %c0_0 = arith.constant 0 : index
    %0 = vector.load %arg1[%c0, %c0_0] : memref<2x3136xbf16, #tpu.memory_space<vmem>>, vector<2x3136xbf16>
    %c0_1 = arith.constant 0 : index
    %c0_2 = arith.constant 0 : index
    %1 = vector.load %arg2[%c0_1, %c0_2] : memref<3136x512xbf16, #tpu.memory_space<vmem>>, vector<3136x512xbf16>
    %cst = arith.constant dense<0.000000e+00> : vector<2x512xf32>
    %2 = tpu.matmul %0, %1, %cst {dimension_numbers = #tpu.dot_dimension_numbers<[1], [0], [0], [1], [0, 0, 1, 1], [], []>} : vector<2x3136xbf16>, vector<3136x512xbf16>, vector<2x512xf32> -> vector<2x512xf32>
    %c0_3 = arith.constant 0 : index
    %c0_4 = arith.constant 0 : index
    %3 = vector.load %arg3[%c0_3, %c0_4] : memref<1x512xf32, #tpu.memory_space<vmem>>, vector<1x512xf32>
    %4 = vector.broadcast %3 : vector<1x512xf32> to vector<2x512xf32>
    %5 = arith.addf %2, %4 : vector<2x512xf32>
    %cst_5 = arith.constant 0.000000e+00 : f32
    %6 = vector.broadcast %cst_5 : f32 to vector<2x512xf32>
    %7 = arith.cmpf oge, %5, %6 : vector<2x512xf32>
    %cst_6 = arith.constant 0.00999999977 : f32
    %8 = vector.broadcast %cst_6 : f32 to vector<2x512xf32>
    %9 = arith.mulf %8, %5 : vector<2x512xf32>
    %10 = arith.select %7, %5, %9 : vector<2x512xi1>, vector<2x512xf32>
    %11 = arith.truncf %10 : vector<2x512xf32> to vector<2x512xbf16>
    %c0_7 = arith.constant 0 : index
    %c0_8 = arith.constant 0 : index
    %12 = vector.load %arg4[%c0_7, %c0_8] : memref<2x512xbf16, #tpu.memory_space<vmem>>, vector<2x512xbf16>
    tpu.vector_store %arg4[%c0_7, %c0_8], %11 {strides = array<i32>} : memref<2x512xbf16, #tpu.memory_space<vmem>>, vector<2x512xbf16>,
    return
  }
  func.func @transform_0(%arg0: i32) -> (i32, i32) {
    %c0_i32 = arith.constant 0 : i32
    %c0_i32_0 = arith.constant 0 : i32
    return %arg0, %c0_i32 : i32, i32
  }
  func.func @transform_1(%arg0: i32) -> (i32, i32) {
    %c0_i32 = arith.constant 0 : i32
    %c0_i32_0 = arith.constant 0 : i32
    %c0_i32_1 = arith.constant 0 : i32
    return %c0_i32, %c0_i32_0 : i32, i32
  }
  func.func @transform_2(%arg0: i32) -> (i32, i32) {
    %c0_i32 = arith.constant 0 : i32
    %c0_i32_0 = arith.constant 0 : i32
    %c0_i32_1 = arith.constant 0 : i32
    return %c0_i32, %c0_i32_0 : i32, i32
  }
  func.func @transform_3(%arg0: i32) -> (i32, i32) {
    %c0_i32 = arith.constant 0 : i32
    %c0_i32_0 = arith.constant 0 : i32
    return %arg0, %c0_i32 : i32, i32
  }
}

module attributes {stable_mosaic.version = 11 : i64} {
  func.func @_matmul_bias_act_kernel(%arg0: i32, %arg1: memref<2x512xbf16, #tpu.memory_space<vmem>>, %arg2: memref<512x8xbf16, #tpu.memory_space<vmem>>, %arg3: memref<1x8xf32, #tpu.memory_space<vmem>>, %arg4: memref<2x8xf32, #tpu.memory_space<vmem>>) attributes {dimension_semantics = [#tpu.dimension_semantics<parallel>], iteration_bounds = array<i64: 1>, scalar_prefetch = 0 : i64, scratch_operands = 0 : i64, tpu.core_type = #tpu.core_type<tc>, window_params = [{transform_indices = @transform_0, window_bounds = array<i64: 2, 512>}, {pipeline_mode = #tpu.pipeline_mode<synchronous>, transform_indices = @transform_1, window_bounds = array<i64: 512, 8>}, {pipeline_mode = #tpu.pipeline_mode<synchronous>, transform_indices = @transform_2, window_bounds = array<i64: 1, 8>}, {transform_indices = @transform_3, window_bounds = array<i64: 2, 8>}]} {
    %c0 = arith.constant 0 : index
    %c0_0 = arith.constant 0 : index
    %0 = vector.load %arg1[%c0, %c0_0] : memref<2x512xbf16, #tpu.memory_space<vmem>>, vector<2x512xbf16>
    %c0_1 = arith.constant 0 : index
    %c0_2 = arith.constant 0 : index
    %1 = vector.load %arg2[%c0_1, %c0_2] : memref<512x8xbf16, #tpu.memory_space<vmem>>, vector<512x8xbf16>
    %cst = arith.constant dense<0.000000e+00> : vector<2x8xf32>
    %2 = tpu.matmul %0, %1, %cst {dimension_numbers = #tpu.dot_dimension_numbers<[1], [0], [0], [1], [0, 0, 1, 1], [], []>} : vector<2x512xbf16>, vector<512x8xbf16>, vector<2x8xf32> -> vector<2x8xf32>
    %c0_3 = arith.constant 0 : index
    %c0_4 = arith.constant 0 : index
    %3 = vector.load %arg3[%c0_3, %c0_4] : memref<1x8xf32, #tpu.memory_space<vmem>>, vector<1x8xf32>
    %4 = vector.broadcast %3 : vector<1x8xf32> to vector<2x8xf32>
    %5 = arith.addf %2, %4 : vector<2x8xf32>
    %c0_5 = arith.constant 0 : index
    %c0_6 = arith.constant 0 : index
    %6 = vector.load %arg4[%c0_5, %c0_6] : memref<2x8xf32, #tpu.memory_space<vmem>>, vector<2x8xf32>
    tpu.vector_store %arg4[%c0_5, %c0_6], %5 {strides = array<i32>} : memref<2x8xf32, #tpu.memory_space<vmem>>, vector<2x8xf32>,
    return
  }
  func.func @transform_0(%arg0: i32) -> (i32, i32) {
    %c0_i32 = arith.constant 0 : i32
    %c0_i32_0 = arith.constant 0 : i32
    return %arg0, %c0_i32 : i32, i32
  }
  func.func @transform_1(%arg0: i32) -> (i32, i32) {
    %c0_i32 = arith.constant 0 : i32
    %c0_i32_0 = arith.constant 0 : i32
    %c0_i32_1 = arith.constant 0 : i32
    return %c0_i32, %c0_i32_0 : i32, i32
  }
  func.func @transform_2(%arg0: i32) -> (i32, i32) {
    %c0_i32 = arith.constant 0 : i32
    %c0_i32_0 = arith.constant 0 : i32
    %c0_i32_1 = arith.constant 0 : i32
    return %c0_i32, %c0_i32_0 : i32, i32
  }
  func.func @transform_3(%arg0: i32) -> (i32, i32) {
    %c0_i32 = arith.constant 0 : i32
    %c0_i32_0 = arith.constant 0 : i32
    return %arg0, %c0_i32 : i32, i32
  }
}

</mosaic_0001>

<bundles_post_ra>
// kernel: cnn_actor_critic_forward.5
= control target key start
LH: loop header
LB: loop body
LE: loop exit
PB: predicated region body
PF: predicated region fallthrough
CT: control target
= control target key end

     0   :  { %s1816_s12 = smov 0   ;;  %s1818_s13 = smov 0   ;;  %s2174_s0 = inlined_call_operand.vmem [shape: bf16[800,256], index: 0, kind: input, shape index: {}]   ;;  %s2175_s1 = inlined_call_operand.vmem [shape: bf16[256,32], index: 1, kind: input, shape index: {}]   ;;  %s2176_s2 = inlined_call_operand.vmem [shape: f32[1,32], index: 2, kind: input, shape index: {}]   ;;  %s2177_s3 = inlined_call_operand.vmem [shape: bf16[800,32], index: 3, kind: output, shape index: {}]  }
   0x1   :  { %s1820_s14 = smov 0  }
   0x2 LB: > { %s1829_s15 = sadd.s32 4294967295, %s1762_s14   ;;  %s1831_s16 = sadd.s32 1, %s1762_s14   ;;  %s1762_s14 = sphi %s1820_s14, %s2184_s14   ;;  %s1758_s13 = sphi %s1818_s13, %s2183_s13   ;;  %s1754_s12 = sphi %s1816_s12, %s2182_s12  }
   0x3   : > { %s85_s17 = ssub.s32 %s1762_s14, %s1831_s16  ;;  %s88_s18 = sadd.s32 1, %s1758_s13 }
   0x4   : > { %p86_p0 = scmp.eq.s32.totalorder %s85_s17, 0  ;;  %p98_p1 = scmp.ne.s32.totalorder %s1758_s13, %s1754_s12 }
   0x5   : > { %p99_p2 = scmp.eq.s32.totalorder %s1829_s15, 3  ;;  %p1289_p3 = scmp.ge.s32.totalorder %s1762_s14, 1 }
   0x6   : > { %s1839_s19 = scalar_select %p86_p0, %s1758_s13, %s88_s18  }
   0x7   : > { %p1841_p4 = por %p99_p2, %p98_p1  ;;  %p149_p5 = scmp.lt.s32.totalorder %s1762_s14, 5 }
   0x9   : > { %p150_p6 = pnand %p1289_p3, %p149_p5 }
   0xa   : > { %s1849_s23 = sshll.u32 (!%p150_p6), %s1829_s15, 5  ;;  %s175_s18 = sand.u32 (!%p150_p6), 1, %s1754_s12  }
   0xb   : > { %153 = sbr.rel (%p150_p6) target bundleno = 376 (0x178), region = 32  ;;  %p184_p7 = scmp.lt.s32.totalorder (!%p150_p6), %s1849_s23, 99 }
   0xc   : > { %s1290_s21 = sshll.u32 (!%p150_p6), %s175_s18, 7 }
   0xd   : > { %s1945_s12 = scalar_lea.vmem (!%p150_p6), [#allocation2], %s1290_s21  }
  0x10   : > { %v1644_v0 = vld [vmem:[%s2175_s1 + $0x78] sm:$0xff]   ;;  %v1646_v2 = vld [vmem:[%s2175_s1 + $0x70] sm:$0xff]   ;;  %v1648_v4 = vld [vmem:[%s2175_s1 + $0x68] sm:$0xff]   ;;  %s185_s7 = scalar_select %p184_p7, %s1849_s23, 99  ;;  %vm913_vm2 = vcmask 257024  }
  0x11   : > { %v1645_v1 = vld [vmem:[%s2175_s1 + $0x38] sm:$0xff]   ;;  %1428 = vmatprep.subr.bf16.mxu0 %v1644_v0  ;;  %1540 = vmatprep.subr.bf16.mxu1 %v1644_v0  ;;  %v1647_v3 = vld [vmem:[%s2175_s1 + $0x30] sm:$0xff]   ;;  %v1649_v5 = vld [vmem:[%s2175_s1 + $0x28] sm:$0xff]   ;;  %s954_s22 = ssub.s32 (%p1841_p4), 100, %s1849_s23 }
  0x12   : > { %1429 = vmatpush3.bf16.msra.mxu0 %v1645_v1  ;;  %1548 = vmatpush3.bf16.msra.mxu1 %v1645_v1  ;;  %v1650_v6 = vld [vmem:[%s2175_s1 + $0x60] sm:$0xff]   ;;  %s1392_s14 = sshll.u32 %s185_s7, 3  ;;  %v1652_v8 = vld [vmem:[%s2175_s1 + $0x58] sm:$0xff]   ;;  %v1654_v10 = vld [vmem:[%s2175_s1 + $0x50] sm:$0xff]   ;;  %p955_p8 = scmp.lt.s32.totalorder (%p1841_p4), %s954_s22, 32 }
  0x13   : > { %1430 = vmatprep.subr.bf16.mxu0 %v1646_v2  ;;  %1541 = vmatprep.subr.bf16.mxu1 %v1646_v2  ;;  %v1651_v7 = vld [vmem:[%s2175_s1 + $0x20] sm:$0xff]   ;;  %s1880_s24 = scalar_lea.vmem %s2174_s0, %s1392_s14  ;;  %v1653_v9 = vld [vmem:[%s2175_s1 + $0x18] sm:$0xff]   ;;  %v1655_v13 = vld [vmem:[%s2175_s1 + $0x10] sm:$0xff]  }
  0x14   : > { %v1662_v11 = vld [vmem:[%s1880_s24 + $0x4] ss:$8 sps:$4 sm:$0xff]   ;;  %v1660_v18 = vld [vmem:[%s1880_s24] ss:$8 sps:$4 sm:$0xff]   ;;  %v1666_v20 = vld [vmem:[%s1880_s24 + $0x14] ss:$8 sps:$4 sm:$0xff]  }
  0x15   : > { %v1665_v12 = vld [vmem:[%s1880_s24 + $0x84] ss:$8 sps:$4 sm:$0xff]   ;;  %560 = vmatprep.mubr.bf16.mxu0 %v1662_v11  ;;  %v1663_v19 = vld [vmem:[%s1880_s24 + $0x80] ss:$8 sps:$4 sm:$0xff]   ;;  %v1668_v21 = vld [vmem:[%s1880_s24 + $0x94] ss:$8 sps:$4 sm:$0xff]  }
  0x16   : > { %1431 = vmatpush3.bf16.msra.mxu0 %v1647_v3  ;;  %1549 = vmatpush3.bf16.msra.mxu1 %v1647_v3  ;;  %v1656_v14 = vld [vmem:[%s2175_s1 + $0x48] sm:$0xff]   ;;  %v1658_v16 = vld [vmem:[%s2175_s1 + $0x40] sm:$0xff]   ;;  %v1670_v22 = vld [vmem:[%s1880_s24 + $0x10] ss:$8 sps:$4 sm:$0xff]  }
  0x17   : > { %1432 = vmatprep.subr.bf16.mxu0 %v1648_v4  ;;  %1542 = vmatprep.subr.bf16.mxu1 %v1648_v4  ;;  %v1657_v15 = vld [vmem:[%s2175_s1 + $0x8] sm:$0xff]   ;;  %v1659_v17 = vld [vmem:[%s2175_s1] sm:$0xff]   ;;  %v1671_v23 = vld [vmem:[%s1880_s24 + $0x90] ss:$8 sps:$4 sm:$0xff]  }
  0x18   : > { %624 = vmatprep.mubr.bf16.mxu1 %v1665_v12  ;;  %v1672_v24 = vld [vmem:[%s1880_s24 + $0x24] ss:$8 sps:$4 sm:$0xff]   ;;  %v1676_v26 = vld [vmem:[%s1880_s24 + $0x20] ss:$8 sps:$4 sm:$0xff]   ;;  %v1678_v28 = vld [vmem:[%s1880_s24 + $0x34] ss:$8 sps:$4 sm:$0xff]  }
  0x19   : > { %v1674_v25 = vld [vmem:[%s1880_s24 + $0xa4] ss:$8 sps:$4 sm:$0xff]   ;;  %v1677_v27 = vld [vmem:[%s1880_s24 + $0xa0] ss:$8 sps:$4 sm:$0xff]   ;;  %v1680_v29 = vld [vmem:[%s1880_s24 + $0xb4] ss:$8 sps:$4 sm:$0xff]  }
  0x1a   : > { %1433 = vmatpush3.bf16.msra.mxu0 %v1649_v5  ;;  %1550 = vmatpush3.bf16.msra.mxu1 %v1649_v5  ;;  %v1682_v30 = vld [vmem:[%s1880_s24 + $0x30] ss:$8 sps:$4 sm:$0xff]   ;;  %v1684_v32 = vld [vmem:[%s1880_s24 + $0x44] ss:$8 sps:$4 sm:$0xff]   ;;  %v1688_v34 = vld [vmem:[%s1880_s24 + $0x40] ss:$8 sps:$4 sm:$0xff]  }
  0x1b   : > { %1434 = vmatprep.subr.bf16.mxu0 %v1650_v6  ;;  %1543 = vmatprep.subr.bf16.mxu1 %v1650_v6  ;;  %v1683_v31 = vld [vmem:[%s1880_s24 + $0xb0] ss:$8 sps:$4 sm:$0xff]   ;;  %v1686_v33 = vld [vmem:[%s1880_s24 + $0xc4] ss:$8 sps:$4 sm:$0xff]   ;;  %v1689_v35 = vld [vmem:[%s1880_s24 + $0xc0] ss:$8 sps:$4 sm:$0xff]  }
  0x1c   : > { %v1690_v36 = vld [vmem:[%s1880_s24 + $0x54] ss:$8 sps:$4 sm:$0xff]   ;;  %v1694_v38 = vld [vmem:[%s1880_s24 + $0x50] ss:$8 sps:$4 sm:$0xff]   ;;  %v1696_v40 = vld [vmem:[%s1880_s24 + $0x64] ss:$8 sps:$4 sm:$0xff]  }
  0x1d   : > { %v1692_v37 = vld [vmem:[%s1880_s24 + $0xd4] ss:$8 sps:$4 sm:$0xff]   ;;  %v1695_v39 = vld [vmem:[%s1880_s24 + $0xd0] ss:$8 sps:$4 sm:$0xff]   ;;  %v1698_v41 = vld [vmem:[%s1880_s24 + $0xe4] ss:$8 sps:$4 sm:$0xff]  }
  0x1e   : > { %1435 = vmatpush3.bf16.msra.mxu0 %v1651_v7  ;;  %1551 = vmatpush3.bf16.msra.mxu1 %v1651_v7  ;;  %v1700_v42 = vld [vmem:[%s1880_s24 + $0x60] ss:$8 sps:$4 sm:$0xff]   ;;  %v1702_v44 = vld [vmem:[%s1880_s24 + $0x74] ss:$8 sps:$4 sm:$0xff]   ;;  %v1706_v46 = vld [vmem:[%s1880_s24 + $0x70] ss:$8 sps:$4 sm:$0xff]  }
  0x1f   : > { %1436 = vmatprep.subr.bf16.mxu0 %v1652_v8  ;;  %1544 = vmatprep.subr.bf16.mxu1 %v1652_v8  ;;  %v1701_v43 = vld [vmem:[%s1880_s24 + $0xe0] ss:$8 sps:$4 sm:$0xff]   ;;  %v1704_v45 = vld [vmem:[%s1880_s24 + $0xf4] ss:$8 sps:$4 sm:$0xff]   ;;  %v1707_v47 = vld [vmem:[%s1880_s24 + $0xf0] ss:$8 sps:$4 sm:$0xff]  }
  0x20   : > { %v1938_v50 = vld [vmem:[%s2176_s2] ss:$0 sm:$0xff]  ;;  %s1425_s24 = sshll.u32 (%p1841_p4), %s1829_s15, 7 }
  0x21   : > { %s2046_s27 = scalar_lea.vmem (%p1841_p4), %s2177_s3, %s1425_s24  }
  0x22   : > { %1437 = vmatpush3.bf16.msra.mxu0 %v1653_v9  ;;  %1552 = vmatpush3.bf16.msra.mxu1 %v1653_v9 }
  0x23   : > { %1438 = vmatprep.subr.bf16.mxu0 %v1654_v10  ;;  %1545 = vmatprep.subr.bf16.mxu1 %v1654_v10 }
  0x26   : > { %1439 = vmatpush3.bf16.msra.mxu0 %v1655_v13  ;;  %1553 = vmatpush3.bf16.msra.mxu1 %v1655_v13 }
  0x27   : > { %1440 = vmatprep.subr.bf16.mxu0 %v1656_v14  ;;  %1546 = vmatprep.subr.bf16.mxu1 %v1656_v14 }
  0x2a   : > { %1441 = vmatpush3.bf16.msra.mxu0 %v1657_v15  ;;  %1554 = vmatpush3.bf16.msra.mxu1 %v1657_v15 }
  0x2b   : > { %1442 = vmatprep.subr.bf16.mxu0 %v1658_v16  ;;  %1547 = vmatprep.subr.bf16.mxu1 %v1658_v16 }
  0x2e   : > { %1443 = vmatpush3.bf16.msra.mxu0 %v1659_v17  ;;  %1555 = vmatpush3.bf16.msra.mxu1 %v1659_v17 }
  0x31   : > { %561 = vmatmul.mubr.bf16.vlgmr.msra.gmra.mxu0 %v1660_v18  ;;  %625 = vmatmul.mubr.bf16.vlgmr.msra.gmra.mxu1 %v1663_v19 }
  0x32   : > { %568 = vmatprep.mubr.bf16.mxu0 %v1666_v20  ;;  %632 = vmatprep.mubr.bf16.mxu1 %v1668_v21 }
  0x39   : > { %569 = vmatmul.mubr.bf16.gmra.mxu0 %v1670_v22  ;;  %633 = vmatmul.mubr.bf16.gmra.mxu1 %v1671_v23 }
  0x3a   : > { %576 = vmatprep.mubr.bf16.mxu0 %v1672_v24  ;;  %640 = vmatprep.mubr.bf16.mxu1 %v1674_v25 }
  0x41   : > { %577 = vmatmul.mubr.bf16.gmra.mxu0 %v1676_v26  ;;  %641 = vmatmul.mubr.bf16.gmra.mxu1 %v1677_v27 }
  0x42   : > { %584 = vmatprep.mubr.bf16.mxu0 %v1678_v28  ;;  %648 = vmatprep.mubr.bf16.mxu1 %v1680_v29 }
  0x49   : > { %585 = vmatmul.mubr.bf16.gmra.mxu0 %v1682_v30  ;;  %649 = vmatmul.mubr.bf16.gmra.mxu1 %v1683_v31 }
  0x4a   : > { %592 = vmatprep.mubr.bf16.mxu0 %v1684_v32  ;;  %656 = vmatprep.mubr.bf16.mxu1 %v1686_v33 }
  0x51   : > { %593 = vmatmul.mubr.bf16.gmra.mxu0 %v1688_v34  ;;  %657 = vmatmul.mubr.bf16.gmra.mxu1 %v1689_v35 }
  0x52   : > { %600 = vmatprep.mubr.bf16.mxu0 %v1690_v36  ;;  %664 = vmatprep.mubr.bf16.mxu1 %v1692_v37 }
  0x59   : > { %601 = vmatmul.mubr.bf16.gmra.mxu0 %v1694_v38  ;;  %665 = vmatmul.mubr.bf16.gmra.mxu1 %v1695_v39 }
  0x5a   : > { %608 = vmatprep.mubr.bf16.mxu0 %v1696_v40  ;;  %672 = vmatprep.mubr.bf16.mxu1 %v1698_v41 }
  0x61   : > { %609 = vmatmul.mubr.bf16.gmra.mxu0 %v1700_v42  ;;  %673 = vmatmul.mubr.bf16.gmra.mxu1 %v1701_v43 }
  0x62   : > { %616 = vmatprep.mubr.bf16.mxu0 %v1702_v44  ;;  %680 = vmatprep.mubr.bf16.mxu1 %v1704_v45 }
  0x69   : > { %617 = vmatmul.mubr.bf16.gmra.mxu0 %v1706_v46  ;;  %681 = vmatmul.mubr.bf16.gmra.mxu1 %v1707_v47 }
  0xf1   : > { %v1444_v48 = vpop.f32.mrf.mxu0  ;;  %v1492_v49 = vpop.f32.mrf.mxu1 }
  0xf3   : > { %v1445_v51 = vpop.f32.mrf.mxu0  ;;  %v1493_v52 = vpop.f32.mrf.mxu1 }
  0xf4   : > { %v1446_v53 = vadd.f32 %v1445_v51, %v1444_v48  ;;  %v1494_v54 = vadd.f32 %v1493_v52, %v1492_v49 }
  0xf5   : > { %v1447_v55 = vpop.f32.mrf.mxu0  ;;  %v1495_v56 = vpop.f32.mrf.mxu1 }
  0xf6   : > { %v563_v57 = vadd.f32 %v1446_v53, %v1938_v50  ;;  %v627_v58 = vadd.f32 %v1494_v54, %v1938_v50 }
  0xf7   : > { %v1448_v59 = vpop.f32.mrf.mxu0  ;;  %v1496_v60 = vpop.f32.mrf.mxu1 }
  0xf8   : > { %vm689_vm0 = vcmp.ge.f32.partialorder %v563_v57, 0.0  ;;  %v721_v61 = vmul.f32 0.01, %v563_v57  ;;  %vm705_vm1 = vcmp.ge.f32.partialorder %v627_v58, 0.0  ;;  %v737_v62 = vmul.f32 0.01, %v627_v58 }
  0xf9   : > { %v1449_v63 = vadd.f32 %v1448_v59, %v1447_v55  ;;  %v1497_v0 = vadd.f32 %v1496_v60, %v1495_v56  ;;  %v1450_v1 = vpop.f32.mrf.mxu0  ;;  %v1498_v2 = vpop.f32.mrf.mxu1 }
  0xfa   : > { %v753_v3 = vsel %vm689_vm0, %v563_v57, %v721_v61  ;;  %v769_v4 = vsel %vm705_vm1, %v627_v58, %v737_v62 }
  0xfb   : > { %v1393_v5 = vpack.c.bf16 %v753_v3, %v753_v3  ;;  %v1409_v6 = vpack.c.bf16 %v769_v4, %v769_v4  ;;  %v566_v7 = vadd.f32 %v1449_v63, %v1938_v50  ;;  %v630_v8 = vadd.f32 %v1497_v0, %v1938_v50  ;;  %v1451_v9 = vpop.f32.mrf.mxu0  ;;  %v1499_v10 = vpop.f32.mrf.mxu1 }
  0xfc   : > { %v1452_v11 = vadd.f32 %v1451_v9, %v1450_v1  ;;  %v1500_v12 = vadd.f32 %v1499_v10, %v1498_v2 }
  0xfd   : > { %914 = vst.msk [vmem:[%s1945_s12] sm:$0xf] %vm913_vm2, %v1393_v5  ;;  %930 = vst.msk [vmem:[%s1945_s12 + $0x40] sm:$0xf] %vm913_vm2, %v1409_v6  ;;  %vm690_vm3 = vcmp.ge.f32.partialorder %v566_v7, 0.0  ;;  %vm706_vm4 = vcmp.ge.f32.partialorder %v630_v8, 0.0  ;;  %v1453_v15 = vpop.f32.mrf.mxu0  ;;  %v1501_v16 = vpop.f32.mrf.mxu1 }
  0xfe   : > { %v722_v13 = vmul.f32 0.01, %v566_v7  ;;  %v738_v14 = vmul.f32 0.01, %v630_v8  ;;  %v571_v17 = vadd.f32 %v1452_v11, %v1938_v50  ;;  %v635_v18 = vadd.f32 %v1500_v12, %v1938_v50 }
  0xff   : > { %v1454_v21 = vpop.f32.mrf.mxu0  ;;  %v1502_v22 = vpop.f32.mrf.mxu1 }
 0x100   : > { %v754_v19 = vsel %vm690_vm3, %v566_v7, %v722_v13  ;;  %v770_v20 = vsel %vm706_vm4, %v630_v8, %v738_v14  ;;  %vm691_vm5 = vcmp.ge.f32.partialorder %v571_v17, 0.0  ;;  %v723_v25 = vmul.f32 0.01, %v571_v17 }
 0x101   : > { %v1394_v23 = vpack.c.bf16 %v754_v19, %v754_v19  ;;  %v1410_v24 = vpack.c.bf16 %v770_v20, %v770_v20  ;;  %vm707_vm6 = vcmp.ge.f32.partialorder %v635_v18, 0.0  ;;  %v739_v26 = vmul.f32 0.01, %v635_v18  ;;  %v1456_v29 = vpop.f32.mrf.mxu0  ;;  %v1504_v30 = vpop.f32.mrf.mxu1 }
 0x102   : > { %v1455_v27 = vadd.f32 %v1454_v21, %v1453_v15  ;;  %v1503_v28 = vadd.f32 %v1502_v22, %v1501_v16  ;;  %v755_v31 = vsel %vm691_vm5, %v571_v17, %v723_v25 }
 0x103   : > { %915 = vst.msk [vmem:[%s1945_s12 + $0x4] sm:$0xf] %vm913_vm2, %v1394_v23  ;;  %931 = vst.msk [vmem:[%s1945_s12 + $0x44] sm:$0xf] %vm913_vm2, %v1410_v24  ;;  %v1395_v32 = vpack.c.bf16 %v755_v31, %v755_v31  ;;  %v771_v33 = vsel %vm707_vm6, %v635_v18, %v739_v26  ;;  %v1457_v36 = vpop.f32.mrf.mxu0  ;;  %v1505_v37 = vpop.f32.mrf.mxu1 }
 0x104   : > { %v574_v34 = vadd.f32 %v1455_v27, %v1938_v50  ;;  %v638_v35 = vadd.f32 %v1503_v28, %v1938_v50  ;;  %v1411_v38 = vpack.c.bf16 %v771_v33, %v771_v33  ;;  %v1458_v39 = vadd.f32 %v1457_v36, %v1456_v29 }
 0x105   : > { %v1506_v40 = vadd.f32 %v1505_v37, %v1504_v30  ;;  %916 = vst.msk [vmem:[%s1945_s12 + $0x8] sm:$0xf] %vm913_vm2, %v1395_v32  ;;  %v1459_v43 = vpop.f32.mrf.mxu0  ;;  %v1507_v44 = vpop.f32.mrf.mxu1 }
 0x106   : > { %vm692_vm7 = vcmp.ge.f32.partialorder %v574_v34, 0.0  ;;  %v724_v41 = vmul.f32 0.01, %v574_v34  ;;  %vm708_vm8 = vcmp.ge.f32.partialorder %v638_v35, 0.0  ;;  %v740_v42 = vmul.f32 0.01, %v638_v35 }
 0x107   : > { %932 = vst.msk [vmem:[%s1945_s12 + $0x48] sm:$0xf] %vm913_vm2, %v1411_v38  ;;  %v579_v45 = vadd.f32 %v1458_v39, %v1938_v50  ;;  %v643_v46 = vadd.f32 %v1506_v40, %v1938_v50  ;;  %v1460_v49 = vpop.f32.mrf.mxu0  ;;  %v1508_v51 = vpop.f32.mrf.mxu1 }
 0x108   : > { %v756_v47 = vsel %vm692_vm7, %v574_v34, %v724_v41  ;;  %v772_v48 = vsel %vm708_vm8, %v638_v35, %v740_v42  ;;  %v1461_v56 = vadd.f32 %v1460_v49, %v1459_v43  ;;  %v1509_v57 = vadd.f32 %v1508_v51, %v1507_v44 }
 0x109   : > { %v1396_v52 = vpack.c.bf16 %v756_v47, %v756_v47  ;;  %v1412_v53 = vpack.c.bf16 %v772_v48, %v772_v48  ;;  %vm693_vm9 = vcmp.ge.f32.partialorder %v579_v45, 0.0  ;;  %v725_v54 = vmul.f32 0.01, %v579_v45  ;;  %v1462_v58 = vpop.f32.mrf.mxu0  ;;  %v1510_v59 = vpop.f32.mrf.mxu1 }
 0x10a   : > { %vm709_vm10 = vcmp.ge.f32.partialorder %v643_v46, 0.0  ;;  %v741_v55 = vmul.f32 0.01, %v643_v46  ;;  %v582_v63 = vadd.f32 %v1461_v56, %v1938_v50  ;;  %v646_v0 = vadd.f32 %v1509_v57, %v1938_v50 }
 0x10b   : > { %917 = vst.msk [vmem:[%s1945_s12 + $0xc] sm:$0xf] %vm913_vm2, %v1396_v52  ;;  %933 = vst.msk [vmem:[%s1945_s12 + $0x4c] sm:$0xf] %vm913_vm2, %v1412_v53  ;;  %v757_v60 = vsel %vm693_vm9, %v579_v45, %v725_v54  ;;  %v1463_v1 = vpop.f32.mrf.mxu0  ;;  %v1511_v2 = vpop.f32.mrf.mxu1 }
 0x10c   : > { %v1397_v61 = vpack.c.bf16 %v757_v60, %v757_v60  ;;  %v773_v62 = vsel %vm709_vm10, %v643_v46, %v741_v55  ;;  %v1464_v4 = vadd.f32 %v1463_v1, %v1462_v58  ;;  %v1512_v5 = vadd.f32 %v1511_v2, %v1510_v59 }
 0x10d   : > { %v1413_v3 = vpack.c.bf16 %v773_v62, %v773_v62  ;;  %vm694_vm11 = vcmp.ge.f32.partialorder %v582_v63, 0.0  ;;  %v726_v6 = vmul.f32 0.01, %v582_v63  ;;  %vm710_vm12 = vcmp.ge.f32.partialorder %v646_v0, 0.0  ;;  %v1465_v8 = vpop.f32.mrf.mxu0  ;;  %v1513_v9 = vpop.f32.mrf.mxu1 }
 0x10e   : > { %918 = vst.msk [vmem:[%s1945_s12 + $0x10] sm:$0xf] %vm913_vm2, %v1397_v61  ;;  %v742_v7 = vmul.f32 0.01, %v646_v0  ;;  %v587_v10 = vadd.f32 %v1464_v4, %v1938_v50  ;;  %v651_v11 = vadd.f32 %v1512_v5, %v1938_v50 }
 0x10f   : > { %934 = vst.msk [vmem:[%s1945_s12 + $0x50] sm:$0xf] %vm913_vm2, %v1413_v3  ;;  %v758_v12 = vsel %vm694_vm11, %v582_v63, %v726_v6  ;;  %v1466_v14 = vpop.f32.mrf.mxu0  ;;  %v1514_v15 = vpop.f32.mrf.mxu1 }
 0x110   : > { %v774_v13 = vsel %vm710_vm12, %v646_v0, %v742_v7  ;;  %v1398_v16 = vpack.c.bf16 %v758_v12, %v758_v12  ;;  %vm695_vm13 = vcmp.ge.f32.partialorder %v587_v10, 0.0  ;;  %v727_v18 = vmul.f32 0.01, %v587_v10 }
 0x111   : > { %v1414_v17 = vpack.c.bf16 %v774_v13, %v774_v13  ;;  %vm711_vm14 = vcmp.ge.f32.partialorder %v651_v11, 0.0  ;;  %v743_v19 = vmul.f32 0.01, %v651_v11  ;;  %v1467_v20 = vadd.f32 %v1466_v14, %v1465_v8  ;;  %v1468_v22 = vpop.f32.mrf.mxu0  ;;  %v1516_v23 = vpop.f32.mrf.mxu1 }
 0x112   : > { %v1515_v21 = vadd.f32 %v1514_v15, %v1513_v9  ;;  %919 = vst.msk [vmem:[%s1945_s12 + $0x14] sm:$0xf] %vm913_vm2, %v1398_v16  ;;  %v759_v24 = vsel %vm695_vm13, %v587_v10, %v727_v18 }
 0x113   : > { %935 = vst.msk [vmem:[%s1945_s12 + $0x54] sm:$0xf] %vm913_vm2, %v1414_v17  ;;  %v1399_v25 = vpack.c.bf16 %v759_v24, %v759_v24  ;;  %v775_v26 = vsel %vm711_vm14, %v651_v11, %v743_v19  ;;  %v590_v27 = vadd.f32 %v1467_v20, %v1938_v50  ;;  %v1469_v29 = vpop.f32.mrf.mxu0  ;;  %v1517_v30 = vpop.f32.mrf.mxu1 }
 0x114   : > { %v654_v28 = vadd.f32 %v1515_v21, %v1938_v50  ;;  %v1415_v31 = vpack.c.bf16 %v775_v26, %v775_v26  ;;  %v1470_v32 = vadd.f32 %v1469_v29, %v1468_v22  ;;  %v1518_v33 = vadd.f32 %v1517_v30, %v1516_v23 }
 0x115   : > { %920 = vst.msk [vmem:[%s1945_s12 + $0x18] sm:$0xf] %vm913_vm2, %v1399_v25  ;;  %vm696_vm15 = vcmp.ge.f32.partialorder %v590_v27, 0.0  ;;  %v728_v34 = vmul.f32 0.01, %v590_v27  ;;  %v1471_v36 = vpop.f32.mrf.mxu0  ;;  %v1519_v37 = vpop.f32.mrf.mxu1 }
 0x116   : > { %vm712_vm0 = vcmp.ge.f32.partialorder %v654_v28, 0.0  ;;  %v744_v35 = vmul.f32 0.01, %v654_v28  ;;  %936 = vst.msk [vmem:[%s1945_s12 + $0x58] sm:$0xf] %vm913_vm2, %v1415_v31  ;;  %v595_v38 = vadd.f32 %v1470_v32, %v1938_v50  ;;  %v659_v39 = vadd.f32 %v1518_v33, %v1938_v50 }
 0x117   : > { %v760_v40 = vsel %vm696_vm15, %v590_v27, %v728_v34  ;;  %v1472_v42 = vpop.f32.mrf.mxu0  ;;  %v1520_v43 = vpop.f32.mrf.mxu1 }
 0x118   : > { %v776_v41 = vsel %vm712_vm0, %v654_v28, %v744_v35  ;;  %v1400_v44 = vpack.c.bf16 %v760_v40, %v760_v40  ;;  %vm697_vm1 = vcmp.ge.f32.partialorder %v595_v38, 0.0  ;;  %v729_v46 = vmul.f32 0.01, %v595_v38 }
 0x119   : > { %v1416_v45 = vpack.c.bf16 %v776_v41, %v776_v41  ;;  %vm713_vm3 = vcmp.ge.f32.partialorder %v659_v39, 0.0  ;;  %v745_v47 = vmul.f32 0.01, %v659_v39  ;;  %v1473_v48 = vadd.f32 %v1472_v42, %v1471_v36  ;;  %v1474_v51 = vpop.f32.mrf.mxu0  ;;  %v1522_v52 = vpop.f32.mrf.mxu1 }
 0x11a   : > { %v1521_v49 = vadd.f32 %v1520_v43, %v1519_v37  ;;  %921 = vst.msk [vmem:[%s1945_s12 + $0x1c] sm:$0xf] %vm913_vm2, %v1400_v44  ;;  %v761_v53 = vsel %vm697_vm1, %v595_v38, %v729_v46 }
 0x11b   : > { %937 = vst.msk [vmem:[%s1945_s12 + $0x5c] sm:$0xf] %vm913_vm2, %v1416_v45  ;;  %v1401_v54 = vpack.c.bf16 %v761_v53, %v761_v53  ;;  %v777_v55 = vsel %vm713_vm3, %v659_v39, %v745_v47  ;;  %v598_v56 = vadd.f32 %v1473_v48, %v1938_v50  ;;  %v1475_v58 = vpop.f32.mrf.mxu0  ;;  %v1523_v59 = vpop.f32.mrf.mxu1 }
 0x11c   : > { %v662_v57 = vadd.f32 %v1521_v49, %v1938_v50  ;;  %v1417_v60 = vpack.c.bf16 %v777_v55, %v777_v55  ;;  %v1476_v61 = vadd.f32 %v1475_v58, %v1474_v51  ;;  %v1524_v62 = vadd.f32 %v1523_v59, %v1522_v52 }
 0x11d   : > { %922 = vst.msk [vmem:[%s1945_s12 + $0x20] sm:$0xf] %vm913_vm2, %v1401_v54  ;;  %vm698_vm4 = vcmp.ge.f32.partialorder %v598_v56, 0.0  ;;  %v730_v63 = vmul.f32 0.01, %v598_v56  ;;  %v1477_v1 = vpop.f32.mrf.mxu0  ;;  %v1525_v2 = vpop.f32.mrf.mxu1 }
 0x11e   : > { %vm714_vm5 = vcmp.ge.f32.partialorder %v662_v57, 0.0  ;;  %v746_v0 = vmul.f32 0.01, %v662_v57  ;;  %938 = vst.msk [vmem:[%s1945_s12 + $0x60] sm:$0xf] %vm913_vm2, %v1417_v60  ;;  %v603_v3 = vadd.f32 %v1476_v61, %v1938_v50  ;;  %v667_v4 = vadd.f32 %v1524_v62, %v1938_v50 }
 0x11f   : > { %v762_v5 = vsel %vm698_vm4, %v598_v56, %v730_v63  ;;  %v1478_v7 = vpop.f32.mrf.mxu0  ;;  %v1526_v8 = vpop.f32.mrf.mxu1 }
 0x120   : > { %v778_v6 = vsel %vm714_vm5, %v662_v57, %v746_v0  ;;  %v1402_v9 = vpack.c.bf16 %v762_v5, %v762_v5  ;;  %vm699_vm6 = vcmp.ge.f32.partialorder %v603_v3, 0.0  ;;  %v731_v11 = vmul.f32 0.01, %v603_v3 }
 0x121   : > { %v1418_v10 = vpack.c.bf16 %v778_v6, %v778_v6  ;;  %vm715_vm7 = vcmp.ge.f32.partialorder %v667_v4, 0.0  ;;  %v747_v12 = vmul.f32 0.01, %v667_v4  ;;  %v1479_v13 = vadd.f32 %v1478_v7, %v1477_v1  ;;  %v1480_v15 = vpop.f32.mrf.mxu0  ;;  %v1528_v16 = vpop.f32.mrf.mxu1 }
 0x122   : > { %v1527_v14 = vadd.f32 %v1526_v8, %v1525_v2  ;;  %923 = vst.msk [vmem:[%s1945_s12 + $0x24] sm:$0xf] %vm913_vm2, %v1402_v9  ;;  %v763_v17 = vsel %vm699_vm6, %v603_v3, %v731_v11 }
 0x123   : > { %939 = vst.msk [vmem:[%s1945_s12 + $0x64] sm:$0xf] %vm913_vm2, %v1418_v10  ;;  %v1403_v18 = vpack.c.bf16 %v763_v17, %v763_v17  ;;  %v779_v19 = vsel %vm715_vm7, %v667_v4, %v747_v12  ;;  %v606_v20 = vadd.f32 %v1479_v13, %v1938_v50  ;;  %v1481_v22 = vpop.f32.mrf.mxu0  ;;  %v1529_v23 = vpop.f32.mrf.mxu1 }
 0x124   : > { %v670_v21 = vadd.f32 %v1527_v14, %v1938_v50  ;;  %v1419_v24 = vpack.c.bf16 %v779_v19, %v779_v19  ;;  %v1482_v25 = vadd.f32 %v1481_v22, %v1480_v15  ;;  %v1530_v26 = vadd.f32 %v1529_v23, %v1528_v16 }
 0x125   : > { %924 = vst.msk [vmem:[%s1945_s12 + $0x28] sm:$0xf] %vm913_vm2, %v1403_v18  ;;  %vm700_vm8 = vcmp.ge.f32.partialorder %v606_v20, 0.0  ;;  %v732_v27 = vmul.f32 0.01, %v606_v20  ;;  %v1483_v29 = vpop.f32.mrf.mxu0  ;;  %v1531_v30 = vpop.f32.mrf.mxu1 }
 0x126   : > { %vm716_vm9 = vcmp.ge.f32.partialorder %v670_v21, 0.0  ;;  %v748_v28 = vmul.f32 0.01, %v670_v21  ;;  %940 = vst.msk [vmem:[%s1945_s12 + $0x68] sm:$0xf] %vm913_vm2, %v1419_v24  ;;  %v611_v31 = vadd.f32 %v1482_v25, %v1938_v50  ;;  %v675_v32 = vadd.f32 %v1530_v26, %v1938_v50 }
 0x127   : > { %v764_v33 = vsel %vm700_vm8, %v606_v20, %v732_v27  ;;  %v1484_v35 = vpop.f32.mrf.mxu0  ;;  %v1532_v36 = vpop.f32.mrf.mxu1 }
 0x128   : > { %v780_v34 = vsel %vm716_vm9, %v670_v21, %v748_v28  ;;  %v1404_v37 = vpack.c.bf16 %v764_v33, %v764_v33  ;;  %vm701_vm10 = vcmp.ge.f32.partialorder %v611_v31, 0.0  ;;  %v733_v39 = vmul.f32 0.01, %v611_v31 }
 0x129   : > { %v1420_v38 = vpack.c.bf16 %v780_v34, %v780_v34  ;;  %vm717_vm11 = vcmp.ge.f32.partialorder %v675_v32, 0.0  ;;  %v749_v40 = vmul.f32 0.01, %v675_v32  ;;  %v1485_v41 = vadd.f32 %v1484_v35, %v1483_v29  ;;  %v1486_v43 = vpop.f32.mrf.mxu0  ;;  %v1534_v44 = vpop.f32.mrf.mxu1 }
 0x12a   : > { %v1533_v42 = vadd.f32 %v1532_v36, %v1531_v30  ;;  %925 = vst.msk [vmem:[%s1945_s12 + $0x2c] sm:$0xf] %vm913_vm2, %v1404_v37  ;;  %v765_v45 = vsel %vm701_vm10, %v611_v31, %v733_v39 }
 0x12b   : > { %941 = vst.msk [vmem:[%s1945_s12 + $0x6c] sm:$0xf] %vm913_vm2, %v1420_v38  ;;  %v1405_v46 = vpack.c.bf16 %v765_v45, %v765_v45  ;;  %v781_v47 = vsel %vm717_vm11, %v675_v32, %v749_v40  ;;  %v614_v48 = vadd.f32 %v1485_v41, %v1938_v50  ;;  %v1487_v51 = vpop.f32.mrf.mxu0  ;;  %v1535_v52 = vpop.f32.mrf.mxu1 }
 0x12c   : > { %v678_v49 = vadd.f32 %v1533_v42, %v1938_v50  ;;  %v1421_v53 = vpack.c.bf16 %v781_v47, %v781_v47  ;;  %v1488_v54 = vadd.f32 %v1487_v51, %v1486_v43  ;;  %v1536_v55 = vadd.f32 %v1535_v52, %v1534_v44 }
 0x12d   : > { %926 = vst.msk [vmem:[%s1945_s12 + $0x30] sm:$0xf] %vm913_vm2, %v1405_v46  ;;  %vm702_vm12 = vcmp.ge.f32.partialorder %v614_v48, 0.0  ;;  %v734_v56 = vmul.f32 0.01, %v614_v48  ;;  %v1489_v58 = vpop.f32.mrf.mxu0  ;;  %v1537_v59 = vpop.f32.mrf.mxu1 }
 0x12e   : > { %vm718_vm13 = vcmp.ge.f32.partialorder %v678_v49, 0.0  ;;  %v750_v57 = vmul.f32 0.01, %v678_v49  ;;  %942 = vst.msk [vmem:[%s1945_s12 + $0x70] sm:$0xf] %vm913_vm2, %v1421_v53  ;;  %v619_v60 = vadd.f32 %v1488_v54, %v1938_v50  ;;  %v683_v61 = vadd.f32 %v1536_v55, %v1938_v50 }
 0x12f   : > { %v766_v62 = vsel %vm702_vm12, %v614_v48, %v734_v56  ;;  %v1490_v0 = vpop.f32.mrf.mxu0  ;;  %v1538_v1 = vpop.f32.mrf.mxu1 }
 0x130   : > { %v782_v63 = vsel %vm718_vm13, %v678_v49, %v750_v57  ;;  %v1406_v2 = vpack.c.bf16 %v766_v62, %v766_v62  ;;  %vm703_vm14 = vcmp.ge.f32.partialorder %v619_v60, 0.0  ;;  %v735_v4 = vmul.f32 0.01, %v619_v60 }
 0x131   : > { %v1422_v3 = vpack.c.bf16 %v782_v63, %v782_v63  ;;  %vm719_vm15 = vcmp.ge.f32.partialorder %v683_v61, 0.0  ;;  %v751_v5 = vmul.f32 0.01, %v683_v61  ;;  %v1491_v6 = vadd.f32 %v1490_v0, %v1489_v58 }
 0x132   : > { %v1539_v7 = vadd.f32 %v1538_v1, %v1537_v59  ;;  %927 = vst.msk [vmem:[%s1945_s12 + $0x34] sm:$0xf] %vm913_vm2, %v1406_v2  ;;  %v767_v8 = vsel %vm703_vm14, %v619_v60, %v735_v4 }
 0x133   : > { %943 = vst.msk [vmem:[%s1945_s12 + $0x74] sm:$0xf] %vm913_vm2, %v1422_v3  ;;  %v1407_v9 = vpack.c.bf16 %v767_v8, %v767_v8  ;;  %v783_v10 = vsel %vm719_vm15, %v683_v61, %v751_v5  ;;  %v622_v11 = vadd.f32 %v1491_v6, %v1938_v50 }
 0x134   : > { %v686_v12 = vadd.f32 %v1539_v7, %v1938_v50  ;;  %v1423_v13 = vpack.c.bf16 %v783_v10, %v783_v10 }
 0x135   : > { %928 = vst.msk [vmem:[%s1945_s12 + $0x38] sm:$0xf] %vm913_vm2, %v1407_v9  ;;  %vm704_vm0 = vcmp.ge.f32.partialorder %v622_v11, 0.0  ;;  %v736_v14 = vmul.f32 0.01, %v622_v11 }
 0x136   : > { %vm720_vm1 = vcmp.ge.f32.partialorder %v686_v12, 0.0  ;;  %v752_v15 = vmul.f32 0.01, %v686_v12  ;;  %944 = vst.msk [vmem:[%s1945_s12 + $0x78] sm:$0xf] %vm913_vm2, %v1423_v13 }
 0x137   : > { %v768_v16 = vsel %vm704_vm0, %v622_v11, %v736_v14  ;;  %952 = sbr.rel (!%p1841_p4) target bundleno = 376 (0x178), region = 36 }
 0x138   : > { %v784_v17 = vsel %vm720_vm1, %v686_v12, %v752_v15  ;;  %v1408_v18 = vpack.c.bf16 %v768_v16, %v768_v16 }
 0x139   : > { %v1424_v19 = vpack.c.bf16 %v784_v17, %v784_v17 }
 0x13a   : > { %929 = vst.msk [vmem:[%s1945_s12 + $0x3c] sm:$0xf] %vm913_vm2, %v1408_v18 }
 0x13b   : > { %945 = vst.msk [vmem:[%s1945_s12 + $0x7c] sm:$0xf] %vm913_vm2, %v1424_v19 }
 0x13c   : > { %s2186_s22 = smov (!%p955_p8, %s954_s22), 32 }
 0x13d   : > { %s1377_s28 = sshll.u32 %s2186_s22, 6 }
 0x13e   : > { %p1380_p9 = scmp.eq.s32.totalorder %s1377_s28, 0 }
 0x13f   : > { %s2052_s29 = sshrl.u32 (!%p1380_p9), %s2186_s22, 5 }
 0x140   : > { %963 = sbr.rel (%p1380_p9) target bundleno = 376 (0x178), region = 40  ;;  %p1381_p10 = scmp.le.s32.totalorder (!%p1380_p9), %s2052_s29, 0 }
 0x145   : > { %1242 = sbr.rel (%p1381_p10) target bundleno = 359 (0x167), region = 112  ;;  %s2179_s15 = smov (!%p1381_p10), %s2046_s27 }
 0x146   : > { %s2180_s20 = smov (!%p1381_p10), %s1945_s12  ;;  %s2061_s23 = smov (!%p1381_p10), 0  }
 0x147   : > { %s2063_s30 = smov (!%p1381_p10), 0  }
 0x14a LB: >> { %v980_v50 = vld [vmem:[%s1770_s20] sm:$0xf]  ;;  %v982_v20 = vld [vmem:[%s1770_s20 + $0x4] sm:$0xf]  ;;  %v984_v21 = vld [vmem:[%s1770_s20 + $0x8] sm:$0xf]  ;;  %s1778_s30 = sphi %s2063_s30, %s974_s30   ;;  %s1774_s23 = sphi %s2061_s23, %s2181_s23   ;;  %s1770_s20 = sphi %s2180_s20, %s1049_s20   ;;  %s1766_s15 = sphi %s2179_s15, %s1050_s15  }
 0x14b   : >> { %981 = vst [vmem:[%s1766_s15] sm:$0xf] %v980_v50  ;;  %983 = vst [vmem:[%s1766_s15 + $0x4] sm:$0xf] %v982_v20  ;;  %v986_v22 = vld [vmem:[%s1770_s20 + $0xc] sm:$0xf]  ;;  %s1044_s4 = sadd.s32 1, %s1774_s23 }
 0x14c   : >> { %985 = vst [vmem:[%s1766_s15 + $0x8] sm:$0xf] %v984_v21  ;;  %v988_v23 = vld [vmem:[%s1770_s20 + $0x10] sm:$0xf]  ;;  %v990_v24 = vld [vmem:[%s1770_s20 + $0x14] sm:$0xf]  ;;  %p1045_p11 = scmp.ge.s32.totalorder %s1044_s4, %s2052_s29 }
 0x14d   : >> { %987 = vst [vmem:[%s1766_s15 + $0xc] sm:$0xf] %v986_v22  ;;  %989 = vst [vmem:[%s1766_s15 + $0x10] sm:$0xf] %v988_v23  ;;  %v992_v25 = vld [vmem:[%s1770_s20 + $0x18] sm:$0xf] }
 0x14e   : >> { %991 = vst [vmem:[%s1766_s15 + $0x14] sm:$0xf] %v990_v24  ;;  %v994_v26 = vld [vmem:[%s1770_s20 + $0x1c] sm:$0xf]  ;;  %v996_v27 = vld [vmem:[%s1770_s20 + $0x20] sm:$0xf] }
 0x14f   : >> { %993 = vst [vmem:[%s1766_s15 + $0x18] sm:$0xf] %v992_v25  ;;  %995 = vst [vmem:[%s1766_s15 + $0x1c] sm:$0xf] %v994_v26  ;;  %v998_v28 = vld [vmem:[%s1770_s20 + $0x24] sm:$0xf] }
 0x150   : >> { %997 = vst [vmem:[%s1766_s15 + $0x20] sm:$0xf] %v996_v27  ;;  %v1000_v29 = vld [vmem:[%s1770_s20 + $0x28] sm:$0xf]  ;;  %v1002_v30 = vld [vmem:[%s1770_s20 + $0x2c] sm:$0xf] }
 0x151   : >> { %999 = vst [vmem:[%s1766_s15 + $0x24] sm:$0xf] %v998_v28  ;;  %1001 = vst [vmem:[%s1766_s15 + $0x28] sm:$0xf] %v1000_v29  ;;  %v1004_v31 = vld [vmem:[%s1770_s20 + $0x30] sm:$0xf] }
 0x152   : >> { %1003 = vst [vmem:[%s1766_s15 + $0x2c] sm:$0xf] %v1002_v30  ;;  %v1006_v32 = vld [vmem:[%s1770_s20 + $0x34] sm:$0xf]  ;;  %v1008_v33 = vld [vmem:[%s1770_s20 + $0x38] sm:$0xf] }
 0x153   : >> { %1005 = vst [vmem:[%s1766_s15 + $0x30] sm:$0xf] %v1004_v31  ;;  %1007 = vst [vmem:[%s1766_s15 + $0x34] sm:$0xf] %v1006_v32  ;;  %v1010_v34 = vld [vmem:[%s1770_s20 + $0x3c] sm:$0xf] }
 0x154   : >> { %1009 = vst [vmem:[%s1766_s15 + $0x38] sm:$0xf] %v1008_v33  ;;  %v1012_v35 = vld [vmem:[%s1770_s20 + $0x40] sm:$0xf]  ;;  %v1014_v36 = vld [vmem:[%s1770_s20 + $0x44] sm:$0xf] }
 0x155   : >> { %1011 = vst [vmem:[%s1766_s15 + $0x3c] sm:$0xf] %v1010_v34  ;;  %1013 = vst [vmem:[%s1766_s15 + $0x40] sm:$0xf] %v1012_v35  ;;  %v1016_v37 = vld [vmem:[%s1770_s20 + $0x48] sm:$0xf] }
 0x156   : >> { %1015 = vst [vmem:[%s1766_s15 + $0x44] sm:$0xf] %v1014_v36  ;;  %v1018_v38 = vld [vmem:[%s1770_s20 + $0x4c] sm:$0xf]  ;;  %v1020_v39 = vld [vmem:[%s1770_s20 + $0x50] sm:$0xf] }
 0x157   : >> { %1017 = vst [vmem:[%s1766_s15 + $0x48] sm:$0xf] %v1016_v37  ;;  %1019 = vst [vmem:[%s1766_s15 + $0x4c] sm:$0xf] %v1018_v38  ;;  %v1022_v40 = vld [vmem:[%s1770_s20 + $0x54] sm:$0xf] }
 0x158   : >> { %1021 = vst [vmem:[%s1766_s15 + $0x50] sm:$0xf] %v1020_v39  ;;  %v1024_v41 = vld [vmem:[%s1770_s20 + $0x58] sm:$0xf]  ;;  %v1026_v42 = vld [vmem:[%s1770_s20 + $0x5c] sm:$0xf] }
 0x159   : >> { %1023 = vst [vmem:[%s1766_s15 + $0x54] sm:$0xf] %v1022_v40  ;;  %1025 = vst [vmem:[%s1766_s15 + $0x58] sm:$0xf] %v1024_v41  ;;  %v1028_v43 = vld [vmem:[%s1770_s20 + $0x60] sm:$0xf] }
 0x15a   : >> { %1027 = vst [vmem:[%s1766_s15 + $0x5c] sm:$0xf] %v1026_v42  ;;  %v1030_v44 = vld [vmem:[%s1770_s20 + $0x64] sm:$0xf]  ;;  %v1032_v45 = vld [vmem:[%s1770_s20 + $0x68] sm:$0xf] }
 0x15b   : >> { %1029 = vst [vmem:[%s1766_s15 + $0x60] sm:$0xf] %v1028_v43  ;;  %1031 = vst [vmem:[%s1766_s15 + $0x64] sm:$0xf] %v1030_v44  ;;  %v1034_v46 = vld [vmem:[%s1770_s20 + $0x6c] sm:$0xf] }
 0x15c   : >> { %1033 = vst [vmem:[%s1766_s15 + $0x68] sm:$0xf] %v1032_v45  ;;  %v1036_v47 = vld [vmem:[%s1770_s20 + $0x70] sm:$0xf]  ;;  %v1038_v48 = vld [vmem:[%s1770_s20 + $0x74] sm:$0xf] }
 0x15d   : >> { %1035 = vst [vmem:[%s1766_s15 + $0x6c] sm:$0xf] %v1034_v46  ;;  %1037 = vst [vmem:[%s1766_s15 + $0x70] sm:$0xf] %v1036_v47  ;;  %v1040_v49 = vld [vmem:[%s1770_s20 + $0x78] sm:$0xf] }
 0x15e   : >> { %1039 = vst [vmem:[%s1766_s15 + $0x74] sm:$0xf] %v1038_v48  ;;  %v1042_v51 = vld [vmem:[%s1770_s20 + $0x7c] sm:$0xf]  ;;  %1041 = vst [vmem:[%s1766_s15 + $0x78] sm:$0xf] %v1040_v49 }
 0x15f   : >> { %1043 = vst [vmem:[%s1766_s15 + $0x7c] sm:$0xf] %v1042_v51  ;;  %s2188_s4 = smov (%p1045_p11, %s1044_s4), 0  ;;  %s974_s30 = sadd.s32 1, %s1778_s30  }
 0x160   : >> { %s1382_s5 = sshll.u32 %s2188_s4, 7  ;;  %p973_p12 = scmp.ge.s32.totalorder %s974_s30, %s2052_s29 }
 0x161   : >> { %s1049_s20 = scalar_lea.vmem %s1945_s12, %s1382_s5 [#allocation2]   ;;  %s1050_s15 = scalar_lea.vmem %s2046_s27, %s1382_s5  }
 0x162   : >> { %s2181_s23 = smov %s2188_s4  ;;  %976 = sbr.rel (!%p973_p12) target bundleno = 330 (0x14a), region = 118 }
 0x167 PF: > { %s2156_s6 = sand.u32 31, %s2186_s22   ;;  %s1426_s7 = sshll.u32 %s2052_s29, 7 }
 0x168   : > { %s1055_s8 = scalar_lea.vmem %s1945_s12, %s1426_s7 [#allocation2]   ;;  %s1057_s9 = scalar_lea.vmem %s2046_s27, %s1426_s7  }
 0x169   : > { %p1387_p13 = scmp.le.s32.totalorder %s2156_s6, 0 }
 0x16a   : > { %s1780_s10 = smov (!%p1387_p13), %s1057_s9   ;;  %s1784_s11 = smov (!%p1387_p13), %s1055_s8  }
 0x16b   : > { %1256 = sbr.rel (%p1387_p13) target bundleno = 376 (0x178), region = 123  ;;  %s1788_s14 = smov (!%p1387_p13), 0  }
 0x16c   : > { %s1792_s17 = smov (!%p1387_p13), 0  }
 0x170 LB: >> { %v1067_v52 = vld [vmem:[%s1786_s11] sm:$0xf]  ;;  %s1069_s18 = sadd.s32 1, %s1790_s14  ;;  %s1061_s17 = sadd.s32 1, %s1794_s17   ;;  %s1794_s17 = sphi %s1792_s17, %s1061_s17   ;;  %s1790_s14 = sphi %s1788_s14, %s1789_s14   ;;  %s1786_s11 = sphi %s1784_s11, %s1074_s11   ;;  %s1782_s10 = sphi %s1780_s10, %s1075_s10  }
 0x171   : >> { %1068 = vst [vmem:[%s1782_s10] sm:$0xf] %v1067_v52  ;;  %p1070_p0 = scmp.ge.s32.totalorder %s1069_s18, %s2156_s6  ;;  %p1060_p1 = scmp.ge.s32.totalorder %s1061_s17, %s2156_s6 }
 0x173   : >> { %s2190_s18 = smov (%p1070_p0, %s1069_s18), 0  ;;  %1063 = sbr.rel (!%p1060_p1) target bundleno = 368 (0x170), region = 129 }
 0x174   : >> { %s1388_s21 = sshll.u32 %s2190_s18, 2  ;;  %s1789_s14 = smov %s2190_s18  }
 0x175   : >> { %s1074_s11 = scalar_lea.vmem %s1055_s8, %s1388_s21 [#allocation2]   ;;  %s1075_s10 = scalar_lea.vmem %s1057_s9, %s1388_s21  }
 0x178 PF: > { %p10_p2 = scmp.ge.s32.totalorder %s1831_s16, 6   ;;  %s2182_s12 = smov %s1758_s13 }
 0x179   : > { %s2183_s13 = smov %s1839_s19  ;;  %s2184_s14 = smov %s1831_s16 }
 0x17a   :  { %12 = sbr.rel (!%p10_p2) target bundleno = 2 (0x2), region = 140 }

// kernel: cnn_actor_critic_forward.6
= control target key start
LH: loop header
LB: loop body
LE: loop exit
PB: predicated region body
PF: predicated region fallthrough
CT: control target
= control target key end

     0   :  { %vm922_vm1 = vcmask 519168   ;;  %s1679_s1 = inlined_call_operand.vmem [shape: bf16[512,64], index: 1, kind: input, shape index: {}]   ;;  %s1680_s0 = inlined_call_operand.vmem [shape: bf16[162,512], index: 0, kind: input, shape index: {}]   ;;  %s1681_s2 = inlined_call_operand.vmem [shape: f32[1,64], index: 2, kind: input, shape index: {}]   ;;  %s1682_s3 = inlined_call_operand.vmem [shape: bf16[162,64], index: 3, kind: output, shape index: {}]  }
   0x1   :  { %v1232_v0 = vld [vmem:[%s1679_s1 + $0x78] sm:$0xff]   ;;  %v1236_v4 = vld [vmem:[%s1679_s1 + $0x70] sm:$0xff]   ;;  %v1240_v8 = vld [vmem:[%s1679_s1 + $0x68] sm:$0xff]  }
   0x2   :  { %v1233_v1 = vld [vmem:[%s1679_s1 + $0xf8] sm:$0xff]   ;;  %1068 = vmatprep.subr.bf16.mxu0 %v1232_v0  ;;  %v1237_v5 = vld [vmem:[%s1679_s1 + $0xf0] sm:$0xff]   ;;  %v1241_v9 = vld [vmem:[%s1679_s1 + $0xe8] sm:$0xff]  }
   0x3   :  { %v1234_v2 = vld [vmem:[%s1679_s1 + $0x38] sm:$0xff]   ;;  %1150 = vmatprep.subr.bf16.mxu1 %v1233_v1  ;;  %v1238_v6 = vld [vmem:[%s1679_s1 + $0x30] sm:$0xff]   ;;  %v1242_v10 = vld [vmem:[%s1679_s1 + $0x28] sm:$0xff]  }
   0x4   :  { %v1235_v3 = vld [vmem:[%s1679_s1 + $0xb8] sm:$0xff]   ;;  %1069 = vmatpush3.bf16.msra.mxu0 %v1234_v2  ;;  %v1239_v7 = vld [vmem:[%s1679_s1 + $0xb0] sm:$0xff]   ;;  %v1243_v11 = vld [vmem:[%s1679_s1 + $0xa8] sm:$0xff]  }
   0x5   :  { %1151 = vmatpush3.bf16.msra.mxu1 %v1235_v3  ;;  %1070 = vmatprep.subr.bf16.mxu0 %v1236_v4  ;;  %v1244_v12 = vld [vmem:[%s1679_s1 + $0x60] sm:$0xff]   ;;  %v1248_v16 = vld [vmem:[%s1679_s1 + $0x58] sm:$0xff]   ;;  %v1252_v20 = vld [vmem:[%s1679_s1 + $0x50] sm:$0xff]  }
   0x6   :  { %1152 = vmatprep.subr.bf16.mxu1 %v1237_v5  ;;  %v1245_v13 = vld [vmem:[%s1679_s1 + $0xe0] sm:$0xff]   ;;  %v1249_v17 = vld [vmem:[%s1679_s1 + $0xd8] sm:$0xff]   ;;  %v1253_v21 = vld [vmem:[%s1679_s1 + $0xd0] sm:$0xff]  }
   0x7   :  { %v1246_v14 = vld [vmem:[%s1679_s1 + $0x20] sm:$0xff]   ;;  %v1250_v18 = vld [vmem:[%s1679_s1 + $0x18] sm:$0xff]   ;;  %v1254_v22 = vld [vmem:[%s1679_s1 + $0x10] sm:$0xff]  }
   0x8   :  { %1071 = vmatpush3.bf16.msra.mxu0 %v1238_v6  ;;  %v1247_v15 = vld [vmem:[%s1679_s1 + $0xa0] sm:$0xff]   ;;  %v1251_v19 = vld [vmem:[%s1679_s1 + $0x98] sm:$0xff]   ;;  %v1255_v23 = vld [vmem:[%s1679_s1 + $0x90] sm:$0xff]  }
   0x9   :  { %1153 = vmatpush3.bf16.msra.mxu1 %v1239_v7  ;;  %1072 = vmatprep.subr.bf16.mxu0 %v1240_v8  ;;  %v1256_v24 = vld [vmem:[%s1679_s1 + $0x48] sm:$0xff]   ;;  %v1260_v28 = vld [vmem:[%s1679_s1 + $0x40] sm:$0xff]  }
   0xa   :  { %1154 = vmatprep.subr.bf16.mxu1 %v1241_v9  ;;  %v1257_v25 = vld [vmem:[%s1679_s1 + $0xc8] sm:$0xff]   ;;  %v1261_v29 = vld [vmem:[%s1679_s1 + $0xc0] sm:$0xff]  }
   0xb   :  { %v1258_v26 = vld [vmem:[%s1679_s1 + $0x8] sm:$0xff]   ;;  %v1262_v30 = vld [vmem:[%s1679_s1] sm:$0xff]  }
   0xc   :  { %1073 = vmatpush3.bf16.msra.mxu0 %v1242_v10  ;;  %v1259_v27 = vld [vmem:[%s1679_s1 + $0x88] sm:$0xff]   ;;  %v1263_v31 = vld [vmem:[%s1679_s1 + $0x80] sm:$0xff]  }
   0xd   :  { %1155 = vmatpush3.bf16.msra.mxu1 %v1243_v11  ;;  %1074 = vmatprep.subr.bf16.mxu0 %v1244_v12  ;;  %v1264_v32 = vld [vmem:[%s1680_s0] ss:$16 sps:$4 sm:$0xff]   ;;  %v1266_v33 = vld [vmem:[%s1680_s0 + $0x4] ss:$16 sps:$4 sm:$0xff]   ;;  %v1267_v34 = vld [vmem:[%s1680_s0 + $0x8] ss:$16 sps:$4 sm:$0xff]  }
   0xe   :  { %1156 = vmatprep.subr.bf16.mxu1 %v1245_v13  ;;  %v1269_v35 = vld [vmem:[%s1680_s0 + $0xc] ss:$16 sps:$4 sm:$0xff]   ;;  %566 = vmatprep.mubr.bf16.mxu0 %v1266_v33  ;;  %v1270_v36 = vld [vmem:[%s1680_s0 + $0x24] ss:$16 sps:$4 sm:$0xff]   ;;  %v1274_v38 = vld [vmem:[%s1680_s0 + $0x20] ss:$16 sps:$4 sm:$0xff]  }
   0xf   :  { %686 = vmatprep.mubr.bf16.mxu1 %v1269_v35  ;;  %v1272_v37 = vld [vmem:[%s1680_s0 + $0x2c] ss:$16 sps:$4 sm:$0xff]   ;;  %v1275_v39 = vld [vmem:[%s1680_s0 + $0x28] ss:$16 sps:$4 sm:$0xff]   ;;  %v1276_v40 = vld [vmem:[%s1680_s0 + $0x44] ss:$16 sps:$4 sm:$0xff]  }
  0x10   :  { %1075 = vmatpush3.bf16.msra.mxu0 %v1246_v14  ;;  %v1278_v41 = vld [vmem:[%s1680_s0 + $0x4c] ss:$16 sps:$4 sm:$0xff]   ;;  %v1280_v42 = vld [vmem:[%s1680_s0 + $0x40] ss:$16 sps:$4 sm:$0xff]   ;;  %v1281_v43 = vld [vmem:[%s1680_s0 + $0x48] ss:$16 sps:$4 sm:$0xff]  }
  0x11   :  { %1157 = vmatpush3.bf16.msra.mxu1 %v1247_v15  ;;  %1076 = vmatprep.subr.bf16.mxu0 %v1248_v16  ;;  %v1282_v44 = vld [vmem:[%s1680_s0 + $0x64] ss:$16 sps:$4 sm:$0xff]   ;;  %v1284_v45 = vld [vmem:[%s1680_s0 + $0x6c] ss:$16 sps:$4 sm:$0xff]   ;;  %v1286_v46 = vld [vmem:[%s1680_s0 + $0x60] ss:$16 sps:$4 sm:$0xff]  }
  0x12   :  { %1158 = vmatprep.subr.bf16.mxu1 %v1249_v17  ;;  %v1287_v47 = vld [vmem:[%s1680_s0 + $0x68] ss:$16 sps:$4 sm:$0xff]   ;;  %v1288_v48 = vld [vmem:[%s1680_s0 + $0x84] ss:$16 sps:$4 sm:$0xff]   ;;  %v1290_v49 = vld [vmem:[%s1680_s0 + $0x8c] ss:$16 sps:$4 sm:$0xff]  }
  0x13   :  { %v1292_v50 = vld [vmem:[%s1680_s0 + $0x80] ss:$16 sps:$4 sm:$0xff]   ;;  %v1293_v51 = vld [vmem:[%s1680_s0 + $0x88] ss:$16 sps:$4 sm:$0xff]   ;;  %v1294_v52 = vld [vmem:[%s1680_s0 + $0xa4] ss:$16 sps:$4 sm:$0xff]  }
  0x14   :  { %1077 = vmatpush3.bf16.msra.mxu0 %v1250_v18  ;;  %v1296_v53 = vld [vmem:[%s1680_s0 + $0xac] ss:$16 sps:$4 sm:$0xff]   ;;  %v1298_v54 = vld [vmem:[%s1680_s0 + $0xa0] ss:$16 sps:$4 sm:$0xff]   ;;  %v1299_v55 = vld [vmem:[%s1680_s0 + $0xa8] ss:$16 sps:$4 sm:$0xff]  }
  0x15   :  { %1159 = vmatpush3.bf16.msra.mxu1 %v1251_v19  ;;  %1078 = vmatprep.subr.bf16.mxu0 %v1252_v20  ;;  %v1300_v56 = vld [vmem:[%s1680_s0 + $0xc4] ss:$16 sps:$4 sm:$0xff]   ;;  %v1302_v57 = vld [vmem:[%s1680_s0 + $0xcc] ss:$16 sps:$4 sm:$0xff]   ;;  %v1304_v58 = vld [vmem:[%s1680_s0 + $0xc0] ss:$16 sps:$4 sm:$0xff]  }
  0x16   :  { %1160 = vmatprep.subr.bf16.mxu1 %v1253_v21  ;;  %v1305_v59 = vld [vmem:[%s1680_s0 + $0xc8] ss:$16 sps:$4 sm:$0xff]   ;;  %v1306_v60 = vld [vmem:[%s1680_s0 + $0xe4] ss:$16 sps:$4 sm:$0xff]   ;;  %v1308_v61 = vld [vmem:[%s1680_s0 + $0xec] ss:$16 sps:$4 sm:$0xff]  }
  0x17   :  { %v1310_v62 = vld [vmem:[%s1680_s0 + $0xe0] ss:$16 sps:$4 sm:$0xff]   ;;  %v1311_v63 = vld [vmem:[%s1680_s0 + $0xe8] ss:$16 sps:$4 sm:$0xff]   ;;  %v1312_v0 = vld [vmem:[%s1680_s0 + $0x104] ss:$16 sps:$4 sm:$0xff]  }
  0x18   :  { %1079 = vmatpush3.bf16.msra.mxu0 %v1254_v22  ;;  %v1314_v1 = vld [vmem:[%s1680_s0 + $0x10c] ss:$16 sps:$4 sm:$0xff]   ;;  %v1316_v2 = vld [vmem:[%s1680_s0 + $0x100] ss:$16 sps:$4 sm:$0xff]   ;;  %v1317_v3 = vld [vmem:[%s1680_s0 + $0x108] ss:$16 sps:$4 sm:$0xff]  }
  0x19   :  { %1161 = vmatpush3.bf16.msra.mxu1 %v1255_v23  ;;  %1080 = vmatprep.subr.bf16.mxu0 %v1256_v24  ;;  %v1318_v4 = vld [vmem:[%s1680_s0 + $0x124] ss:$16 sps:$4 sm:$0xff]   ;;  %v1320_v5 = vld [vmem:[%s1680_s0 + $0x12c] ss:$16 sps:$4 sm:$0xff]   ;;  %v1322_v8 = vld [vmem:[%s1680_s0 + $0x120] ss:$16 sps:$4 sm:$0xff]  }
  0x1a   :  { %1162 = vmatprep.subr.bf16.mxu1 %v1257_v25  ;;  %v55_v6 = vld [vmem:[%s1680_s0 + $0x140] sm:$0x11]  ;;  %v56_v7 = vld [vmem:[%s1680_s0 + $0x148] sm:$0x11] }
  0x1b   :  { %v1323_v9 = vld [vmem:[%s1680_s0 + $0x128] ss:$16 sps:$4 sm:$0xff]   ;;  %v991_v10 = vcombine.high %v55_v6, %v55_v6  ;;  %v993_v11 = vcombine.high %v56_v7, %v56_v7  ;;  %v990_v12 = vcombine.low %v55_v6, %v55_v6  ;;  %v992_v13 = vcombine.low %v56_v7, %v56_v7  ;;  %v1573_v16 = vld [vmem:[%s1681_s2] ss:$0 sm:$0xff] }
  0x1c   :  { %1081 = vmatpush3.bf16.msra.mxu0 %v1258_v26 }
  0x1d   :  { %1163 = vmatpush3.bf16.msra.mxu1 %v1259_v27  ;;  %1082 = vmatprep.subr.bf16.mxu0 %v1260_v28 }
  0x1e   :  { %1164 = vmatprep.subr.bf16.mxu1 %v1261_v29 }
  0x20   :  { %1083 = vmatpush3.bf16.msra.mxu0 %v1262_v30 }
  0x21   :  { %1165 = vmatpush3.bf16.msra.mxu1 %v1263_v31 }
  0x23   :  { %567 = vmatmul.mubr.bf16.vlgmr.msra.gmra.mxu0 %v1264_v32 }
  0x24   :  { %687 = vmatmul.mubr.bf16.vlgmr.msra.gmra.mxu1 %v1267_v34  ;;  %574 = vmatprep.mubr.bf16.mxu0 %v1270_v36 }
  0x25   :  { %694 = vmatprep.mubr.bf16.mxu1 %v1272_v37 }
  0x2b   :  { %575 = vmatmul.mubr.bf16.gmra.mxu0 %v1274_v38 }
  0x2c   :  { %695 = vmatmul.mubr.bf16.gmra.mxu1 %v1275_v39  ;;  %582 = vmatprep.mubr.bf16.mxu0 %v1276_v40 }
  0x2d   :  { %702 = vmatprep.mubr.bf16.mxu1 %v1278_v41 }
  0x33   :  { %583 = vmatmul.mubr.bf16.gmra.mxu0 %v1280_v42 }
  0x34   :  { %703 = vmatmul.mubr.bf16.gmra.mxu1 %v1281_v43  ;;  %590 = vmatprep.mubr.bf16.mxu0 %v1282_v44 }
  0x35   :  { %710 = vmatprep.mubr.bf16.mxu1 %v1284_v45 }
  0x3b   :  { %591 = vmatmul.mubr.bf16.gmra.mxu0 %v1286_v46 }
  0x3c   :  { %711 = vmatmul.mubr.bf16.gmra.mxu1 %v1287_v47  ;;  %598 = vmatprep.mubr.bf16.mxu0 %v1288_v48 }
  0x3d   :  { %718 = vmatprep.mubr.bf16.mxu1 %v1290_v49 }
  0x43   :  { %599 = vmatmul.mubr.bf16.gmra.mxu0 %v1292_v50 }
  0x44   :  { %719 = vmatmul.mubr.bf16.gmra.mxu1 %v1293_v51  ;;  %606 = vmatprep.mubr.bf16.mxu0 %v1294_v52 }
  0x45   :  { %726 = vmatprep.mubr.bf16.mxu1 %v1296_v53 }
  0x4b   :  { %607 = vmatmul.mubr.bf16.gmra.mxu0 %v1298_v54 }
  0x4c   :  { %727 = vmatmul.mubr.bf16.gmra.mxu1 %v1299_v55  ;;  %614 = vmatprep.mubr.bf16.mxu0 %v1300_v56 }
  0x4d   :  { %734 = vmatprep.mubr.bf16.mxu1 %v1302_v57 }
  0x53   :  { %615 = vmatmul.mubr.bf16.gmra.mxu0 %v1304_v58 }
  0x54   :  { %735 = vmatmul.mubr.bf16.gmra.mxu1 %v1305_v59  ;;  %622 = vmatprep.mubr.bf16.mxu0 %v1306_v60 }
  0x55   :  { %742 = vmatprep.mubr.bf16.mxu1 %v1308_v61 }
  0x5b   :  { %623 = vmatmul.mubr.bf16.gmra.mxu0 %v1310_v62 }
  0x5c   :  { %743 = vmatmul.mubr.bf16.gmra.mxu1 %v1311_v63  ;;  %630 = vmatprep.mubr.bf16.mxu0 %v1312_v0 }
  0x5d   :  { %750 = vmatprep.mubr.bf16.mxu1 %v1314_v1 }
  0x63   :  { %631 = vmatmul.mubr.bf16.gmra.mxu0 %v1316_v2 }
  0x64   :  { %751 = vmatmul.mubr.bf16.gmra.mxu1 %v1317_v3  ;;  %638 = vmatprep.mubr.bf16.mxu0 %v1318_v4 }
  0x65   :  { %758 = vmatprep.mubr.bf16.mxu1 %v1320_v5 }
  0x6b   :  { %639 = vmatmul.mubr.bf16.gmra.mxu0 %v1322_v8 }
  0x6c   :  { %759 = vmatmul.mubr.bf16.gmra.mxu1 %v1323_v9  ;;  %646 = vmatprep.mubr.bf16.mxu0 %v991_v10 }
  0x6d   :  { %766 = vmatprep.mubr.bf16.mxu1 %v993_v11 }
  0x73   :  { %647 = vmatmul.mubr.bf16.gmra.mxu0 %v990_v12 }
  0x74   :  { %767 = vmatmul.mubr.bf16.gmra.mxu1 %v992_v13 }
  0xe3   :  { %v1084_v14 = vpop.f32.mrf.mxu0 }
  0xe4   :  { %v1166_v15 = vpop.f32.mrf.mxu1 }
  0xe5   :  { %v1085_v17 = vpop.f32.mrf.mxu0 }
  0xe6   :  { %v1086_v18 = vadd.f32 %v1085_v17, %v1084_v14  ;;  %v1167_v19 = vpop.f32.mrf.mxu1 }
  0xe7   :  { %v1087_v20 = vpop.f32.mrf.mxu0  ;;  %v1168_v22 = vadd.f32 %v1167_v19, %v1166_v15 }
  0xe8   :  { %v569_v21 = vadd.f32 %v1086_v18, %v1573_v16  ;;  %v1169_v23 = vpop.f32.mrf.mxu1 }
  0xe9   :  { %v1088_v24 = vpop.f32.mrf.mxu0 }
  0xea   :  { %v689_v25 = vadd.f32 %v1168_v22, %v569_v21  ;;  %v1089_v26 = vadd.f32 %v1088_v24, %v1087_v20  ;;  %v1170_v27 = vpop.f32.mrf.mxu1 }
  0xeb   :  { %v1090_v28 = vpop.f32.mrf.mxu0  ;;  %v1171_v31 = vadd.f32 %v1170_v27, %v1169_v23 }
  0xec   :  { %vm774_vm0 = vcmp.ge.f32.partialorder %v689_v25, 0.0  ;;  %v795_v29 = vmul.f32 0.01, %v689_v25  ;;  %v572_v30 = vadd.f32 %v1089_v26, %v1573_v16  ;;  %v1172_v32 = vpop.f32.mrf.mxu1 }
  0xed   :  { %v1091_v33 = vpop.f32.mrf.mxu0 }
  0xee   :  { %v816_v34 = vsel %vm774_vm0, %v689_v25, %v795_v29  ;;  %v692_v35 = vadd.f32 %v1171_v31, %v572_v30  ;;  %v1092_v36 = vadd.f32 %v1091_v33, %v1090_v28  ;;  %v1173_v37 = vpop.f32.mrf.mxu1 }
  0xef   :  { %v1047_v38 = vpack.c.bf16 %v816_v34, %v816_v34  ;;  %v1093_v39 = vpop.f32.mrf.mxu0  ;;  %v1174_v42 = vadd.f32 %v1173_v37, %v1172_v32 }
  0xf0   :  { %vm775_vm2 = vcmp.ge.f32.partialorder %v692_v35, 0.0  ;;  %v796_v40 = vmul.f32 0.01, %v692_v35  ;;  %v577_v41 = vadd.f32 %v1092_v36, %v1573_v16  ;;  %v1175_v43 = vpop.f32.mrf.mxu1 }
  0xf1   :  { %923 = vst.msk [vmem:[%s1682_s3] sm:$0xf] %vm922_vm1, %v1047_v38  ;;  %v1094_v44 = vpop.f32.mrf.mxu0 }
  0xf2   :  { %v817_v45 = vsel %vm775_vm2, %v692_v35, %v796_v40  ;;  %v697_v46 = vadd.f32 %v1174_v42, %v577_v41  ;;  %v1095_v47 = vadd.f32 %v1094_v44, %v1093_v39  ;;  %v1176_v48 = vpop.f32.mrf.mxu1 }
  0xf3   :  { %v1048_v49 = vpack.c.bf16 %v817_v45, %v817_v45  ;;  %v1096_v50 = vpop.f32.mrf.mxu0  ;;  %v1177_v53 = vadd.f32 %v1176_v48, %v1175_v43 }
  0xf4   :  { %vm776_vm3 = vcmp.ge.f32.partialorder %v697_v46, 0.0  ;;  %v797_v51 = vmul.f32 0.01, %v697_v46  ;;  %v580_v52 = vadd.f32 %v1095_v47, %v1573_v16  ;;  %v1178_v54 = vpop.f32.mrf.mxu1 }
  0xf5   :  { %924 = vst.msk [vmem:[%s1682_s3 + $0x4] sm:$0xf] %vm922_vm1, %v1048_v49  ;;  %v1097_v55 = vpop.f32.mrf.mxu0 }
  0xf6   :  { %v818_v56 = vsel %vm776_vm3, %v697_v46, %v797_v51  ;;  %v700_v57 = vadd.f32 %v1177_v53, %v580_v52  ;;  %v1098_v58 = vadd.f32 %v1097_v55, %v1096_v50  ;;  %v1179_v59 = vpop.f32.mrf.mxu1 }
  0xf7   :  { %v1049_v60 = vpack.c.bf16 %v818_v56, %v818_v56  ;;  %v1099_v61 = vpop.f32.mrf.mxu0  ;;  %v1180_v0 = vadd.f32 %v1179_v59, %v1178_v54 }
  0xf8   :  { %vm777_vm4 = vcmp.ge.f32.partialorder %v700_v57, 0.0  ;;  %v798_v62 = vmul.f32 0.01, %v700_v57  ;;  %v585_v63 = vadd.f32 %v1098_v58, %v1573_v16  ;;  %v1181_v1 = vpop.f32.mrf.mxu1 }
  0xf9   :  { %925 = vst.msk [vmem:[%s1682_s3 + $0x8] sm:$0xf] %vm922_vm1, %v1049_v60  ;;  %v1100_v2 = vpop.f32.mrf.mxu0 }
  0xfa   :  { %v819_v3 = vsel %vm777_vm4, %v700_v57, %v798_v62  ;;  %v705_v4 = vadd.f32 %v1180_v0, %v585_v63  ;;  %v1101_v5 = vadd.f32 %v1100_v2, %v1099_v61  ;;  %v1182_v6 = vpop.f32.mrf.mxu1 }
  0xfb   :  { %v1050_v7 = vpack.c.bf16 %v819_v3, %v819_v3  ;;  %v1102_v8 = vpop.f32.mrf.mxu0  ;;  %v1183_v11 = vadd.f32 %v1182_v6, %v1181_v1 }
  0xfc   :  { %vm778_vm5 = vcmp.ge.f32.partialorder %v705_v4, 0.0  ;;  %v799_v9 = vmul.f32 0.01, %v705_v4  ;;  %v588_v10 = vadd.f32 %v1101_v5, %v1573_v16  ;;  %v1184_v12 = vpop.f32.mrf.mxu1 }
  0xfd   :  { %926 = vst.msk [vmem:[%s1682_s3 + $0xc] sm:$0xf] %vm922_vm1, %v1050_v7  ;;  %v1103_v13 = vpop.f32.mrf.mxu0 }
  0xfe   :  { %v820_v14 = vsel %vm778_vm5, %v705_v4, %v799_v9  ;;  %v708_v15 = vadd.f32 %v1183_v11, %v588_v10  ;;  %v1104_v17 = vadd.f32 %v1103_v13, %v1102_v8  ;;  %v1185_v18 = vpop.f32.mrf.mxu1 }
  0xff   :  { %v1051_v19 = vpack.c.bf16 %v820_v14, %v820_v14  ;;  %v1105_v20 = vpop.f32.mrf.mxu0  ;;  %v1186_v23 = vadd.f32 %v1185_v18, %v1184_v12 }
 0x100   :  { %vm779_vm6 = vcmp.ge.f32.partialorder %v708_v15, 0.0  ;;  %v800_v21 = vmul.f32 0.01, %v708_v15  ;;  %v593_v22 = vadd.f32 %v1104_v17, %v1573_v16  ;;  %v1187_v24 = vpop.f32.mrf.mxu1 }
 0x101   :  { %927 = vst.msk [vmem:[%s1682_s3 + $0x10] sm:$0xf] %vm922_vm1, %v1051_v19  ;;  %v1106_v25 = vpop.f32.mrf.mxu0 }
 0x102   :  { %v821_v26 = vsel %vm779_vm6, %v708_v15, %v800_v21  ;;  %v713_v27 = vadd.f32 %v1186_v23, %v593_v22  ;;  %v1107_v28 = vadd.f32 %v1106_v25, %v1105_v20  ;;  %v1188_v29 = vpop.f32.mrf.mxu1 }
 0x103   :  { %v1052_v30 = vpack.c.bf16 %v821_v26, %v821_v26  ;;  %v1108_v31 = vpop.f32.mrf.mxu0  ;;  %v1189_v34 = vadd.f32 %v1188_v29, %v1187_v24 }
 0x104   :  { %vm780_vm7 = vcmp.ge.f32.partialorder %v713_v27, 0.0  ;;  %v801_v32 = vmul.f32 0.01, %v713_v27  ;;  %v596_v33 = vadd.f32 %v1107_v28, %v1573_v16  ;;  %v1190_v35 = vpop.f32.mrf.mxu1 }
 0x105   :  { %928 = vst.msk [vmem:[%s1682_s3 + $0x14] sm:$0xf] %vm922_vm1, %v1052_v30  ;;  %v1109_v36 = vpop.f32.mrf.mxu0 }
 0x106   :  { %v822_v37 = vsel %vm780_vm7, %v713_v27, %v801_v32  ;;  %v716_v38 = vadd.f32 %v1189_v34, %v596_v33  ;;  %v1110_v39 = vadd.f32 %v1109_v36, %v1108_v31  ;;  %v1191_v40 = vpop.f32.mrf.mxu1  ;;  %vm943_vm7 = vcmask 516096  }
 0x107   :  { %v1053_v41 = vpack.c.bf16 %v822_v37, %v822_v37  ;;  %v1111_v42 = vpop.f32.mrf.mxu0  ;;  %v1192_v45 = vadd.f32 %v1191_v40, %v1190_v35 }
 0x108   :  { %vm781_vm8 = vcmp.ge.f32.partialorder %v716_v38, 0.0  ;;  %v802_v43 = vmul.f32 0.01, %v716_v38  ;;  %v601_v44 = vadd.f32 %v1110_v39, %v1573_v16  ;;  %v1193_v46 = vpop.f32.mrf.mxu1 }
 0x109   :  { %929 = vst.msk [vmem:[%s1682_s3 + $0x18] sm:$0xf] %vm922_vm1, %v1053_v41  ;;  %v1112_v47 = vpop.f32.mrf.mxu0 }
 0x10a   :  { %v823_v48 = vsel %vm781_vm8, %v716_v38, %v802_v43  ;;  %v721_v49 = vadd.f32 %v1192_v45, %v601_v44  ;;  %v1113_v50 = vadd.f32 %v1112_v47, %v1111_v42  ;;  %v1194_v51 = vpop.f32.mrf.mxu1 }
 0x10b   :  { %v1054_v52 = vpack.c.bf16 %v823_v48, %v823_v48  ;;  %v1114_v53 = vpop.f32.mrf.mxu0  ;;  %v1195_v56 = vadd.f32 %v1194_v51, %v1193_v46 }
 0x10c   :  { %vm782_vm9 = vcmp.ge.f32.partialorder %v721_v49, 0.0  ;;  %v803_v54 = vmul.f32 0.01, %v721_v49  ;;  %v604_v55 = vadd.f32 %v1113_v50, %v1573_v16  ;;  %v1196_v57 = vpop.f32.mrf.mxu1 }
 0x10d   :  { %930 = vst.msk [vmem:[%s1682_s3 + $0x1c] sm:$0xf] %vm922_vm1, %v1054_v52  ;;  %v1115_v58 = vpop.f32.mrf.mxu0 }
 0x10e   :  { %v824_v59 = vsel %vm782_vm9, %v721_v49, %v803_v54  ;;  %v724_v60 = vadd.f32 %v1195_v56, %v604_v55  ;;  %v1116_v61 = vadd.f32 %v1115_v58, %v1114_v53  ;;  %v1197_v62 = vpop.f32.mrf.mxu1 }
 0x10f   :  { %v1055_v63 = vpack.c.bf16 %v824_v59, %v824_v59  ;;  %v1117_v0 = vpop.f32.mrf.mxu0  ;;  %v1198_v3 = vadd.f32 %v1197_v62, %v1196_v57 }
 0x110   :  { %vm783_vm10 = vcmp.ge.f32.partialorder %v724_v60, 0.0  ;;  %v804_v1 = vmul.f32 0.01, %v724_v60  ;;  %v609_v2 = vadd.f32 %v1116_v61, %v1573_v16  ;;  %v1199_v4 = vpop.f32.mrf.mxu1 }
 0x111   :  { %931 = vst.msk [vmem:[%s1682_s3 + $0x20] sm:$0xf] %vm922_vm1, %v1055_v63  ;;  %v1118_v5 = vpop.f32.mrf.mxu0 }
 0x112   :  { %v825_v6 = vsel %vm783_vm10, %v724_v60, %v804_v1  ;;  %v729_v7 = vadd.f32 %v1198_v3, %v609_v2  ;;  %v1119_v8 = vadd.f32 %v1118_v5, %v1117_v0  ;;  %v1200_v9 = vpop.f32.mrf.mxu1 }
 0x113   :  { %v1056_v10 = vpack.c.bf16 %v825_v6, %v825_v6  ;;  %v1120_v11 = vpop.f32.mrf.mxu0  ;;  %v1201_v14 = vadd.f32 %v1200_v9, %v1199_v4 }
 0x114   :  { %vm784_vm11 = vcmp.ge.f32.partialorder %v729_v7, 0.0  ;;  %v805_v12 = vmul.f32 0.01, %v729_v7  ;;  %v612_v13 = vadd.f32 %v1119_v8, %v1573_v16  ;;  %v1202_v15 = vpop.f32.mrf.mxu1 }
 0x115   :  { %932 = vst.msk [vmem:[%s1682_s3 + $0x24] sm:$0xf] %vm922_vm1, %v1056_v10  ;;  %v1121_v17 = vpop.f32.mrf.mxu0 }
 0x116   :  { %v826_v18 = vsel %vm784_vm11, %v729_v7, %v805_v12  ;;  %v732_v19 = vadd.f32 %v1201_v14, %v612_v13  ;;  %v1122_v20 = vadd.f32 %v1121_v17, %v1120_v11  ;;  %v1203_v21 = vpop.f32.mrf.mxu1 }
 0x117   :  { %v1057_v22 = vpack.c.bf16 %v826_v18, %v826_v18  ;;  %v1123_v23 = vpop.f32.mrf.mxu0  ;;  %v1204_v26 = vadd.f32 %v1203_v21, %v1202_v15 }
 0x118   :  { %vm785_vm12 = vcmp.ge.f32.partialorder %v732_v19, 0.0  ;;  %v806_v24 = vmul.f32 0.01, %v732_v19  ;;  %v617_v25 = vadd.f32 %v1122_v20, %v1573_v16  ;;  %v1205_v27 = vpop.f32.mrf.mxu1 }
 0x119   :  { %933 = vst.msk [vmem:[%s1682_s3 + $0x28] sm:$0xf] %vm922_vm1, %v1057_v22  ;;  %v1124_v28 = vpop.f32.mrf.mxu0 }
 0x11a   :  { %v827_v29 = vsel %vm785_vm12, %v732_v19, %v806_v24  ;;  %v737_v30 = vadd.f32 %v1204_v26, %v617_v25  ;;  %v1125_v31 = vadd.f32 %v1124_v28, %v1123_v23  ;;  %v1206_v32 = vpop.f32.mrf.mxu1 }
 0x11b   :  { %v1058_v33 = vpack.c.bf16 %v827_v29, %v827_v29  ;;  %v1126_v34 = vpop.f32.mrf.mxu0  ;;  %v1207_v37 = vadd.f32 %v1206_v32, %v1205_v27 }
 0x11c   :  { %vm786_vm13 = vcmp.ge.f32.partialorder %v737_v30, 0.0  ;;  %v807_v35 = vmul.f32 0.01, %v737_v30  ;;  %v620_v36 = vadd.f32 %v1125_v31, %v1573_v16  ;;  %v1208_v38 = vpop.f32.mrf.mxu1 }
 0x11d   :  { %934 = vst.msk [vmem:[%s1682_s3 + $0x2c] sm:$0xf] %vm922_vm1, %v1058_v33  ;;  %v1127_v39 = vpop.f32.mrf.mxu0 }
 0x11e   :  { %v828_v40 = vsel %vm786_vm13, %v737_v30, %v807_v35  ;;  %v740_v41 = vadd.f32 %v1207_v37, %v620_v36  ;;  %v1128_v42 = vadd.f32 %v1127_v39, %v1126_v34  ;;  %v1209_v43 = vpop.f32.mrf.mxu1 }
 0x11f   :  { %v1059_v44 = vpack.c.bf16 %v828_v40, %v828_v40  ;;  %v1129_v45 = vpop.f32.mrf.mxu0  ;;  %v1210_v48 = vadd.f32 %v1209_v43, %v1208_v38 }
 0x120   :  { %vm787_vm14 = vcmp.ge.f32.partialorder %v740_v41, 0.0  ;;  %v808_v46 = vmul.f32 0.01, %v740_v41  ;;  %v625_v47 = vadd.f32 %v1128_v42, %v1573_v16  ;;  %v1211_v49 = vpop.f32.mrf.mxu1 }
 0x121   :  { %935 = vst.msk [vmem:[%s1682_s3 + $0x30] sm:$0xf] %vm922_vm1, %v1059_v44  ;;  %v1130_v50 = vpop.f32.mrf.mxu0 }
 0x122   :  { %v829_v51 = vsel %vm787_vm14, %v740_v41, %v808_v46  ;;  %v745_v52 = vadd.f32 %v1210_v48, %v625_v47  ;;  %v1131_v53 = vadd.f32 %v1130_v50, %v1129_v45  ;;  %v1212_v54 = vpop.f32.mrf.mxu1 }
 0x123   :  { %v1060_v55 = vpack.c.bf16 %v829_v51, %v829_v51  ;;  %v1132_v56 = vpop.f32.mrf.mxu0  ;;  %v1213_v59 = vadd.f32 %v1212_v54, %v1211_v49 }
 0x124   :  { %vm788_vm15 = vcmp.ge.f32.partialorder %v745_v52, 0.0  ;;  %v809_v57 = vmul.f32 0.01, %v745_v52  ;;  %v628_v58 = vadd.f32 %v1131_v53, %v1573_v16  ;;  %v1214_v60 = vpop.f32.mrf.mxu1 }
 0x125   :  { %936 = vst.msk [vmem:[%s1682_s3 + $0x34] sm:$0xf] %vm922_vm1, %v1060_v55  ;;  %v1133_v61 = vpop.f32.mrf.mxu0 }
 0x126   :  { %v830_v62 = vsel %vm788_vm15, %v745_v52, %v809_v57  ;;  %v748_v63 = vadd.f32 %v1213_v59, %v628_v58  ;;  %v1134_v0 = vadd.f32 %v1133_v61, %v1132_v56  ;;  %v1215_v1 = vpop.f32.mrf.mxu1 }
 0x127   :  { %v1061_v2 = vpack.c.bf16 %v830_v62, %v830_v62  ;;  %v1135_v3 = vpop.f32.mrf.mxu0  ;;  %v1216_v6 = vadd.f32 %v1215_v1, %v1214_v60 }
 0x128   :  { %vm789_vm0 = vcmp.ge.f32.partialorder %v748_v63, 0.0  ;;  %v810_v4 = vmul.f32 0.01, %v748_v63  ;;  %v633_v5 = vadd.f32 %v1134_v0, %v1573_v16  ;;  %v1217_v7 = vpop.f32.mrf.mxu1 }
 0x129   :  { %937 = vst.msk [vmem:[%s1682_s3 + $0x38] sm:$0xf] %vm922_vm1, %v1061_v2  ;;  %v1136_v8 = vpop.f32.mrf.mxu0 }
 0x12a   :  { %v831_v9 = vsel %vm789_vm0, %v748_v63, %v810_v4  ;;  %v753_v10 = vadd.f32 %v1216_v6, %v633_v5  ;;  %v1137_v11 = vadd.f32 %v1136_v8, %v1135_v3  ;;  %v1218_v12 = vpop.f32.mrf.mxu1 }
 0x12b   :  { %v1062_v13 = vpack.c.bf16 %v831_v9, %v831_v9  ;;  %v1138_v14 = vpop.f32.mrf.mxu0  ;;  %v1219_v18 = vadd.f32 %v1218_v12, %v1217_v7 }
 0x12c   :  { %vm790_vm2 = vcmp.ge.f32.partialorder %v753_v10, 0.0  ;;  %v811_v15 = vmul.f32 0.01, %v753_v10  ;;  %v636_v17 = vadd.f32 %v1137_v11, %v1573_v16  ;;  %v1220_v19 = vpop.f32.mrf.mxu1 }
 0x12d   :  { %938 = vst.msk [vmem:[%s1682_s3 + $0x3c] sm:$0xf] %vm922_vm1, %v1062_v13  ;;  %v1139_v20 = vpop.f32.mrf.mxu0 }
 0x12e   :  { %v832_v21 = vsel %vm790_vm2, %v753_v10, %v811_v15  ;;  %v756_v22 = vadd.f32 %v1219_v18, %v636_v17  ;;  %v1140_v23 = vadd.f32 %v1139_v20, %v1138_v14  ;;  %v1221_v24 = vpop.f32.mrf.mxu1 }
 0x12f   :  { %v1063_v25 = vpack.c.bf16 %v832_v21, %v832_v21  ;;  %v1141_v26 = vpop.f32.mrf.mxu0  ;;  %v1222_v29 = vadd.f32 %v1221_v24, %v1220_v19 }
 0x130   :  { %vm791_vm3 = vcmp.ge.f32.partialorder %v756_v22, 0.0  ;;  %v812_v27 = vmul.f32 0.01, %v756_v22  ;;  %v641_v28 = vadd.f32 %v1140_v23, %v1573_v16  ;;  %v1223_v30 = vpop.f32.mrf.mxu1 }
 0x131   :  { %939 = vst.msk [vmem:[%s1682_s3 + $0x40] sm:$0xf] %vm922_vm1, %v1063_v25  ;;  %v1142_v31 = vpop.f32.mrf.mxu0 }
 0x132   :  { %v833_v32 = vsel %vm791_vm3, %v756_v22, %v812_v27  ;;  %v761_v33 = vadd.f32 %v1222_v29, %v641_v28  ;;  %v1143_v34 = vadd.f32 %v1142_v31, %v1141_v26  ;;  %v1224_v35 = vpop.f32.mrf.mxu1 }
 0x133   :  { %v1064_v36 = vpack.c.bf16 %v833_v32, %v833_v32  ;;  %v1144_v37 = vpop.f32.mrf.mxu0  ;;  %v1225_v40 = vadd.f32 %v1224_v35, %v1223_v30 }
 0x134   :  { %vm792_vm4 = vcmp.ge.f32.partialorder %v761_v33, 0.0  ;;  %v813_v38 = vmul.f32 0.01, %v761_v33  ;;  %v644_v39 = vadd.f32 %v1143_v34, %v1573_v16  ;;  %v1226_v41 = vpop.f32.mrf.mxu1 }
 0x135   :  { %940 = vst.msk [vmem:[%s1682_s3 + $0x44] sm:$0xf] %vm922_vm1, %v1064_v36  ;;  %v1145_v42 = vpop.f32.mrf.mxu0 }
 0x136   :  { %v834_v43 = vsel %vm792_vm4, %v761_v33, %v813_v38  ;;  %v764_v44 = vadd.f32 %v1225_v40, %v644_v39  ;;  %v1146_v45 = vadd.f32 %v1145_v42, %v1144_v37  ;;  %v1227_v46 = vpop.f32.mrf.mxu1 }
 0x137   :  { %v1065_v47 = vpack.c.bf16 %v834_v43, %v834_v43  ;;  %v1147_v48 = vpop.f32.mrf.mxu0  ;;  %v1228_v51 = vadd.f32 %v1227_v46, %v1226_v41 }
 0x138   :  { %vm793_vm5 = vcmp.ge.f32.partialorder %v764_v44, 0.0  ;;  %v814_v49 = vmul.f32 0.01, %v764_v44  ;;  %v649_v50 = vadd.f32 %v1146_v45, %v1573_v16  ;;  %v1229_v52 = vpop.f32.mrf.mxu1 }
 0x139   :  { %941 = vst.msk [vmem:[%s1682_s3 + $0x48] sm:$0xf] %vm922_vm1, %v1065_v47  ;;  %v1148_v53 = vpop.f32.mrf.mxu0 }
 0x13a   :  { %v835_v54 = vsel %vm793_vm5, %v764_v44, %v814_v49  ;;  %v769_v55 = vadd.f32 %v1228_v51, %v649_v50  ;;  %v1230_v56 = vpop.f32.mrf.mxu1 }
 0x13b   :  { %v1066_v57 = vpack.c.bf16 %v835_v54, %v835_v54 }
 0x13c   :  { %vm794_vm6 = vcmp.ge.f32.partialorder %v769_v55, 0.0  ;;  %v815_v58 = vmul.f32 0.01, %v769_v55 }
 0x13d   :  { %942 = vst.msk [vmem:[%s1682_s3 + $0x4c] sm:$0xf] %vm922_vm1, %v1066_v57 }
 0x13e   :  { %v836_v16 = vsel %vm794_vm6, %v769_v55, %v815_v58 }
 0x13f   :  { %v1067_v59 = vpack.c.bf16 %v836_v16, %v836_v16 }
 0x141   :  { %944 = vst.msk [vmem:[%s1682_s3 + $0x50] sm:$0x1] %vm943_vm7, %v1067_v59 }

// kernel: cnn_actor_critic_forward.7
= control target key start
LH: loop header
LB: loop body
LE: loop exit
PB: predicated region body
PF: predicated region fallthrough
CT: control target
= control target key end

     0   :  { %v1274_v34 = vmov 0.0   ;;  %vm1275_vm0 = vmmov 0   ;;  %vm516_vm1 = vcmask 523264   ;;  %vm894_vm2 = vcmask 519168   ;;  %s1661_s1 = inlined_call_operand.vmem [shape: bf16[576,64], index: 1, kind: input, shape index: {}]   ;;  %s1662_s0 = inlined_call_operand.vmem [shape: bf16[98,576], index: 0, kind: input, shape index: {}]   ;;  %s1663_s2 = inlined_call_operand.vmem [shape: f32[1,64], index: 2, kind: input, shape index: {}]   ;;  %s1664_s3 = inlined_call_operand.vmem [shape: bf16[98,64], index: 3, kind: output, shape index: {}]  }
   0x1   :  { %v1191_v0 = vld [vmem:[%s1661_s1 + $0x78] sm:$0xff]   ;;  %v1195_v4 = vld [vmem:[%s1661_s1 + $0x70] sm:$0xff]   ;;  %v1199_v8 = vld [vmem:[%s1661_s1 + $0x68] sm:$0xff]   ;;  %vm907_vm13 = vcmask 516096  }
   0x2   :  { %v1192_v1 = vld [vmem:[%s1661_s1 + $0xf8] sm:$0xff]   ;;  %1018 = vmatprep.subr.bf16.mxu0 %v1191_v0  ;;  %v1196_v5 = vld [vmem:[%s1661_s1 + $0xf0] sm:$0xff]   ;;  %v1200_v9 = vld [vmem:[%s1661_s1 + $0xe8] sm:$0xff]  }
   0x3   :  { %v1193_v2 = vld [vmem:[%s1661_s1 + $0x38] sm:$0xff]   ;;  %1076 = vmatprep.subr.bf16.mxu1 %v1192_v1  ;;  %v1197_v6 = vld [vmem:[%s1661_s1 + $0x30] sm:$0xff]   ;;  %v1201_v10 = vld [vmem:[%s1661_s1 + $0x28] sm:$0xff]  }
   0x4   :  { %v1194_v3 = vld [vmem:[%s1661_s1 + $0xb8] sm:$0xff]   ;;  %1019 = vmatpush3.bf16.msra.mxu0 %v1193_v2  ;;  %v1198_v7 = vld [vmem:[%s1661_s1 + $0xb0] sm:$0xff]   ;;  %v1202_v11 = vld [vmem:[%s1661_s1 + $0xa8] sm:$0xff]  }
   0x5   :  { %1077 = vmatpush3.bf16.msra.mxu1 %v1194_v3  ;;  %1020 = vmatprep.subr.bf16.mxu0 %v1195_v4  ;;  %v1203_v12 = vld [vmem:[%s1661_s1 + $0x60] sm:$0xff]   ;;  %v1207_v16 = vld [vmem:[%s1661_s1 + $0x58] sm:$0xff]   ;;  %v1211_v20 = vld [vmem:[%s1661_s1 + $0x50] sm:$0xff]  }
   0x6   :  { %1078 = vmatprep.subr.bf16.mxu1 %v1196_v5  ;;  %v1204_v13 = vld [vmem:[%s1661_s1 + $0xe0] sm:$0xff]   ;;  %v1208_v17 = vld [vmem:[%s1661_s1 + $0xd8] sm:$0xff]   ;;  %v1212_v21 = vld [vmem:[%s1661_s1 + $0xd0] sm:$0xff]  }
   0x7   :  { %v1205_v14 = vld [vmem:[%s1661_s1 + $0x20] sm:$0xff]   ;;  %v1209_v18 = vld [vmem:[%s1661_s1 + $0x18] sm:$0xff]   ;;  %v1213_v22 = vld [vmem:[%s1661_s1 + $0x10] sm:$0xff]  }
   0x8   :  { %1021 = vmatpush3.bf16.msra.mxu0 %v1197_v6  ;;  %v1206_v15 = vld [vmem:[%s1661_s1 + $0xa0] sm:$0xff]   ;;  %v1210_v19 = vld [vmem:[%s1661_s1 + $0x98] sm:$0xff]   ;;  %v1214_v23 = vld [vmem:[%s1661_s1 + $0x90] sm:$0xff]  }
   0x9   :  { %1079 = vmatpush3.bf16.msra.mxu1 %v1198_v7  ;;  %1022 = vmatprep.subr.bf16.mxu0 %v1199_v8  ;;  %v1215_v24 = vld [vmem:[%s1661_s1 + $0x48] sm:$0xff]   ;;  %v1219_v28 = vld [vmem:[%s1661_s1 + $0x40] sm:$0xff]   ;;  %v1229_v37 = vld [vmem:[%s1661_s1 + $0x118] sm:$0xff]  }
   0xa   :  { %1080 = vmatprep.subr.bf16.mxu1 %v1200_v9  ;;  %v1216_v25 = vld [vmem:[%s1661_s1 + $0xc8] sm:$0xff]   ;;  %v1220_v29 = vld [vmem:[%s1661_s1 + $0xc0] sm:$0xff]   ;;  %v1240_v43 = vld [vmem:[%s1661_s1 + $0x110] sm:$0xff]  }
   0xb   :  { %v1217_v26 = vld [vmem:[%s1661_s1 + $0x8] sm:$0xff]   ;;  %v1221_v30 = vld [vmem:[%s1661_s1] sm:$0xff]   ;;  %v1238_v44 = vld [vmem:[%s1662_s0 + $0x5c] ss:$20 sps:$4 sm:$0xff]  }
   0xc   :  { %1023 = vmatpush3.bf16.msra.mxu0 %v1201_v10  ;;  %v1218_v27 = vld [vmem:[%s1661_s1 + $0x88] sm:$0xff]   ;;  %v1222_v31 = vld [vmem:[%s1661_s1 + $0x80] sm:$0xff]   ;;  %v1243_v48 = vld [vmem:[%s1662_s0 + $0x7c] ss:$20 sps:$4 sm:$0xff]  }
   0xd   :  { %1081 = vmatpush3.bf16.msra.mxu1 %v1202_v11  ;;  %1024 = vmatprep.subr.bf16.mxu0 %v1203_v12  ;;  %v1223_v32 = vld [vmem:[%s1662_s0] ss:$20 sps:$4 sm:$0xff]   ;;  %v1225_v33 = vld [vmem:[%s1662_s0 + $0x4] ss:$20 sps:$4 sm:$0xff]   ;;  %v1226_v35 = vld [vmem:[%s1662_s0 + $0x8] ss:$20 sps:$4 sm:$0xff]  }
   0xe   :  { %1082 = vmatprep.subr.bf16.mxu1 %v1204_v13  ;;  %v1228_v36 = vld [vmem:[%s1662_s0 + $0xc] ss:$20 sps:$4 sm:$0xff]   ;;  %570 = vmatprep.mubr.bf16.mxu0 %v1225_v33  ;;  %v1232_v39 = vld [vmem:[%s1662_s0 + $0x34] ss:$20 sps:$4 sm:$0xff]   ;;  %v1235_v41 = vld [vmem:[%s1662_s0 + $0x30] ss:$20 sps:$4 sm:$0xff]  }
   0xf   :  { %658 = vmatprep.mubr.bf16.mxu1 %v1228_v36  ;;  %v1230_v38 = vld [vmem:[%s1662_s0 + $0x2c] ss:$20 sps:$4 sm:$0xff]   ;;  %v1234_v40 = vld [vmem:[%s1662_s0 + $0x28] ss:$20 sps:$4 sm:$0xff]   ;;  %v1241_v46 = vld [vmem:[%s1662_s0 + $0x50] ss:$20 sps:$4 sm:$0xff]  }
  0x10   :  { %1025 = vmatpush3.bf16.msra.mxu0 %v1205_v14  ;;  %v1236_v42 = vld [vmem:[%s1662_s0 + $0x54] ss:$20 sps:$4 sm:$0xff]   ;;  %v1242_v47 = vld [vmem:[%s1662_s0 + $0x58] ss:$20 sps:$4 sm:$0xff]   ;;  %v1262_v50 = vld [vmem:[%s1661_s1 + $0x100] sm:$0xff]  }
  0x11   :  { %1083 = vmatpush3.bf16.msra.mxu1 %v1206_v15  ;;  %1026 = vmatprep.subr.bf16.mxu0 %v1207_v16  ;;  %v1249_v45 = vld [vmem:[%s1661_s1 + $0x108] sm:$0xff]   ;;  %v1245_v49 = vld [vmem:[%s1662_s0 + $0x84] ss:$20 sps:$4 sm:$0xff]   ;;  %v1248_v52 = vld [vmem:[%s1662_s0 + $0x80] ss:$20 sps:$4 sm:$0xff]  }
  0x12   :  { %1084 = vmatprep.subr.bf16.mxu1 %v1208_v17  ;;  %v1247_v51 = vld [vmem:[%s1662_s0 + $0x78] ss:$20 sps:$4 sm:$0xff]   ;;  %v1254_v55 = vld [vmem:[%s1662_s0 + $0xa0] ss:$20 sps:$4 sm:$0xff]   ;;  %v1255_v56 = vld [vmem:[%s1662_s0 + $0xa8] ss:$20 sps:$4 sm:$0xff]  }
  0x13   :  { %v1250_v53 = vld [vmem:[%s1662_s0 + $0xa4] ss:$20 sps:$4 sm:$0xff]   ;;  %v1252_v54 = vld [vmem:[%s1662_s0 + $0xac] ss:$20 sps:$4 sm:$0xff]   ;;  %v1258_v58 = vld [vmem:[%s1662_s0 + $0xd4] ss:$20 sps:$4 sm:$0xff]  }
  0x14   :  { %1027 = vmatpush3.bf16.msra.mxu0 %v1209_v18  ;;  %v1256_v57 = vld [vmem:[%s1662_s0 + $0xcc] ss:$20 sps:$4 sm:$0xff]   ;;  %v51_v59 = vld [vmem:[%s1662_s0 + $0xf0] sm:$0x11]  ;;  %v52_v60 = vld [vmem:[%s1662_s0 + $0xf8] sm:$0x11] }
  0x15   :  { %1085 = vmatpush3.bf16.msra.mxu1 %v1210_v19  ;;  %1028 = vmatprep.subr.bf16.mxu0 %v1211_v20  ;;  %v1260_v61 = vld [vmem:[%s1662_s0 + $0xc8] ss:$20 sps:$4 sm:$0xff]   ;;  %v1261_v62 = vld [vmem:[%s1662_s0 + $0xd0] ss:$20 sps:$4 sm:$0xff]   ;;  %v945_v63 = vcombine.high %v51_v59, %v51_v59  ;;  %v947_v0 = vcombine.high %v52_v60, %v52_v60  ;;  %v944_v1 = vcombine.low %v51_v59, %v51_v59  ;;  %v1269_v5 = vld [vmem:[%s1662_s0 + $0x38] ss:$20 sps:$4 sm:$0xff]  }
  0x16   :  { %1086 = vmatprep.subr.bf16.mxu1 %v1212_v21  ;;  %v946_v2 = vcombine.low %v52_v60, %v52_v60  ;;  %v1267_v3 = vld [vmem:[%s1662_s0 + $0x10] ss:$20 sps:$4 sm:$0xff]   ;;  %v1270_v6 = vld [vmem:[%s1662_s0 + $0xd8] ss:$20 sps:$4 sm:$0xff]   ;;  %v1271_v7 = vld [vmem:[%s1662_s0 + $0x60] ss:$20 sps:$4 sm:$0xff]  }
  0x17   :  { %v1268_v4 = vld [vmem:[%s1662_s0 + $0xb0] ss:$20 sps:$4 sm:$0xff]   ;;  %v1272_v8 = vld [vmem:[%s1662_s0 + $0x100] ss:$0 sps:$4 sm:$0x11]  }
  0x18   :  { %1029 = vmatpush3.bf16.msra.mxu0 %v1213_v22  ;;  %v1273_v9 = vld [vmem:[%s1662_s0 + $0x88] ss:$20 sps:$4 sm:$0xff]   ;;  %v1571_v59 = vld [vmem:[%s1663_s2] ss:$0 sm:$0xff] }
  0x19   :  { %1087 = vmatpush3.bf16.msra.mxu1 %v1214_v23  ;;  %1030 = vmatprep.subr.bf16.mxu0 %v1215_v24 }
  0x1a   :  { %1088 = vmatprep.subr.bf16.mxu1 %v1216_v25 }
  0x1c   :  { %1031 = vmatpush3.bf16.msra.mxu0 %v1217_v26 }
  0x1d   :  { %1089 = vmatpush3.bf16.msra.mxu1 %v1218_v27  ;;  %1032 = vmatprep.subr.bf16.mxu0 %v1219_v28 }
  0x1e   :  { %1090 = vmatprep.subr.bf16.mxu1 %v1220_v29 }
  0x20   :  { %1033 = vmatpush3.bf16.msra.mxu0 %v1221_v30 }
  0x21   :  { %1091 = vmatpush3.bf16.msra.mxu1 %v1222_v31  ;;  %1145 = vmatprep.subr.bf16.mxu0 %v1274_v34 }
  0x22   :  { %1181 = vmatprep.subr.bf16.mxu1 %v1274_v34 }
  0x23   :  { %571 = vmatmul.mubr.bf16.vlgmr.msra.gmra.mxu0 %v1223_v32 }
  0x24   :  { %659 = vmatmul.mubr.bf16.vlgmr.msra.gmra.mxu1 %v1226_v35  ;;  %1146 = vmatpush3.bf16.msra.mxu0 %v1229_v37 }
  0x25   :  { %578 = vmatprep.mubr.bf16.mxu0 %v1230_v38  ;;  %1185 = vmatpush3.bf16.msra.mxu1 %v1229_v37 }
  0x26   :  { %666 = vmatprep.mubr.bf16.mxu1 %v1232_v39  ;;  %1147 = vmatprep.subr.bf16.mxu0 %v1274_v34 }
  0x27   :  { %1182 = vmatprep.subr.bf16.mxu1 %v1274_v34 }
  0x28   :  { %1148 = vmatpush3.bf16.msra.mxu0 %v1240_v43 }
  0x29   :  { %1186 = vmatpush3.bf16.msra.mxu1 %v1240_v43  ;;  %1149 = vmatprep.subr.bf16.mxu0 %v1274_v34 }
  0x2a   :  { %1183 = vmatprep.subr.bf16.mxu1 %v1274_v34 }
  0x2b   :  { %579 = vmatmul.mubr.bf16.gmra.mxu0 %v1234_v40 }
  0x2c   :  { %667 = vmatmul.mubr.bf16.gmra.mxu1 %v1235_v41  ;;  %586 = vmatprep.mubr.bf16.mxu0 %v1236_v42 }
  0x2d   :  { %674 = vmatprep.mubr.bf16.mxu1 %v1238_v44  ;;  %1150 = vmatpush3.bf16.msra.mxu0 %v1249_v45 }
  0x2e   :  { %1187 = vmatpush3.bf16.msra.mxu1 %v1249_v45  ;;  %1151 = vmatprep.subr.bf16.mxu0 %v1274_v34 }
  0x2f   :  { %1184 = vmatprep.subr.bf16.mxu1 %v1274_v34 }
  0x31   :  { %1152 = vmatpush3.bf16.msra.mxu0 %v1262_v50 }
  0x32   :  { %1188 = vmatpush3.bf16.msra.mxu1 %v1262_v50 }
  0x33   :  { %587 = vmatmul.mubr.bf16.gmra.mxu0 %v1241_v46 }
  0x34   :  { %675 = vmatmul.mubr.bf16.gmra.mxu1 %v1242_v47  ;;  %594 = vmatprep.mubr.bf16.mxu0 %v1243_v48 }
  0x35   :  { %682 = vmatprep.mubr.bf16.mxu1 %v1245_v49 }
  0x3b   :  { %595 = vmatmul.mubr.bf16.gmra.mxu0 %v1247_v51 }
  0x3c   :  { %683 = vmatmul.mubr.bf16.gmra.mxu1 %v1248_v52  ;;  %602 = vmatprep.mubr.bf16.mxu0 %v1250_v53 }
  0x3d   :  { %690 = vmatprep.mubr.bf16.mxu1 %v1252_v54 }
  0x43   :  { %603 = vmatmul.mubr.bf16.gmra.mxu0 %v1254_v55 }
  0x44   :  { %691 = vmatmul.mubr.bf16.gmra.mxu1 %v1255_v56  ;;  %610 = vmatprep.mubr.bf16.mxu0 %v1256_v57 }
  0x45   :  { %698 = vmatprep.mubr.bf16.mxu1 %v1258_v58 }
  0x4b   :  { %611 = vmatmul.mubr.bf16.gmra.mxu0 %v1260_v61 }
  0x4c   :  { %699 = vmatmul.mubr.bf16.gmra.mxu1 %v1261_v62  ;;  %618 = vmatprep.mubr.bf16.mxu0 %v945_v63 }
  0x4d   :  { %706 = vmatprep.mubr.bf16.mxu1 %v947_v0 }
  0x53   :  { %619 = vmatmul.mubr.bf16.gmra.mxu0 %v944_v1 }
  0x54   :  { %707 = vmatmul.mubr.bf16.gmra.mxu1 %v946_v2  ;;  %1153 = vmatprep.mubr.msk.bf16.mxu0 %vm1275_vm0, %v1274_v34 }
  0x55   :  { %1169 = vmatprep.mubr.msk.bf16.mxu1 %vm1275_vm0, %v1274_v34 }
  0x5b   :  { %1154 = vmatmul.mubr.msk.bf16.vlgmr.msra.gmra.mxu0 %vm516_vm1, %v1267_v3 }
  0x5c   :  { %1170 = vmatmul.mubr.msk.bf16.vlgmr.msra.gmra.mxu1 %vm516_vm1, %v1268_v4  ;;  %1157 = vmatprep.mubr.msk.bf16.mxu0 %vm1275_vm0, %v1274_v34 }
  0x5d   :  { %1173 = vmatprep.mubr.msk.bf16.mxu1 %vm1275_vm0, %v1274_v34 }
  0x63   :  { %1158 = vmatmul.mubr.msk.bf16.gmra.mxu0 %vm516_vm1, %v1269_v5 }
  0x64   :  { %1174 = vmatmul.mubr.msk.bf16.gmra.mxu1 %vm516_vm1, %v1270_v6  ;;  %1161 = vmatprep.mubr.msk.bf16.mxu0 %vm1275_vm0, %v1274_v34 }
  0x65   :  { %1177 = vmatprep.mubr.msk.bf16.mxu1 %vm1275_vm0, %v1274_v34 }
  0x6b   :  { %1162 = vmatmul.mubr.msk.bf16.gmra.mxu0 %vm516_vm1, %v1271_v7 }
  0x6c   :  { %1178 = vmatmul.mubr.msk.bf16.gmra.mxu1 %vm516_vm1, %v1272_v8  ;;  %1165 = vmatprep.mubr.msk.bf16.mxu0 %vm1275_vm0, %v1274_v34 }
  0x73   :  { %1166 = vmatmul.mubr.msk.bf16.gmra.mxu0 %vm516_vm1, %v1273_v9 }
  0xe3   :  { %v1034_v10 = vpop.f32.mrf.mxu0 }
  0xe4   :  { %v1092_v11 = vpop.f32.mrf.mxu1 }
  0xe5   :  { %v1035_v12 = vpop.f32.mrf.mxu0 }
  0xe6   :  { %v1093_v13 = vpop.f32.mrf.mxu1  ;;  %v1036_v57 = vadd.f32 %v1035_v12, %v1034_v10 }
  0xe7   :  { %v1037_v14 = vpop.f32.mrf.mxu0  ;;  %v1094_v3 = vadd.f32 %v1093_v13, %v1092_v11 }
  0xe8   :  { %v1095_v15 = vpop.f32.mrf.mxu1  ;;  %v573_v2 = vadd.f32 %v1036_v57, %v1571_v59 }
  0xe9   :  { %v1038_v16 = vpop.f32.mrf.mxu0 }
  0xea   :  { %v1096_v17 = vpop.f32.mrf.mxu1  ;;  %v1039_v63 = vadd.f32 %v1038_v16, %v1037_v14  ;;  %v661_v13 = vadd.f32 %v1094_v3, %v573_v2 }
  0xeb   :  { %v1040_v18 = vpop.f32.mrf.mxu0 }
  0xec   :  { %v1098_v19 = vpop.f32.mrf.mxu1  ;;  %v576_v12 = vadd.f32 %v1039_v63, %v1571_v59 }
  0xed   :  { %v1041_v20 = vpop.f32.mrf.mxu0 }
  0xee   :  { %v1099_v21 = vpop.f32.mrf.mxu1  ;;  %v1042_v0 = vadd.f32 %v1041_v20, %v1040_v18 }
  0xef   :  { %v1043_v22 = vpop.f32.mrf.mxu0  ;;  %v1100_v14 = vadd.f32 %v1099_v21, %v1098_v19 }
  0xf0   :  { %v1532_v23 = vpop.f32.mrf.mxu1 }
  0xf1   :  { %v1044_v24 = vpop.f32.mrf.mxu0 }
  0xf2   :  { %v1534_v25 = vpop.f32.mrf.mxu1  ;;  %v1045_v9 = vadd.f32 %v1044_v24, %v1043_v22 }
  0xf3   :  { %v1536_v26 = vpop.f32.mrf.mxu0  ;;  %v1103_v22 = vadd.f32 %v1534_v25, %v1532_v23 }
  0xf4   :  { %v1538_v27 = vpop.f32.mrf.mxu1 }
  0xf5   :  { %v1540_v28 = vpop.f32.mrf.mxu0 }
  0xf6   :  { %v1542_v29 = vpop.f32.mrf.mxu1  ;;  %v1048_v23 = vadd.f32 %v1540_v28, %v1536_v26 }
  0xf7   :  { %v1544_v30 = vpop.f32.mrf.mxu0 }
  0xf8   :  { %v1546_v31 = vpop.f32.mrf.mxu1 }
  0xf9   :  { %v1548_v32 = vpop.f32.mrf.mxu0 }
  0xfa   :  { %v1550_v33 = vpop.f32.mrf.mxu1 }
  0xfb   :  { %v1552_v34 = vpop.f32.mrf.mxu0 }
  0xfc   :  { %v1554_v35 = vpop.f32.mrf.mxu1 }
  0xfd   :  { %v1556_v36 = vpop.f32.mrf.mxu0 }
  0xfe   :  { %v1558_v37 = vpop.f32.mrf.mxu1 }
  0xff   :  { %v1560_v38 = vpop.f32.mrf.mxu0 }
 0x100   :  { %v1562_v39 = vpop.f32.mrf.mxu1 }
 0x101   :  { %v1564_v40 = vpop.f32.mrf.mxu0 }
 0x102   :  { %v1566_v41 = vpop.f32.mrf.mxu1 }
 0x103   :  { %v1058_v42 = vpop.f32.mrf.mxu0 }
 0x104   :  { %v1116_v43 = vpop.f32.mrf.mxu1 }
 0x105   :  { %v1059_v44 = vpop.f32.mrf.mxu0 }
 0x106   :  { %v1117_v45 = vpop.f32.mrf.mxu1  ;;  %v1060_v60 = vadd.f32 %v1059_v44, %v1058_v42  ;;  %v1097_v42 = vadd.f32 %v1096_v17, %v1095_v15  ;;  %v581_v44 = vadd.f32 %v1042_v0, %v1571_v59 }
 0x107   :  { %v1061_v46 = vpop.f32.mrf.mxu0  ;;  %v1118_v7 = vadd.f32 %v1117_v45, %v1116_v43  ;;  %v584_v43 = vadd.f32 %v1045_v9, %v1571_v59 }
 0x108   :  { %v1119_v47 = vpop.f32.mrf.mxu1  ;;  %v605_v6 = vadd.f32 %v1060_v60, %v1571_v59  ;;  %v664_v19 = vadd.f32 %v1097_v42, %v576_v12  ;;  %v669_v21 = vadd.f32 %v1100_v14, %v581_v44  ;;  %v1051_v44 = vadd.f32 %v1548_v32, %v1544_v30 }
 0x109   :  { %v1062_v48 = vpop.f32.mrf.mxu0 }
 0x10a   :  { %v1120_v49 = vpop.f32.mrf.mxu1  ;;  %v1063_v4 = vadd.f32 %v1062_v48, %v1061_v46  ;;  %v693_v57 = vadd.f32 %v1118_v7, %v605_v6  ;;  %v672_v6 = vadd.f32 %v1103_v22, %v584_v43  ;;  %v592_v22 = vadd.f32 %v1051_v44, %v1571_v59 }
 0x10b   :  { %v1064_v50 = vpop.f32.mrf.mxu0  ;;  %v1121_v20 = vadd.f32 %v1120_v49, %v1119_v47 }
 0x10c   :  { %v1122_v51 = vpop.f32.mrf.mxu1  ;;  %v608_v18 = vadd.f32 %v1063_v4, %v1571_v59 }
 0x10d   :  { %v1065_v52 = vpop.f32.mrf.mxu0 }
 0x10e   :  { %v1123_v53 = vpop.f32.mrf.mxu1  ;;  %v1066_v46 = vadd.f32 %v1065_v52, %v1064_v50  ;;  %v696_v63 = vadd.f32 %v1121_v20, %v608_v18 }
 0x10f   :  { %v1067_v54 = vpop.f32.mrf.mxu0  ;;  %v1124_v52 = vadd.f32 %v1123_v53, %v1122_v51 }
 0x110   :  { %v1125_v55 = vpop.f32.mrf.mxu1  ;;  %v613_v50 = vadd.f32 %v1066_v46, %v1571_v59 }
 0x111   :  { %v1068_v56 = vpop.f32.mrf.mxu0 }
 0x112   :  { %v1126_v58 = vpop.f32.mrf.mxu1  ;;  %v1069_v60 = vadd.f32 %v1068_v56, %v1067_v54 }
 0x113   :  { %v1070_v61 = vpop.f32.mrf.mxu0  ;;  %v1127_v7 = vadd.f32 %v1126_v58, %v1125_v55  ;;  %v701_v55 = vadd.f32 %v1124_v52, %v613_v50  ;;  %v1106_v58 = vadd.f32 %v1542_v29, %v1538_v27 }
 0x114   :  { %v1573_v62 = vpop.f32.mrf.mxu1 }
 0x115   :  { %v1071_v1 = vpop.f32.mrf.mxu0 }
 0x116   :  { %v1576_v5 = vpop.f32.mrf.mxu1  ;;  %v1072_v42 = vadd.f32 %v1071_v1, %v1070_v61 }
 0x117   :  { %v1073_v8 = vpop.f32.mrf.mxu0  ;;  %v1130_v32 = vadd.f32 %v1576_v5, %v1573_v62 }
 0x118   :  { %v1131_v10 = vpop.f32.mrf.mxu1  ;;  %v621_v30 = vadd.f32 %v1072_v42, %v1571_v59 }
 0x119   :  { %v1074_v16 = vpop.f32.mrf.mxu0  ;;  %v616_v10 = vadd.f32 %v1069_v60, %v1571_v59 }
 0x11a   :  { %v1132_v11 = vpop.f32.mrf.mxu1  ;;  %v589_v16 = vadd.f32 %v1048_v23, %v1571_v59  ;;  %v709_v52 = vadd.f32 %v1130_v32, %v621_v30 }
 0x11b   :  { %v748_v48 = vpop.f32.mrf.mxu0 }
 0x11c   :  { %v749_v24 = vadd.f32 %v748_v48, %v661_v13  ;;  %v780_v45 = vpop.f32.mrf.mxu1  ;;  %v704_v48 = vadd.f32 %v1127_v7, %v616_v10 }
 0x11d   :  { %v781_v15 = vadd.f32 %v780_v45, %v693_v57  ;;  %v1155_v17 = vpop.f32.mrf.mxu0 }
 0x11e   :  { %vm802_vm3 = vcmp.ge.f32.partialorder %v749_v24, 0.0  ;;  %v815_v47 = vmul.f32 0.01, %v749_v24  ;;  %v1171_v49 = vpop.f32.mrf.mxu1 }
 0x11f   :  { %vm810_vm4 = vcmp.ge.f32.partialorder %v781_v15, 0.0  ;;  %v823_v0 = vmul.f32 0.01, %v781_v15  ;;  %v751_v2 = vpop.f32.mrf.mxu0 }
 0x120   :  { %v828_v25 = vsel %vm802_vm3, %v749_v24, %v815_v47  ;;  %v752_v3 = vadd.f32 %v751_v2, %v664_v19  ;;  %v783_v4 = vpop.f32.mrf.mxu1  ;;  %v1109_v24 = vadd.f32 %v1550_v33, %v1546_v31  ;;  %v677_v31 = vadd.f32 %v1106_v58, %v589_v16 }
 0x121   :  { %v1005_v8 = vpack.c.bf16 %v828_v25, %v828_v25  ;;  %v836_v54 = vsel %vm810_vm4, %v781_v15, %v823_v0  ;;  %v784_v56 = vadd.f32 %v783_v4, %v696_v63  ;;  %v1156_v9 = vpop.f32.mrf.mxu0  ;;  %v1054_v15 = vadd.f32 %v1556_v36, %v1552_v34 }
 0x122   :  { %v1013_v12 = vpack.c.bf16 %v836_v54, %v836_v54  ;;  %vm803_vm5 = vcmp.ge.f32.partialorder %v752_v3, 0.0  ;;  %v816_v51 = vmul.f32 0.01, %v752_v3  ;;  %v1172_v53 = vpop.f32.mrf.mxu1  ;;  %v1112_v34 = vadd.f32 %v1558_v37, %v1554_v35 }
 0x123   :  { %895 = vst.msk [vmem:[%s1664_s3] sm:$0xf] %vm894_vm2, %v1005_v8  ;;  %vm811_vm6 = vcmp.ge.f32.partialorder %v784_v56, 0.0  ;;  %v824_v26 = vmul.f32 0.01, %v784_v56  ;;  %v756_v28 = vpop.f32.mrf.mxu0  ;;  %v680_v23 = vadd.f32 %v1109_v24, %v592_v22  ;;  %v597_v25 = vadd.f32 %v1054_v15, %v1571_v59 }
 0x124   :  { %903 = vst.msk [vmem:[%s1664_s3 + $0x20] sm:$0xf] %vm894_vm2, %v1013_v12  ;;  %v829_v61 = vsel %vm803_vm5, %v752_v3, %v816_v51  ;;  %v757_v1 = vadd.f32 %v756_v28, %v669_v21  ;;  %v788_v14 = vpop.f32.mrf.mxu1  ;;  %v1057_v8 = vadd.f32 %v1564_v40, %v1560_v38  ;;  %v1115_v12 = vadd.f32 %v1566_v41, %v1562_v39 }
 0x125   :  { %v1006_v18 = vpack.c.bf16 %v829_v61, %v829_v61  ;;  %v837_v20 = vsel %vm811_vm6, %v784_v56, %v824_v26  ;;  %v789_v11 = vadd.f32 %v788_v14, %v701_v55  ;;  %v1159_v13 = vpop.f32.mrf.mxu0  ;;  %v685_v26 = vadd.f32 %v1112_v34, %v597_v25 }
 0x126   :  { %v1014_v46 = vpack.c.bf16 %v837_v20, %v837_v20  ;;  %vm804_vm7 = vcmp.ge.f32.partialorder %v757_v1, 0.0  ;;  %v817_v27 = vmul.f32 0.01, %v757_v1  ;;  %v1175_v29 = vpop.f32.mrf.mxu1  ;;  %v600_v28 = vadd.f32 %v1057_v8, %v1571_v59 }
 0x127   :  { %896 = vst.msk [vmem:[%s1664_s3 + $0x4] sm:$0xf] %vm894_vm2, %v1006_v18  ;;  %vm812_vm8 = vcmp.ge.f32.partialorder %v789_v11, 0.0  ;;  %v825_v57 = vmul.f32 0.01, %v789_v11  ;;  %v759_v43 = vpop.f32.mrf.mxu0 }
 0x128   :  { %904 = vst.msk [vmem:[%s1664_s3 + $0x24] sm:$0xf] %vm894_vm2, %v1014_v46  ;;  %v830_v45 = vsel %vm804_vm7, %v757_v1, %v817_v27  ;;  %v760_v62 = vadd.f32 %v759_v43, %v672_v6  ;;  %v791_v5 = vpop.f32.mrf.mxu1  ;;  %v688_v16 = vadd.f32 %v1115_v12, %v600_v28 }
 0x129   :  { %v1007_v17 = vpack.c.bf16 %v830_v45, %v830_v45  ;;  %v838_v19 = vsel %vm812_vm8, %v789_v11, %v825_v57  ;;  %v792_v21 = vadd.f32 %v791_v5, %v704_v48  ;;  %v1160_v60 = vpop.f32.mrf.mxu0 }
 0x12a   :  { %v1015_v47 = vpack.c.bf16 %v838_v19, %v838_v19  ;;  %vm805_vm9 = vcmp.ge.f32.partialorder %v760_v62, 0.0  ;;  %v818_v49 = vmul.f32 0.01, %v760_v62  ;;  %v1176_v63 = vpop.f32.mrf.mxu1 }
 0x12b   :  { %897 = vst.msk [vmem:[%s1664_s3 + $0x8] sm:$0xf] %vm894_vm2, %v1007_v17  ;;  %vm813_vm10 = vcmp.ge.f32.partialorder %v792_v21, 0.0  ;;  %v826_v33 = vmul.f32 0.01, %v792_v21  ;;  %v764_v50 = vpop.f32.mrf.mxu0 }
 0x12c   :  { %905 = vst.msk [vmem:[%s1664_s3 + $0x28] sm:$0xf] %vm894_vm2, %v1015_v47  ;;  %v831_v36 = vsel %vm805_vm9, %v760_v62, %v818_v49  ;;  %v765_v0 = vadd.f32 %v764_v50, %v677_v31  ;;  %v796_v2 = vpop.f32.mrf.mxu1 }
 0x12d   :  { %v1008_v3 = vpack.c.bf16 %v831_v36, %v831_v36  ;;  %v839_v4 = vsel %vm813_vm10, %v792_v21, %v826_v33  ;;  %v797_v6 = vadd.f32 %v796_v2, %v709_v52  ;;  %v1163_v7 = vpop.f32.mrf.mxu0 }
 0x12e   :  { %v1016_v54 = vpack.c.bf16 %v839_v4, %v839_v4  ;;  %vm806_vm11 = vcmp.ge.f32.partialorder %v765_v0, 0.0  ;;  %v819_v35 = vmul.f32 0.01, %v765_v0  ;;  %v1179_v37 = vpop.f32.mrf.mxu1 }
 0x12f   :  { %898 = vst.msk [vmem:[%s1664_s3 + $0xc] sm:$0xf] %vm894_vm2, %v1008_v3  ;;  %vm814_vm12 = vcmp.ge.f32.partialorder %v797_v6, 0.0  ;;  %v827_v56 = vmul.f32 0.01, %v797_v6  ;;  %v767_v9 = vpop.f32.mrf.mxu0 }
 0x130   :  { %906 = vst.msk [vmem:[%s1664_s3 + $0x2c] sm:$0xf] %vm894_vm2, %v1016_v54  ;;  %v832_v10 = vsel %vm806_vm11, %v765_v0, %v819_v35  ;;  %v768_v38 = vadd.f32 %v767_v9, %v680_v23  ;;  %v799_v40 = vpop.f32.mrf.mxu1 }
 0x131   :  { %v1009_v51 = vpack.c.bf16 %v832_v10, %v832_v10  ;;  %v840_v53 = vsel %vm814_vm12, %v797_v6, %v827_v56  ;;  %v1164_v42 = vpop.f32.mrf.mxu0 }
 0x132   :  { %v1017_v55 = vpack.c.bf16 %v840_v53, %v840_v53  ;;  %vm807_vm14 = vcmp.ge.f32.partialorder %v768_v38, 0.0  ;;  %v820_v58 = vmul.f32 0.01, %v768_v38  ;;  %v1180_v44 = vpop.f32.mrf.mxu1 }
 0x133   :  { %899 = vst.msk [vmem:[%s1664_s3 + $0x10] sm:$0xf] %vm894_vm2, %v1009_v51  ;;  %v772_v61 = vpop.f32.mrf.mxu0 }
 0x134   :  { %908 = vst.msk [vmem:[%s1664_s3 + $0x30] sm:$0x1] %vm907_vm13, %v1017_v55  ;;  %v833_v39 = vsel %vm807_vm14, %v768_v38, %v820_v58  ;;  %v773_v41 = vadd.f32 %v772_v61, %v685_v26 }
 0x135   :  { %v1010_v1 = vpack.c.bf16 %v833_v39, %v833_v39  ;;  %v1167_v14 = vpop.f32.mrf.mxu0 }
 0x136   :  { %vm808_vm15 = vcmp.ge.f32.partialorder %v773_v41, 0.0  ;;  %v821_v59 = vmul.f32 0.01, %v773_v41 }
 0x137   :  { %900 = vst.msk [vmem:[%s1664_s3 + $0x14] sm:$0xf] %vm894_vm2, %v1010_v1  ;;  %v775_v18 = vpop.f32.mrf.mxu0 }
 0x138   :  { %v834_v20 = vsel %vm808_vm15, %v773_v41, %v821_v59  ;;  %v776_v11 = vadd.f32 %v775_v18, %v688_v16 }
 0x139   :  { %v1011_v13 = vpack.c.bf16 %v834_v20, %v834_v20  ;;  %v1168_v46 = vpop.f32.mrf.mxu0 }
 0x13a   :  { %vm809_vm0 = vcmp.ge.f32.partialorder %v776_v11, 0.0  ;;  %v822_v27 = vmul.f32 0.01, %v776_v11 }
 0x13b   :  { %901 = vst.msk [vmem:[%s1664_s3 + $0x18] sm:$0xf] %vm894_vm2, %v1011_v13 }
 0x13c   :  { %v835_v29 = vsel %vm809_vm0, %v776_v11, %v822_v27 }
 0x13d   :  { %v1012_v48 = vpack.c.bf16 %v835_v29, %v835_v29 }
 0x13f   :  { %902 = vst.msk [vmem:[%s1664_s3 + $0x1c] sm:$0xf] %vm894_vm2, %v1012_v48 }

// kernel: cnn_actor_critic_forward.9
= control target key start
LH: loop header
LB: loop body
LE: loop exit
PB: predicated region body
PF: predicated region fallthrough
CT: control target
= control target key end

     0   :  { %v505_v22 = vmov 1966171168   ;;  %v99_v24 = vlaneseq  ;;  %vm388_vm0 = vcmask 58368   ;;  %s631_s1 = inlined_call_operand.vmem [shape: bf16[512,8], index: 1, kind: input, shape index: {}]   ;;  %s632_s0 = inlined_call_operand.vmem [shape: bf16[2,512], index: 0, kind: input, shape index: {}]   ;;  %s633_s2 = inlined_call_operand.vmem [shape: f32[1,8], index: 2, kind: input, shape index: {}]   ;;  %s634_s3 = inlined_call_operand.vmem [shape: f32[2,8], index: 3, kind: output, shape index: {}]  }
   0x1   :  { %v473_v0 = vld [vmem:[%s631_s1 + $0x78] sm:$0xff]   ;;  %v477_v4 = vld [vmem:[%s631_s1 + $0x70] sm:$0xff]   ;;  %v481_v8 = vld [vmem:[%s631_s1 + $0x68] sm:$0xff]   ;;  %v97_v23 = vunpack.c.l.s4 %v505_v22 }
   0x2   :  { %v474_v1 = vld [vmem:[%s631_s1 + $0xf8] sm:$0xff]   ;;  %428 = vmatprep.subr.bf16.mxu0 %v473_v0  ;;  %v478_v5 = vld [vmem:[%s631_s1 + $0xf0] sm:$0xff]   ;;  %v482_v9 = vld [vmem:[%s631_s1 + $0xe8] sm:$0xff]   ;;  %v100_v30 = vshrl.u32 %v99_v24, 7 }
   0x3   :  { %v475_v2 = vld [vmem:[%s631_s1 + $0x38] sm:$0xff]   ;;  %450 = vmatprep.subr.bf16.mxu1 %v474_v1  ;;  %v479_v6 = vld [vmem:[%s631_s1 + $0x30] sm:$0xff]   ;;  %v483_v10 = vld [vmem:[%s631_s1 + $0x28] sm:$0xff]   ;;  %v98_v29 = vunpack.c.0.s8 %v97_v23 }
   0x4   :  { %v476_v3 = vld [vmem:[%s631_s1 + $0xb8] sm:$0xff]   ;;  %429 = vmatpush3.bf16.msra.mxu0 %v475_v2  ;;  %v480_v7 = vld [vmem:[%s631_s1 + $0xb0] sm:$0xff]   ;;  %v484_v11 = vld [vmem:[%s631_s1 + $0xa8] sm:$0xff]  }
   0x5   :  { %451 = vmatpush3.bf16.msra.mxu1 %v476_v3  ;;  %430 = vmatprep.subr.bf16.mxu0 %v477_v4  ;;  %v485_v12 = vld [vmem:[%s631_s1 + $0x60] sm:$0xff]   ;;  %v489_v16 = vld [vmem:[%s631_s1 + $0x58] sm:$0xff]   ;;  %v493_v20 = vld [vmem:[%s631_s1 + $0x50] sm:$0xff]   ;;  %v101_v35 = vsub.s32 %v98_v29, %v100_v30 }
   0x6   :  { %452 = vmatprep.subr.bf16.mxu1 %v478_v5  ;;  %v486_v13 = vld [vmem:[%s631_s1 + $0xe0] sm:$0xff]   ;;  %v490_v17 = vld [vmem:[%s631_s1 + $0xd8] sm:$0xff]   ;;  %v494_v21 = vld [vmem:[%s631_s1 + $0xd0] sm:$0xff]  }
   0x7   :  { %v487_v14 = vld [vmem:[%s631_s1 + $0x20] sm:$0xff]   ;;  %v491_v18 = vld [vmem:[%s631_s1 + $0x18] sm:$0xff]   ;;  %v495_v25 = vld [vmem:[%s631_s1 + $0x10] sm:$0xff]  }
   0x8   :  { %431 = vmatpush3.bf16.msra.mxu0 %v479_v6  ;;  %v488_v15 = vld [vmem:[%s631_s1 + $0xa0] sm:$0xff]   ;;  %v492_v19 = vld [vmem:[%s631_s1 + $0x98] sm:$0xff]   ;;  %v496_v26 = vld [vmem:[%s631_s1 + $0x90] sm:$0xff]  }
   0x9   :  { %453 = vmatpush3.bf16.msra.mxu1 %v480_v7  ;;  %432 = vmatprep.subr.bf16.mxu0 %v481_v8  ;;  %v497_v27 = vld [vmem:[%s631_s1 + $0x48] sm:$0xff]   ;;  %v501_v33 = vld [vmem:[%s631_s1 + $0x40] sm:$0xff]  }
   0xa   :  { %454 = vmatprep.subr.bf16.mxu1 %v482_v9  ;;  %v498_v28 = vld [vmem:[%s631_s1 + $0xc8] sm:$0xff]   ;;  %v502_v34 = vld [vmem:[%s631_s1 + $0xc0] sm:$0xff]  }
   0xb   :  { %v499_v31 = vld [vmem:[%s631_s1 + $0x8] sm:$0xff]   ;;  %v503_v36 = vld [vmem:[%s631_s1] sm:$0xff]  }
   0xc   :  { %433 = vmatpush3.bf16.msra.mxu0 %v483_v10  ;;  %v500_v32 = vld [vmem:[%s631_s1 + $0x88] sm:$0xff]   ;;  %v504_v37 = vld [vmem:[%s631_s1 + $0x80] sm:$0xff]  }
   0xd   :  { %455 = vmatpush3.bf16.msra.mxu1 %v484_v11  ;;  %434 = vmatprep.subr.bf16.mxu0 %v485_v12  ;;  %v395_v38 = vld.sshfl [vmem:[%s632_s0] sm:$0x33 pattern:$0x75316420] }
   0xe   :  { %456 = vmatprep.subr.bf16.mxu1 %v486_v13  ;;  %v95_v39 = vcombine.high %v395_v38, %v395_v38  ;;  %v102_v40 = vrot.slane %v395_v38, %v101_v35  ;;  %v394_v46 = vld [vmem:[%s633_s2] ss:$0 sm:$0xff] }
  0x10   :  { %435 = vmatpush3.bf16.msra.mxu0 %v487_v14  ;;  %v109_v41 = vrot.slane %v95_v39, %v101_v35  ;;  %v110_v42 = vcombine.high %v102_v40, %v102_v40 }
  0x11   :  { %457 = vmatpush3.bf16.msra.mxu1 %v488_v15  ;;  %436 = vmatprep.subr.bf16.mxu0 %v489_v16 }
  0x12   :  { %458 = vmatprep.subr.bf16.mxu1 %v490_v17  ;;  %340 = vmatprep.mubr.bf16.mxu0 %v109_v41  ;;  %v111_v43 = vcombine.high %v109_v41, %v109_v41 }
  0x14   :  { %437 = vmatpush3.bf16.msra.mxu0 %v491_v18  ;;  %380 = vmatprep.mubr.bf16.mxu1 %v111_v43 }
  0x15   :  { %459 = vmatpush3.bf16.msra.mxu1 %v492_v19  ;;  %438 = vmatprep.subr.bf16.mxu0 %v493_v20 }
  0x16   :  { %460 = vmatprep.subr.bf16.mxu1 %v494_v21 }
  0x18   :  { %439 = vmatpush3.bf16.msra.mxu0 %v495_v25 }
  0x19   :  { %461 = vmatpush3.bf16.msra.mxu1 %v496_v26  ;;  %440 = vmatprep.subr.bf16.mxu0 %v497_v27 }
  0x1a   :  { %462 = vmatprep.subr.bf16.mxu1 %v498_v28 }
  0x1c   :  { %441 = vmatpush3.bf16.msra.mxu0 %v499_v31 }
  0x1d   :  { %463 = vmatpush3.bf16.msra.mxu1 %v500_v32  ;;  %442 = vmatprep.subr.bf16.mxu0 %v501_v33 }
  0x1e   :  { %464 = vmatprep.subr.bf16.mxu1 %v502_v34 }
  0x20   :  { %443 = vmatpush3.bf16.msra.mxu0 %v503_v36 }
  0x21   :  { %465 = vmatpush3.bf16.msra.mxu1 %v504_v37 }
  0x23   :  { %341 = vmatmul.mubr.bf16.vlgmr.msra.gmra.mxu0 %v102_v40 }
  0x24   :  { %381 = vmatmul.mubr.bf16.vlgmr.msra.gmra.mxu1 %v110_v42 }
  0xe3   :  { %v444_v44 = vpop.f32.mrf.mxu0 }
  0xe4   :  { %v466_v45 = vpop.f32.mrf.mxu1 }
  0xe5   :  { %v445_v47 = vpop.f32.mrf.mxu0 }
  0xe6   :  { %v446_v48 = vadd.f32 %v445_v47, %v444_v44  ;;  %v467_v49 = vpop.f32.mrf.mxu1 }
  0xe7   :  { %v447_v50 = vpop.f32.mrf.mxu0  ;;  %v468_v52 = vadd.f32 %v467_v49, %v466_v45 }
  0xe8   :  { %v343_v51 = vadd.f32 %v446_v48, %v394_v46  ;;  %v469_v53 = vpop.f32.mrf.mxu1 }
  0xe9   :  { %v448_v54 = vpop.f32.mrf.mxu0 }
  0xea   :  { %v383_v55 = vadd.f32 %v468_v52, %v343_v51  ;;  %v470_v56 = vpop.f32.mrf.mxu1 }
  0xec   :  { %389 = vst.msk [vmem:[%s634_s3] sm:$0x3] %vm388_vm0, %v383_v55 }

// kernel: cnn_actor_critic_forward.8
= control target key start
LH: loop header
LB: loop body
LE: loop exit
PB: predicated region body
PF: predicated region fallthrough
CT: control target
= control target key end

     0   :  { %v805_v36 = vlaneseq  ;;  %v8026_v37 = vmov 1966171168   ;;  %vm4934_vm0 = vcmask 523264   ;;  %s10665_s1 = inlined_call_operand.vmem [shape: bf16[3136,512], index: 1, kind: input, shape index: {}]   ;;  %s10666_s0 = inlined_call_operand.vmem [shape: bf16[2,3136], index: 0, kind: input, shape index: {}]   ;;  %s10667_s2 = inlined_call_operand.vmem [shape: f32[1,512], index: 2, kind: input, shape index: {}]   ;;  %s10668_s3 = inlined_call_operand.vmem [shape: bf16[2,512], index: 3, kind: output, shape index: {}]  }
   0x1   :  { %v6846_v0 = vld [vmem:[%s10665_s1 + $0xe4] ss:$16 sps:$4 sm:$0xff]   ;;  %v6850_v2 = vld [vmem:[%s10665_s1 + $0xe0] ss:$16 sps:$4 sm:$0xff]   ;;  %v831_v38 = vunpack.c.l.s4 %v8026_v37 }
   0x2   :  { %v6848_v1 = vld [vmem:[%s10665_s1 + $0x2e4] ss:$16 sps:$4 sm:$0xff]   ;;  %4938 = vmatprep.subr.bf16.mxu0 %v6846_v0  ;;  %v6851_v3 = vld [vmem:[%s10665_s1 + $0x2e0] ss:$16 sps:$4 sm:$0xff]   ;;  %v8165_v42 = vshrl.u32 %v805_v36, 7 }
   0x3   :  { %4979 = vmatprep.subr.bf16.mxu1 %v6848_v1  ;;  %v6852_v4 = vld [vmem:[%s10665_s1 + $0xc4] ss:$16 sps:$4 sm:$0xff]   ;;  %4939 = vmatpush1.bf16.msra.mxu0 %v6850_v2  ;;  %v6856_v6 = vld [vmem:[%s10665_s1 + $0xc0] ss:$16 sps:$4 sm:$0xff]   ;;  %v832_v43 = vunpack.c.0.s8 %v831_v38 }
   0x4   :  { %4980 = vmatpush1.bf16.msra.mxu1 %v6851_v3  ;;  %v6854_v5 = vld [vmem:[%s10665_s1 + $0x2c4] ss:$16 sps:$4 sm:$0xff]   ;;  %4940 = vmatprep.subr.bf16.mxu0 %v6852_v4  ;;  %v6857_v7 = vld [vmem:[%s10665_s1 + $0x2c0] ss:$16 sps:$4 sm:$0xff]  }
   0x5   :  { %4981 = vmatprep.subr.bf16.mxu1 %v6854_v5  ;;  %v6858_v8 = vld [vmem:[%s10665_s1 + $0xa4] ss:$16 sps:$4 sm:$0xff]   ;;  %v6862_v10 = vld [vmem:[%s10665_s1 + $0xa0] ss:$16 sps:$4 sm:$0xff]   ;;  %v8183_v49 = vsub.s32 %v832_v43, %v8165_v42 }
   0x6   :  { %v6860_v9 = vld [vmem:[%s10665_s1 + $0x2a4] ss:$16 sps:$4 sm:$0xff]   ;;  %v6863_v11 = vld [vmem:[%s10665_s1 + $0x2a0] ss:$16 sps:$4 sm:$0xff]  }
   0x7   :  { %4941 = vmatpush1.bf16.msra.mxu0 %v6856_v6  ;;  %v6864_v12 = vld [vmem:[%s10665_s1 + $0x84] ss:$16 sps:$4 sm:$0xff]   ;;  %v6868_v14 = vld [vmem:[%s10665_s1 + $0x80] ss:$16 sps:$4 sm:$0xff]  }
   0x8   :  { %4982 = vmatpush1.bf16.msra.mxu1 %v6857_v7  ;;  %4942 = vmatprep.subr.bf16.mxu0 %v6858_v8  ;;  %v6866_v13 = vld [vmem:[%s10665_s1 + $0x284] ss:$16 sps:$4 sm:$0xff]   ;;  %v6869_v15 = vld [vmem:[%s10665_s1 + $0x280] ss:$16 sps:$4 sm:$0xff]  }
   0x9   :  { %4983 = vmatprep.subr.bf16.mxu1 %v6860_v9  ;;  %v6870_v16 = vld [vmem:[%s10665_s1 + $0x64] ss:$16 sps:$4 sm:$0xff]   ;;  %v6874_v18 = vld [vmem:[%s10665_s1 + $0x60] ss:$16 sps:$4 sm:$0xff]  }
   0xa   :  { %v6872_v17 = vld [vmem:[%s10665_s1 + $0x264] ss:$16 sps:$4 sm:$0xff]   ;;  %v6875_v19 = vld [vmem:[%s10665_s1 + $0x260] ss:$16 sps:$4 sm:$0xff]  }
   0xb   :  { %4943 = vmatpush1.bf16.msra.mxu0 %v6862_v10  ;;  %v6876_v20 = vld [vmem:[%s10665_s1 + $0x44] ss:$16 sps:$4 sm:$0xff]   ;;  %v6880_v22 = vld [vmem:[%s10665_s1 + $0x40] ss:$16 sps:$4 sm:$0xff]  }
   0xc   :  { %4984 = vmatpush1.bf16.msra.mxu1 %v6863_v11  ;;  %4944 = vmatprep.subr.bf16.mxu0 %v6864_v12  ;;  %v6878_v21 = vld [vmem:[%s10665_s1 + $0x244] ss:$16 sps:$4 sm:$0xff]   ;;  %v6881_v23 = vld [vmem:[%s10665_s1 + $0x240] ss:$16 sps:$4 sm:$0xff]  }
   0xd   :  { %4985 = vmatprep.subr.bf16.mxu1 %v6866_v13  ;;  %v6882_v24 = vld [vmem:[%s10665_s1 + $0x24] ss:$16 sps:$4 sm:$0xff]   ;;  %v6886_v26 = vld [vmem:[%s10665_s1 + $0x20] ss:$16 sps:$4 sm:$0xff]  }
   0xe   :  { %v6884_v25 = vld [vmem:[%s10665_s1 + $0x224] ss:$16 sps:$4 sm:$0xff]   ;;  %v6887_v27 = vld [vmem:[%s10665_s1 + $0x220] ss:$16 sps:$4 sm:$0xff]  }
   0xf   :  { %4945 = vmatpush1.bf16.msra.mxu0 %v6868_v14  ;;  %v6888_v28 = vld [vmem:[%s10665_s1 + $0x4] ss:$16 sps:$4 sm:$0xff]   ;;  %v6892_v30 = vld [vmem:[%s10665_s1] ss:$16 sps:$4 sm:$0xff]  }
  0x10   :  { %4986 = vmatpush1.bf16.msra.mxu1 %v6869_v15  ;;  %4946 = vmatprep.subr.bf16.mxu0 %v6870_v16  ;;  %v6890_v29 = vld [vmem:[%s10665_s1 + $0x204] ss:$16 sps:$4 sm:$0xff]   ;;  %v6893_v31 = vld [vmem:[%s10665_s1 + $0x200] ss:$16 sps:$4 sm:$0xff]  }
  0x11   :  { %4987 = vmatprep.subr.bf16.mxu1 %v6872_v17  ;;  %v6894_v32 = vld [vmem:[%s10665_s1 + $0x1e4] ss:$16 sps:$4 sm:$0xff]   ;;  %v6898_v34 = vld [vmem:[%s10665_s1 + $0x1e0] ss:$16 sps:$4 sm:$0xff]  }
  0x12   :  { %v6896_v33 = vld [vmem:[%s10665_s1 + $0x3e4] ss:$16 sps:$4 sm:$0xff]   ;;  %v6899_v35 = vld [vmem:[%s10665_s1 + $0x3e0] ss:$16 sps:$4 sm:$0xff]  }
  0x13   :  { %4947 = vmatpush1.bf16.msra.mxu0 %v6874_v18  ;;  %v6900_v39 = vld [vmem:[%s10665_s1 + $0x1c4] ss:$16 sps:$4 sm:$0xff]   ;;  %v6904_v41 = vld [vmem:[%s10665_s1 + $0x1c0] ss:$16 sps:$4 sm:$0xff]  }
  0x14   :  { %4988 = vmatpush1.bf16.msra.mxu1 %v6875_v19  ;;  %4948 = vmatprep.subr.bf16.mxu0 %v6876_v20  ;;  %v6902_v40 = vld [vmem:[%s10665_s1 + $0x3c4] ss:$16 sps:$4 sm:$0xff]   ;;  %v6905_v44 = vld [vmem:[%s10665_s1 + $0x3c0] ss:$16 sps:$4 sm:$0xff]  }
  0x15   :  { %4989 = vmatprep.subr.bf16.mxu1 %v6878_v21  ;;  %v6906_v45 = vld [vmem:[%s10665_s1 + $0x1a4] ss:$16 sps:$4 sm:$0xff]   ;;  %v6910_v47 = vld [vmem:[%s10665_s1 + $0x1a0] ss:$16 sps:$4 sm:$0xff]  }
  0x16   :  { %v6908_v46 = vld [vmem:[%s10665_s1 + $0x3a4] ss:$16 sps:$4 sm:$0xff]   ;;  %v6911_v48 = vld [vmem:[%s10665_s1 + $0x3a0] ss:$16 sps:$4 sm:$0xff]  }
  0x17   :  { %4949 = vmatpush1.bf16.msra.mxu0 %v6880_v22  ;;  %v6912_v50 = vld [vmem:[%s10665_s1 + $0x184] ss:$16 sps:$4 sm:$0xff]   ;;  %v6916_v53 = vld [vmem:[%s10665_s1 + $0x180] ss:$16 sps:$4 sm:$0xff]  }
  0x18   :  { %4990 = vmatpush1.bf16.msra.mxu1 %v6881_v23  ;;  %4950 = vmatprep.subr.bf16.mxu0 %v6882_v24  ;;  %v6914_v51 = vld [vmem:[%s10665_s1 + $0x384] ss:$16 sps:$4 sm:$0xff]   ;;  %v6917_v55 = vld [vmem:[%s10665_s1 + $0x380] ss:$16 sps:$4 sm:$0xff]  }
  0x19   :  { %4991 = vmatprep.subr.bf16.mxu1 %v6884_v25  ;;  %v15_v52 = vld [vmem:[%s10666_s0] sm:$0xff] }
  0x1a   :  { %v836_v54 = vrot.slane %v15_v52, %v8183_v49  ;;  %v6918_v56 = vld [vmem:[%s10665_s1 + $0x164] ss:$16 sps:$4 sm:$0xff]   ;;  %v6922_v59 = vld [vmem:[%s10665_s1 + $0x160] ss:$16 sps:$4 sm:$0xff]   ;;  %v829_v1 = vcombine.high %v15_v52, %v15_v52 }
  0x1b   :  { %4951 = vmatpush1.bf16.msra.mxu0 %v6886_v26  ;;  %v6920_v57 = vld [vmem:[%s10665_s1 + $0x364] ss:$16 sps:$4 sm:$0xff]   ;;  %v6923_v61 = vld [vmem:[%s10665_s1 + $0x360] ss:$16 sps:$4 sm:$0xff]  }
  0x1c   :  { %4992 = vmatpush1.bf16.msra.mxu1 %v6887_v27  ;;  %4952 = vmatprep.subr.bf16.mxu0 %v6888_v28  ;;  %v844_v58 = vcombine.high %v836_v54, %v836_v54  ;;  %v6924_v62 = vld [vmem:[%s10665_s1 + $0x144] ss:$16 sps:$4 sm:$0xff]   ;;  %v6928_v2 = vld [vmem:[%s10665_s1 + $0x140] ss:$16 sps:$4 sm:$0xff]   ;;  %v8241_v6 = vrot.slane %v829_v1, %v8183_v49  ;;  %v8261_v13 = vrot.slane %v836_v54, %v8183_v49 }
  0x1d   :  { %4993 = vmatprep.subr.bf16.mxu1 %v6890_v29  ;;  %v6926_v63 = vld [vmem:[%s10665_s1 + $0x344] ss:$16 sps:$4 sm:$0xff]   ;;  %v6929_v3 = vld [vmem:[%s10665_s1 + $0x340] ss:$16 sps:$4 sm:$0xff]  }
  0x1e   :  { %v8211_v60 = vrot.slane %v844_v58, %v8183_v49  ;;  %v6930_v4 = vld [vmem:[%s10665_s1 + $0x124] ss:$16 sps:$4 sm:$0xff]   ;;  %v6934_v7 = vld [vmem:[%s10665_s1 + $0x120] ss:$16 sps:$4 sm:$0xff]   ;;  %v845_v11 = vcombine.high %v8241_v6, %v8241_v6  ;;  %v8277_v18 = vcombine.high %v8261_v13, %v8261_v13 }
  0x1f   :  { %4953 = vmatpush1.bf16.msra.mxu0 %v6892_v30  ;;  %v6932_v5 = vld [vmem:[%s10665_s1 + $0x324] ss:$16 sps:$4 sm:$0xff]   ;;  %v6935_v8 = vld [vmem:[%s10665_s1 + $0x320] ss:$16 sps:$4 sm:$0xff]  }
  0x20   :  { %4994 = vmatpush1.bf16.msra.mxu1 %v6893_v31  ;;  %4954 = vmatprep.subr.bf16.mxu0 %v6894_v32  ;;  %v8224_v0 = vcombine.high %v8211_v60, %v8211_v60  ;;  %v6936_v9 = vld [vmem:[%s10665_s1 + $0x104] ss:$16 sps:$4 sm:$0xff]   ;;  %v6940_v12 = vld [vmem:[%s10665_s1 + $0x100] ss:$16 sps:$4 sm:$0xff]   ;;  %v8273_v17 = vrot.slane %v845_v11, %v8183_v49 }
  0x21   :  { %4995 = vmatprep.subr.bf16.mxu1 %v6896_v33  ;;  %4970 = vmatprep.mubr.bf16.mxu0 %v8211_v60  ;;  %v6938_v10 = vld [vmem:[%s10665_s1 + $0x304] ss:$16 sps:$4 sm:$0xff]   ;;  %v6941_v14 = vld [vmem:[%s10665_s1 + $0x300] ss:$16 sps:$4 sm:$0xff]  }
  0x22   :  { %5011 = vmatprep.mubr.bf16.mxu1 %v8224_v0  ;;  %v6944_v15 = vld [vmem:[%s10665_s1 + $0x4e4] ss:$16 sps:$4 sm:$0xff]   ;;  %v6942_v19 = vld [vmem:[%s10665_s1 + $0x4e0] ss:$16 sps:$4 sm:$0xff]   ;;  %v8293_v23 = vcombine.high %v8273_v17, %v8273_v17 }
  0x23   :  { %4955 = vmatpush2.bf16.msra.mxu0 %v6898_v34  ;;  %v6947_v16 = vld [vmem:[%s10665_s1 + $0x6e4] ss:$16 sps:$4 sm:$0xff]   ;;  %v6945_v20 = vld [vmem:[%s10665_s1 + $0x6e0] ss:$16 sps:$4 sm:$0xff]  }
  0x24   :  { %4996 = vmatpush2.bf16.msra.mxu1 %v6899_v35  ;;  %4956 = vmatprep.subr.bf16.mxu0 %v6900_v39  ;;  %v6950_v21 = vld [vmem:[%s10665_s1 + $0x4c4] ss:$16 sps:$4 sm:$0xff]   ;;  %v6948_v24 = vld [vmem:[%s10665_s1 + $0x4c0] ss:$16 sps:$4 sm:$0xff]  }
  0x25   :  { %4997 = vmatprep.subr.bf16.mxu1 %v6902_v40  ;;  %v6953_v22 = vld [vmem:[%s10665_s1 + $0x6c4] ss:$16 sps:$4 sm:$0xff]   ;;  %v6951_v25 = vld [vmem:[%s10665_s1 + $0x6c0] ss:$16 sps:$4 sm:$0xff]  }
  0x26   :  { %v6956_v26 = vld [vmem:[%s10665_s1 + $0x4a4] ss:$16 sps:$4 sm:$0xff]   ;;  %v6954_v28 = vld [vmem:[%s10665_s1 + $0x4a0] ss:$16 sps:$4 sm:$0xff]  }
  0x27   :  { %4957 = vmatpush2.bf16.msra.mxu0 %v6904_v41  ;;  %v6959_v27 = vld [vmem:[%s10665_s1 + $0x6a4] ss:$16 sps:$4 sm:$0xff]   ;;  %v6957_v29 = vld [vmem:[%s10665_s1 + $0x6a0] ss:$16 sps:$4 sm:$0xff]  }
  0x28   :  { %4998 = vmatpush2.bf16.msra.mxu1 %v6905_v44  ;;  %4958 = vmatprep.subr.bf16.mxu0 %v6906_v45  ;;  %v6962_v30 = vld [vmem:[%s10665_s1 + $0x484] ss:$16 sps:$4 sm:$0xff]   ;;  %v6960_v32 = vld [vmem:[%s10665_s1 + $0x480] ss:$16 sps:$4 sm:$0xff]  }
  0x29   :  { %4999 = vmatprep.subr.bf16.mxu1 %v6908_v46  ;;  %v6965_v31 = vld [vmem:[%s10665_s1 + $0x684] ss:$16 sps:$4 sm:$0xff]   ;;  %v6963_v33 = vld [vmem:[%s10665_s1 + $0x680] ss:$16 sps:$4 sm:$0xff]  }
  0x2a   :  { %v6968_v34 = vld [vmem:[%s10665_s1 + $0x464] ss:$16 sps:$4 sm:$0xff]   ;;  %v6966_v36 = vld [vmem:[%s10665_s1 + $0x460] ss:$16 sps:$4 sm:$0xff]  }
  0x2b   :  { %4959 = vmatpush2.bf16.msra.mxu0 %v6910_v47  ;;  %v6971_v35 = vld [vmem:[%s10665_s1 + $0x664] ss:$16 sps:$4 sm:$0xff]   ;;  %v6969_v37 = vld [vmem:[%s10665_s1 + $0x660] ss:$16 sps:$4 sm:$0xff]  }
  0x2c   :  { %5000 = vmatpush2.bf16.msra.mxu1 %v6911_v48  ;;  %4960 = vmatprep.subr.bf16.mxu0 %v6912_v50  ;;  %v6974_v38 = vld [vmem:[%s10665_s1 + $0x444] ss:$16 sps:$4 sm:$0xff]   ;;  %v6972_v40 = vld [vmem:[%s10665_s1 + $0x440] ss:$16 sps:$4 sm:$0xff]  }
  0x2d   :  { %5001 = vmatprep.subr.bf16.mxu1 %v6914_v51  ;;  %v6977_v39 = vld [vmem:[%s10665_s1 + $0x644] ss:$16 sps:$4 sm:$0xff]   ;;  %v6975_v41 = vld [vmem:[%s10665_s1 + $0x640] ss:$16 sps:$4 sm:$0xff]  }
  0x2e   :  { %v6980_v43 = vld [vmem:[%s10665_s1 + $0x424] ss:$16 sps:$4 sm:$0xff]   ;;  %v6978_v45 = vld [vmem:[%s10665_s1 + $0x420] ss:$16 sps:$4 sm:$0xff]  }
  0x2f   :  { %4961 = vmatpush2.bf16.msra.mxu0 %v6916_v53  ;;  %v6983_v44 = vld [vmem:[%s10665_s1 + $0x624] ss:$16 sps:$4 sm:$0xff]   ;;  %v6981_v46 = vld [vmem:[%s10665_s1 + $0x620] ss:$16 sps:$4 sm:$0xff]  }
  0x30   :  { %5002 = vmatpush2.bf16.msra.mxu1 %v6917_v55  ;;  %4962 = vmatprep.subr.bf16.mxu0 %v6918_v56  ;;  %v6986_v47 = vld [vmem:[%s10665_s1 + $0x404] ss:$16 sps:$4 sm:$0xff]   ;;  %v6984_v50 = vld [vmem:[%s10665_s1 + $0x400] ss:$16 sps:$4 sm:$0xff]  }
  0x31   :  { %5003 = vmatprep.subr.bf16.mxu1 %v6920_v57  ;;  %v6989_v48 = vld [vmem:[%s10665_s1 + $0x604] ss:$16 sps:$4 sm:$0xff]   ;;  %v6987_v51 = vld [vmem:[%s10665_s1 + $0x600] ss:$16 sps:$4 sm:$0xff]  }
  0x32   :  { %v6992_v52 = vld [vmem:[%s10665_s1 + $0x5e4] ss:$16 sps:$4 sm:$0xff]   ;;  %v6990_v54 = vld [vmem:[%s10665_s1 + $0x5e0] ss:$16 sps:$4 sm:$0xff]  }
  0x33   :  { %4963 = vmatpush2.bf16.msra.mxu0 %v6922_v59  ;;  %v6995_v53 = vld [vmem:[%s10665_s1 + $0x7e4] ss:$16 sps:$4 sm:$0xff]   ;;  %v6993_v55 = vld [vmem:[%s10665_s1 + $0x7e0] ss:$16 sps:$4 sm:$0xff]  }
  0x34   :  { %5004 = vmatpush2.bf16.msra.mxu1 %v6923_v61  ;;  %4964 = vmatprep.subr.bf16.mxu0 %v6924_v62  ;;  %v6998_v56 = vld [vmem:[%s10665_s1 + $0x5c4] ss:$16 sps:$4 sm:$0xff]   ;;  %v6996_v58 = vld [vmem:[%s10665_s1 + $0x5c0] ss:$16 sps:$4 sm:$0xff]  }
  0x35   :  { %5005 = vmatprep.subr.bf16.mxu1 %v6926_v63  ;;  %v7001_v57 = vld [vmem:[%s10665_s1 + $0x7c4] ss:$16 sps:$4 sm:$0xff]   ;;  %v6999_v59 = vld [vmem:[%s10665_s1 + $0x7c0] ss:$16 sps:$4 sm:$0xff]  }
  0x36   :  { %v7004_v61 = vld [vmem:[%s10665_s1 + $0x5a4] ss:$16 sps:$4 sm:$0xff]   ;;  %v7002_v63 = vld [vmem:[%s10665_s1 + $0x5a0] ss:$16 sps:$4 sm:$0xff]  }
  0x37   :  { %4965 = vmatpush2.bf16.msra.mxu0 %v6928_v2  ;;  %v7007_v62 = vld [vmem:[%s10665_s1 + $0x7a4] ss:$16 sps:$4 sm:$0xff]   ;;  %v7005_v1 = vld [vmem:[%s10665_s1 + $0x7a0] ss:$16 sps:$4 sm:$0xff]  }
  0x38   :  { %5006 = vmatpush2.bf16.msra.mxu1 %v6929_v3  ;;  %4966 = vmatprep.subr.bf16.mxu0 %v6930_v4  ;;  %v7010_v2 = vld [vmem:[%s10665_s1 + $0x584] ss:$16 sps:$4 sm:$0xff]   ;;  %v7008_v4 = vld [vmem:[%s10665_s1 + $0x580] ss:$16 sps:$4 sm:$0xff]  }
  0x39   :  { %5007 = vmatprep.subr.bf16.mxu1 %v6932_v5  ;;  %v7013_v3 = vld [vmem:[%s10665_s1 + $0x784] ss:$16 sps:$4 sm:$0xff]   ;;  %v7011_v5 = vld [vmem:[%s10665_s1 + $0x780] ss:$16 sps:$4 sm:$0xff]  }
  0x3a   :  { %v7022_v11 = vld [vmem:[%s10665_s1 + $0x544] ss:$16 sps:$4 sm:$0xff]  }
  0x3b   :  { %4967 = vmatpush2.bf16.msra.mxu0 %v6934_v7  ;;  %v7016_v7 = vld [vmem:[%s10665_s1 + $0x564] ss:$16 sps:$4 sm:$0xff]  }
  0x3c   :  { %5008 = vmatpush2.bf16.msra.mxu1 %v6935_v8  ;;  %4968 = vmatprep.subr.bf16.mxu0 %v6936_v9  ;;  %v7019_v8 = vld [vmem:[%s10665_s1 + $0x764] ss:$16 sps:$4 sm:$0xff]   ;;  %v7014_v9 = vld [vmem:[%s10665_s1 + $0x560] ss:$16 sps:$4 sm:$0xff]  }
  0x3d   :  { %5009 = vmatprep.subr.bf16.mxu1 %v6938_v10  ;;  %v7017_v10 = vld [vmem:[%s10665_s1 + $0x760] ss:$16 sps:$4 sm:$0xff]  }
  0x3f   :  { %4969 = vmatpush2.bf16.msra.mxu0 %v6940_v12  ;;  %v7025_v12 = vld [vmem:[%s10665_s1 + $0x744] ss:$16 sps:$4 sm:$0xff]  }
  0x40   :  { %5010 = vmatpush2.bf16.msra.mxu1 %v6941_v14  ;;  %5020 = vmatprep.subr.bf16.mxu0 %v6944_v15  ;;  %v7020_v14 = vld [vmem:[%s10665_s1 + $0x540] ss:$16 sps:$4 sm:$0xff]  }
  0x41   :  { %5061 = vmatprep.subr.bf16.mxu1 %v6947_v16  ;;  %v7023_v15 = vld [vmem:[%s10665_s1 + $0x740] ss:$16 sps:$4 sm:$0xff]   ;;  %v7028_v16 = vld [vmem:[%s10665_s1 + $0x524] ss:$16 sps:$4 sm:$0xff]  }
  0x42   :  { %4971 = vmatmul.mubr.bf16.vlgmr.msra.gmra.mxu0 %v8261_v13 }
  0x43   :  { %5012 = vmatmul.mubr.bf16.vlgmr.msra.gmra.mxu1 %v8277_v18  ;;  %5021 = vmatpush1.bf16.msra.mxu0 %v6942_v19  ;;  %v7031_v19 = vld [vmem:[%s10665_s1 + $0x724] ss:$16 sps:$4 sm:$0xff]  }
  0x44   :  { %5062 = vmatpush1.bf16.msra.mxu1 %v6945_v20  ;;  %5022 = vmatprep.subr.bf16.mxu0 %v6950_v21  ;;  %v7026_v20 = vld [vmem:[%s10665_s1 + $0x520] ss:$16 sps:$4 sm:$0xff]  }
  0x45   :  { %5063 = vmatprep.subr.bf16.mxu1 %v6953_v22  ;;  %5052 = vmatprep.mubr.bf16.mxu0 %v8273_v17  ;;  %v7029_v21 = vld [vmem:[%s10665_s1 + $0x720] ss:$16 sps:$4 sm:$0xff]   ;;  %v7034_v22 = vld [vmem:[%s10665_s1 + $0x504] ss:$16 sps:$4 sm:$0xff]  }
  0x46   :  { %5093 = vmatprep.mubr.bf16.mxu1 %v8293_v23 }
  0x47   :  { %5023 = vmatpush1.bf16.msra.mxu0 %v6948_v24  ;;  %v7037_v24 = vld [vmem:[%s10665_s1 + $0x704] ss:$16 sps:$4 sm:$0xff]  }
  0x48   :  { %5064 = vmatpush1.bf16.msra.mxu1 %v6951_v25  ;;  %5024 = vmatprep.subr.bf16.mxu0 %v6956_v26  ;;  %v7032_v25 = vld [vmem:[%s10665_s1 + $0x500] ss:$16 sps:$4 sm:$0xff]   ;;  %v8472_v26 = vrot.slane %v8241_v6, %v8183_v49 }
  0x49   :  { %5065 = vmatprep.subr.bf16.mxu1 %v6959_v27  ;;  %v7035_v27 = vld [vmem:[%s10665_s1 + $0x700] ss:$16 sps:$4 sm:$0xff]  }
  0x4a   :  { %v8485_v6 = vcombine.high %v8472_v26, %v8472_v26 }
  0x4b   :  { %5025 = vmatpush1.bf16.msra.mxu0 %v6954_v28  ;;  %v7041_v28 = vld [vmem:[%s10665_s1 + $0x8e4] ss:$16 sps:$4 sm:$0xff]  }
  0x4c   :  { %5066 = vmatpush1.bf16.msra.mxu1 %v6957_v29  ;;  %5026 = vmatprep.subr.bf16.mxu0 %v6962_v30  ;;  %v7044_v29 = vld [vmem:[%s10665_s1 + $0xae4] ss:$16 sps:$4 sm:$0xff]   ;;  %v7039_v30 = vld [vmem:[%s10665_s1 + $0x8e0] ss:$16 sps:$4 sm:$0xff]  }
  0x4d   :  { %5067 = vmatprep.subr.bf16.mxu1 %v6965_v31  ;;  %v7042_v31 = vld [vmem:[%s10665_s1 + $0xae0] ss:$16 sps:$4 sm:$0xff]  }
  0x4f   :  { %5027 = vmatpush1.bf16.msra.mxu0 %v6960_v32  ;;  %v8496_v32 = vld [vmem:[%s10666_s0 + $0x8] sm:$0xff] }
  0x50   :  { %5068 = vmatpush1.bf16.msra.mxu1 %v6963_v33  ;;  %5028 = vmatprep.subr.bf16.mxu0 %v6968_v34  ;;  %v7047_v33 = vld [vmem:[%s10665_s1 + $0x8c4] ss:$16 sps:$4 sm:$0xff]  }
  0x51   :  { %5069 = vmatprep.subr.bf16.mxu1 %v6971_v35  ;;  %v7050_v34 = vld [vmem:[%s10665_s1 + $0xac4] ss:$16 sps:$4 sm:$0xff]   ;;  %v8506_v35 = vrot.slane %v8496_v32, %v8183_v49 }
  0x53   :  { %5029 = vmatpush1.bf16.msra.mxu0 %v6966_v36  ;;  %v893_v36 = vcombine.high %v8506_v35, %v8506_v35 }
  0x54   :  { %5070 = vmatpush1.bf16.msra.mxu1 %v6969_v37  ;;  %5030 = vmatprep.subr.bf16.mxu0 %v6974_v38  ;;  %v7045_v37 = vld [vmem:[%s10665_s1 + $0x8c0] ss:$16 sps:$4 sm:$0xff]  }
  0x55   :  { %5071 = vmatprep.subr.bf16.mxu1 %v6977_v39  ;;  %v7048_v38 = vld [vmem:[%s10665_s1 + $0xac0] ss:$16 sps:$4 sm:$0xff]   ;;  %v7053_v39 = vld [vmem:[%s10665_s1 + $0x8a4] ss:$16 sps:$4 sm:$0xff]  }
  0x57   :  { %5031 = vmatpush1.bf16.msra.mxu0 %v6972_v40  ;;  %v7056_v40 = vld [vmem:[%s10665_s1 + $0xaa4] ss:$16 sps:$4 sm:$0xff]  }
  0x58   :  { %5072 = vmatpush1.bf16.msra.mxu1 %v6975_v41  ;;  %5032 = vmatprep.subr.bf16.mxu0 %v6980_v43  ;;  %v8525_v41 = vrot.slane %v893_v36, %v8183_v49  ;;  %v7117_v36 = vld [vmem:[%s10665_s1 + $0x940] ss:$16 sps:$4 sm:$0xff]  }
  0x59   :  { %5073 = vmatprep.subr.bf16.mxu1 %v6983_v44  ;;  %v7051_v44 = vld [vmem:[%s10665_s1 + $0x8a0] ss:$16 sps:$4 sm:$0xff]  }
  0x5a   :  { %v8530_v43 = vcombine.high %v8525_v41, %v8525_v41 }
  0x5b   :  { %5033 = vmatpush1.bf16.msra.mxu0 %v6978_v45  ;;  %v7054_v45 = vld [vmem:[%s10665_s1 + $0xaa0] ss:$16 sps:$4 sm:$0xff]  }
  0x5c   :  { %5074 = vmatpush1.bf16.msra.mxu1 %v6981_v46  ;;  %5034 = vmatprep.subr.bf16.mxu0 %v6986_v47  ;;  %v7059_v46 = vld [vmem:[%s10665_s1 + $0x884] ss:$16 sps:$4 sm:$0xff]  }
  0x5d   :  { %5075 = vmatprep.subr.bf16.mxu1 %v6989_v48  ;;  %v7062_v47 = vld [vmem:[%s10665_s1 + $0xa84] ss:$16 sps:$4 sm:$0xff]   ;;  %v7057_v48 = vld [vmem:[%s10665_s1 + $0x880] ss:$16 sps:$4 sm:$0xff]  }
  0x5f   :  { %5035 = vmatpush1.bf16.msra.mxu0 %v6984_v50  ;;  %v7060_v50 = vld [vmem:[%s10665_s1 + $0xa80] ss:$16 sps:$4 sm:$0xff]  }
  0x60   :  { %5076 = vmatpush1.bf16.msra.mxu1 %v6987_v51  ;;  %5036 = vmatprep.subr.bf16.mxu0 %v6992_v52  ;;  %v7065_v51 = vld [vmem:[%s10665_s1 + $0x864] ss:$16 sps:$4 sm:$0xff]  }
  0x61   :  { %5077 = vmatprep.subr.bf16.mxu1 %v6995_v53  ;;  %v7068_v52 = vld [vmem:[%s10665_s1 + $0xa64] ss:$16 sps:$4 sm:$0xff]   ;;  %v7063_v53 = vld [vmem:[%s10665_s1 + $0x860] ss:$16 sps:$4 sm:$0xff]  }
  0x63   :  { %5037 = vmatpush2.bf16.msra.mxu0 %v6990_v54  ;;  %v7066_v54 = vld [vmem:[%s10665_s1 + $0xa60] ss:$16 sps:$4 sm:$0xff]  }
  0x64   :  { %5078 = vmatpush2.bf16.msra.mxu1 %v6993_v55  ;;  %5038 = vmatprep.subr.bf16.mxu0 %v6998_v56  ;;  %v7071_v55 = vld [vmem:[%s10665_s1 + $0x844] ss:$16 sps:$4 sm:$0xff]  }
  0x65   :  { %5079 = vmatprep.subr.bf16.mxu1 %v7001_v57  ;;  %v7074_v56 = vld [vmem:[%s10665_s1 + $0xa44] ss:$16 sps:$4 sm:$0xff]   ;;  %v7069_v57 = vld [vmem:[%s10665_s1 + $0x840] ss:$16 sps:$4 sm:$0xff]  }
  0x67   :  { %5039 = vmatpush2.bf16.msra.mxu0 %v6996_v58  ;;  %v7072_v58 = vld [vmem:[%s10665_s1 + $0xa40] ss:$16 sps:$4 sm:$0xff]  }
  0x68   :  { %5080 = vmatpush2.bf16.msra.mxu1 %v6999_v59  ;;  %5040 = vmatprep.subr.bf16.mxu0 %v7004_v61  ;;  %v7077_v59 = vld [vmem:[%s10665_s1 + $0x824] ss:$16 sps:$4 sm:$0xff]  }
  0x69   :  { %5081 = vmatprep.subr.bf16.mxu1 %v7007_v62  ;;  %v7080_v61 = vld [vmem:[%s10665_s1 + $0xa24] ss:$16 sps:$4 sm:$0xff]   ;;  %v7075_v62 = vld [vmem:[%s10665_s1 + $0x820] ss:$16 sps:$4 sm:$0xff]  }
  0x6b   :  { %5041 = vmatpush2.bf16.msra.mxu0 %v7002_v63  ;;  %v7078_v63 = vld [vmem:[%s10665_s1 + $0xa20] ss:$16 sps:$4 sm:$0xff]  }
  0x6c   :  { %5082 = vmatpush2.bf16.msra.mxu1 %v7005_v1  ;;  %5042 = vmatprep.subr.bf16.mxu0 %v7010_v2  ;;  %v7083_v1 = vld [vmem:[%s10665_s1 + $0x804] ss:$16 sps:$4 sm:$0xff]  }
  0x6d   :  { %5083 = vmatprep.subr.bf16.mxu1 %v7013_v3  ;;  %v7086_v2 = vld [vmem:[%s10665_s1 + $0xa04] ss:$16 sps:$4 sm:$0xff]   ;;  %v7081_v3 = vld [vmem:[%s10665_s1 + $0x800] ss:$16 sps:$4 sm:$0xff]  }
  0x6f   :  { %5043 = vmatpush2.bf16.msra.mxu0 %v7008_v4  ;;  %v7084_v4 = vld [vmem:[%s10665_s1 + $0xa00] ss:$16 sps:$4 sm:$0xff]  }
  0x70   :  { %5084 = vmatpush2.bf16.msra.mxu1 %v7011_v5  ;;  %5044 = vmatprep.subr.bf16.mxu0 %v7016_v7  ;;  %v7089_v5 = vld [vmem:[%s10665_s1 + $0x9e4] ss:$16 sps:$4 sm:$0xff]  }
  0x71   :  { %5085 = vmatprep.subr.bf16.mxu1 %v7019_v8  ;;  %v7092_v7 = vld [vmem:[%s10665_s1 + $0xbe4] ss:$16 sps:$4 sm:$0xff]   ;;  %v7087_v8 = vld [vmem:[%s10665_s1 + $0x9e0] ss:$16 sps:$4 sm:$0xff]  }
  0x73   :  { %5045 = vmatpush2.bf16.msra.mxu0 %v7014_v9  ;;  %v7090_v9 = vld [vmem:[%s10665_s1 + $0xbe0] ss:$16 sps:$4 sm:$0xff]  }
  0x74   :  { %5086 = vmatpush2.bf16.msra.mxu1 %v7017_v10  ;;  %5046 = vmatprep.subr.bf16.mxu0 %v7022_v11  ;;  %v7095_v10 = vld [vmem:[%s10665_s1 + $0x9c4] ss:$16 sps:$4 sm:$0xff]  }
  0x75   :  { %5087 = vmatprep.subr.bf16.mxu1 %v7025_v12  ;;  %v7098_v11 = vld [vmem:[%s10665_s1 + $0xbc4] ss:$16 sps:$4 sm:$0xff]   ;;  %v7093_v12 = vld [vmem:[%s10665_s1 + $0x9c0] ss:$16 sps:$4 sm:$0xff]  }
  0x77   :  { %5047 = vmatpush2.bf16.msra.mxu0 %v7020_v14  ;;  %v7096_v14 = vld [vmem:[%s10665_s1 + $0xbc0] ss:$16 sps:$4 sm:$0xff]  }
  0x78   :  { %5088 = vmatpush2.bf16.msra.mxu1 %v7023_v15  ;;  %5048 = vmatprep.subr.bf16.mxu0 %v7028_v16  ;;  %v7101_v15 = vld [vmem:[%s10665_s1 + $0x9a4] ss:$16 sps:$4 sm:$0xff]  }
  0x79   :  { %5089 = vmatprep.subr.bf16.mxu1 %v7031_v19  ;;  %v7104_v16 = vld [vmem:[%s10665_s1 + $0xba4] ss:$16 sps:$4 sm:$0xff]   ;;  %v7099_v19 = vld [vmem:[%s10665_s1 + $0x9a0] ss:$16 sps:$4 sm:$0xff]  }
  0x7b   :  { %5049 = vmatpush2.bf16.msra.mxu0 %v7026_v20  ;;  %v7102_v20 = vld [vmem:[%s10665_s1 + $0xba0] ss:$16 sps:$4 sm:$0xff]  }
  0x7c   :  { %5090 = vmatpush2.bf16.msra.mxu1 %v7029_v21  ;;  %5050 = vmatprep.subr.bf16.mxu0 %v7034_v22  ;;  %v7107_v21 = vld [vmem:[%s10665_s1 + $0x984] ss:$16 sps:$4 sm:$0xff]  }
  0x7d   :  { %5091 = vmatprep.subr.bf16.mxu1 %v7037_v24  ;;  %v7110_v22 = vld [vmem:[%s10665_s1 + $0xb84] ss:$16 sps:$4 sm:$0xff]   ;;  %v7105_v24 = vld [vmem:[%s10665_s1 + $0x980] ss:$16 sps:$4 sm:$0xff]  }
  0x7f   :  { %5051 = vmatpush2.bf16.msra.mxu0 %v7032_v25  ;;  %v7108_v25 = vld [vmem:[%s10665_s1 + $0xb80] ss:$16 sps:$4 sm:$0xff]  }
  0x80   :  { %5092 = vmatpush2.bf16.msra.mxu1 %v7035_v27  ;;  %5102 = vmatprep.subr.bf16.mxu0 %v7041_v28  ;;  %v7113_v27 = vld [vmem:[%s10665_s1 + $0x964] ss:$16 sps:$4 sm:$0xff]  }
  0x81   :  { %5143 = vmatprep.subr.bf16.mxu1 %v7044_v29  ;;  %v7116_v28 = vld [vmem:[%s10665_s1 + $0xb64] ss:$16 sps:$4 sm:$0xff]   ;;  %v7111_v29 = vld [vmem:[%s10665_s1 + $0x960] ss:$16 sps:$4 sm:$0xff]  }
  0x82   :  { %5053 = vmatmul.mubr.bf16.vlgmr.msra.gmra.mxu0 %v8472_v26 }
  0x83   :  { %5094 = vmatmul.mubr.bf16.vlgmr.msra.gmra.mxu1 %v8485_v6  ;;  %5103 = vmatpush1.bf16.msra.mxu0 %v7039_v30  ;;  %v7114_v30 = vld [vmem:[%s10665_s1 + $0xb60] ss:$16 sps:$4 sm:$0xff]  }
  0x84   :  { %5144 = vmatpush1.bf16.msra.mxu1 %v7042_v31  ;;  %5104 = vmatprep.subr.bf16.mxu0 %v7047_v33  ;;  %v7119_v31 = vld [vmem:[%s10665_s1 + $0x944] ss:$16 sps:$4 sm:$0xff]  }
  0x85   :  { %5145 = vmatprep.subr.bf16.mxu1 %v7050_v34  ;;  %5134 = vmatprep.mubr.bf16.mxu0 %v8525_v41  ;;  %v7122_v33 = vld [vmem:[%s10665_s1 + $0xb44] ss:$16 sps:$4 sm:$0xff]   ;;  %v878_v34 = vcombine.high %v8496_v32, %v8496_v32 }
  0x86   :  { %5175 = vmatprep.mubr.bf16.mxu1 %v8530_v43  ;;  %v7128_v32 = vld [vmem:[%s10665_s1 + $0xb24] ss:$16 sps:$4 sm:$0xff]  }
  0x87   :  { %5105 = vmatpush1.bf16.msra.mxu0 %v7045_v37  ;;  %v7120_v37 = vld [vmem:[%s10665_s1 + $0xb40] ss:$16 sps:$4 sm:$0xff]  }
  0x88   :  { %5146 = vmatpush1.bf16.msra.mxu1 %v7048_v38  ;;  %5106 = vmatprep.subr.bf16.mxu0 %v7053_v39  ;;  %v7125_v38 = vld [vmem:[%s10665_s1 + $0x924] ss:$16 sps:$4 sm:$0xff]   ;;  %v8680_v39 = vrot.slane %v878_v34, %v8183_v49  ;;  %v7186_v34 = vld [vmem:[%s10665_s1 + $0xfe0] ss:$16 sps:$4 sm:$0xff]  }
  0x89   :  { %5147 = vmatprep.subr.bf16.mxu1 %v7056_v40  ;;  %v7123_v40 = vld [vmem:[%s10665_s1 + $0x920] ss:$16 sps:$4 sm:$0xff]  }
  0x8b   :  { %5107 = vmatpush1.bf16.msra.mxu0 %v7051_v44  ;;  %v7126_v44 = vld [vmem:[%s10665_s1 + $0xb20] ss:$16 sps:$4 sm:$0xff]  }
  0x8c   :  { %5148 = vmatpush1.bf16.msra.mxu1 %v7054_v45  ;;  %5108 = vmatprep.subr.bf16.mxu0 %v7059_v46  ;;  %v7131_v45 = vld [vmem:[%s10665_s1 + $0x904] ss:$16 sps:$4 sm:$0xff]  }
  0x8d   :  { %5149 = vmatprep.subr.bf16.mxu1 %v7062_v47  ;;  %v7134_v46 = vld [vmem:[%s10665_s1 + $0xb04] ss:$16 sps:$4 sm:$0xff]   ;;  %v894_v47 = vcombine.high %v8680_v39, %v8680_v39 }
  0x8f   :  { %5109 = vmatpush1.bf16.msra.mxu0 %v7057_v48  ;;  %v7129_v48 = vld [vmem:[%s10665_s1 + $0x900] ss:$16 sps:$4 sm:$0xff]  }
  0x90   :  { %5150 = vmatpush1.bf16.msra.mxu1 %v7060_v50  ;;  %5110 = vmatprep.subr.bf16.mxu0 %v7065_v51  ;;  %v8701_v50 = vrot.slane %v8506_v35, %v8183_v49  ;;  %v7132_v51 = vld [vmem:[%s10665_s1 + $0xb00] ss:$16 sps:$4 sm:$0xff]  }
  0x91   :  { %5151 = vmatprep.subr.bf16.mxu1 %v7068_v52  ;;  %v7137_v52 = vld [vmem:[%s10665_s1 + $0xce4] ss:$16 sps:$4 sm:$0xff]  }
  0x92   :  { %v8717_v35 = vcombine.high %v8701_v50, %v8701_v50 }
  0x93   :  { %5111 = vmatpush1.bf16.msra.mxu0 %v7063_v53  ;;  %v7140_v53 = vld [vmem:[%s10665_s1 + $0xee4] ss:$16 sps:$4 sm:$0xff]  }
  0x94   :  { %5152 = vmatpush1.bf16.msra.mxu1 %v7066_v54  ;;  %5112 = vmatprep.subr.bf16.mxu0 %v7071_v55  ;;  %v8713_v54 = vrot.slane %v894_v47, %v8183_v49  ;;  %v7135_v55 = vld [vmem:[%s10665_s1 + $0xce0] ss:$16 sps:$4 sm:$0xff]   ;;  %v7203_v47 = vld [vmem:[%s10665_s1 + $0xd84] ss:$16 sps:$4 sm:$0xff]  }
  0x95   :  { %5153 = vmatprep.subr.bf16.mxu1 %v7074_v56  ;;  %v7138_v56 = vld [vmem:[%s10665_s1 + $0xee0] ss:$16 sps:$4 sm:$0xff]  }
  0x97   :  { %5113 = vmatpush1.bf16.msra.mxu0 %v7069_v57  ;;  %v7143_v57 = vld [vmem:[%s10665_s1 + $0xcc4] ss:$16 sps:$4 sm:$0xff]  }
  0x98   :  { %5154 = vmatpush1.bf16.msra.mxu1 %v7072_v58  ;;  %5114 = vmatprep.subr.bf16.mxu0 %v7077_v59  ;;  %v7146_v58 = vld [vmem:[%s10665_s1 + $0xec4] ss:$16 sps:$4 sm:$0xff]   ;;  %v8733_v59 = vcombine.high %v8713_v54, %v8713_v54 }
  0x99   :  { %5155 = vmatprep.subr.bf16.mxu1 %v7080_v61  ;;  %v7141_v61 = vld [vmem:[%s10665_s1 + $0xcc0] ss:$16 sps:$4 sm:$0xff]  }
  0x9b   :  { %5115 = vmatpush1.bf16.msra.mxu0 %v7075_v62  ;;  %v7144_v62 = vld [vmem:[%s10665_s1 + $0xec0] ss:$16 sps:$4 sm:$0xff]  }
  0x9c   :  { %5156 = vmatpush1.bf16.msra.mxu1 %v7078_v63  ;;  %5116 = vmatprep.subr.bf16.mxu0 %v7083_v1  ;;  %v7149_v63 = vld [vmem:[%s10665_s1 + $0xca4] ss:$16 sps:$4 sm:$0xff]  }
  0x9d   :  { %5157 = vmatprep.subr.bf16.mxu1 %v7086_v2  ;;  %v7152_v1 = vld [vmem:[%s10665_s1 + $0xea4] ss:$16 sps:$4 sm:$0xff]   ;;  %v7147_v2 = vld [vmem:[%s10665_s1 + $0xca0] ss:$16 sps:$4 sm:$0xff]  }
  0x9f   :  { %5117 = vmatpush1.bf16.msra.mxu0 %v7081_v3  ;;  %v7150_v3 = vld [vmem:[%s10665_s1 + $0xea0] ss:$16 sps:$4 sm:$0xff]  }
  0xa0   :  { %5158 = vmatpush1.bf16.msra.mxu1 %v7084_v4  ;;  %5118 = vmatprep.subr.bf16.mxu0 %v7089_v5  ;;  %v7155_v4 = vld [vmem:[%s10665_s1 + $0xc84] ss:$16 sps:$4 sm:$0xff]  }
  0xa1   :  { %5159 = vmatprep.subr.bf16.mxu1 %v7092_v7  ;;  %v7158_v5 = vld [vmem:[%s10665_s1 + $0xe84] ss:$16 sps:$4 sm:$0xff]   ;;  %v7153_v7 = vld [vmem:[%s10665_s1 + $0xc80] ss:$16 sps:$4 sm:$0xff]  }
  0xa3   :  { %5119 = vmatpush2.bf16.msra.mxu0 %v7087_v8  ;;  %v7156_v8 = vld [vmem:[%s10665_s1 + $0xe80] ss:$16 sps:$4 sm:$0xff]  }
  0xa4   :  { %5160 = vmatpush2.bf16.msra.mxu1 %v7090_v9  ;;  %5120 = vmatprep.subr.bf16.mxu0 %v7095_v10  ;;  %v7161_v9 = vld [vmem:[%s10665_s1 + $0xc64] ss:$16 sps:$4 sm:$0xff]  }
  0xa5   :  { %5161 = vmatprep.subr.bf16.mxu1 %v7098_v11  ;;  %v7164_v10 = vld [vmem:[%s10665_s1 + $0xe64] ss:$16 sps:$4 sm:$0xff]   ;;  %v7159_v11 = vld [vmem:[%s10665_s1 + $0xc60] ss:$16 sps:$4 sm:$0xff]  }
  0xa7   :  { %5121 = vmatpush2.bf16.msra.mxu0 %v7093_v12  ;;  %v7162_v12 = vld [vmem:[%s10665_s1 + $0xe60] ss:$16 sps:$4 sm:$0xff]  }
  0xa8   :  { %5162 = vmatpush2.bf16.msra.mxu1 %v7096_v14  ;;  %5122 = vmatprep.subr.bf16.mxu0 %v7101_v15  ;;  %v7167_v14 = vld [vmem:[%s10665_s1 + $0xc44] ss:$16 sps:$4 sm:$0xff]  }
  0xa9   :  { %5163 = vmatprep.subr.bf16.mxu1 %v7104_v16  ;;  %v7170_v15 = vld [vmem:[%s10665_s1 + $0xe44] ss:$16 sps:$4 sm:$0xff]   ;;  %v7165_v16 = vld [vmem:[%s10665_s1 + $0xc40] ss:$16 sps:$4 sm:$0xff]  }
  0xab   :  { %5123 = vmatpush2.bf16.msra.mxu0 %v7099_v19  ;;  %v7168_v19 = vld [vmem:[%s10665_s1 + $0xe40] ss:$16 sps:$4 sm:$0xff]  }
  0xac   :  { %5164 = vmatpush2.bf16.msra.mxu1 %v7102_v20  ;;  %5124 = vmatprep.subr.bf16.mxu0 %v7107_v21  ;;  %v7173_v20 = vld [vmem:[%s10665_s1 + $0xc24] ss:$16 sps:$4 sm:$0xff]  }
  0xad   :  { %5165 = vmatprep.subr.bf16.mxu1 %v7110_v22  ;;  %v7176_v21 = vld [vmem:[%s10665_s1 + $0xe24] ss:$16 sps:$4 sm:$0xff]   ;;  %v7171_v22 = vld [vmem:[%s10665_s1 + $0xc20] ss:$16 sps:$4 sm:$0xff]  }
  0xaf   :  { %5125 = vmatpush2.bf16.msra.mxu0 %v7105_v24  ;;  %v7174_v24 = vld [vmem:[%s10665_s1 + $0xe20] ss:$16 sps:$4 sm:$0xff]  }
  0xb0   :  { %5166 = vmatpush2.bf16.msra.mxu1 %v7108_v25  ;;  %5126 = vmatprep.subr.bf16.mxu0 %v7113_v27  ;;  %v7179_v25 = vld [vmem:[%s10665_s1 + $0xc04] ss:$16 sps:$4 sm:$0xff]  }
  0xb1   :  { %5167 = vmatprep.subr.bf16.mxu1 %v7116_v28  ;;  %v7182_v27 = vld [vmem:[%s10665_s1 + $0xe04] ss:$16 sps:$4 sm:$0xff]   ;;  %v7177_v28 = vld [vmem:[%s10665_s1 + $0xc00] ss:$16 sps:$4 sm:$0xff]  }
  0xb3   :  { %5127 = vmatpush2.bf16.msra.mxu0 %v7111_v29  ;;  %v7180_v29 = vld [vmem:[%s10665_s1 + $0xe00] ss:$16 sps:$4 sm:$0xff]  }
  0xb4   :  { %5168 = vmatpush2.bf16.msra.mxu1 %v7114_v30  ;;  %5128 = vmatprep.subr.bf16.mxu0 %v7119_v31  ;;  %v7185_v30 = vld [vmem:[%s10665_s1 + $0xde4] ss:$16 sps:$4 sm:$0xff]  }
  0xb5   :  { %5169 = vmatprep.subr.bf16.mxu1 %v7122_v33  ;;  %v7188_v31 = vld [vmem:[%s10665_s1 + $0xfe4] ss:$16 sps:$4 sm:$0xff]   ;;  %v7183_v33 = vld [vmem:[%s10665_s1 + $0xde0] ss:$16 sps:$4 sm:$0xff]  }
  0xb7   :  { %5129 = vmatpush2.bf16.msra.mxu0 %v7117_v36  ;;  %v7191_v36 = vld [vmem:[%s10665_s1 + $0xdc4] ss:$16 sps:$4 sm:$0xff]  }
  0xb8   :  { %5170 = vmatpush2.bf16.msra.mxu1 %v7120_v37  ;;  %5130 = vmatprep.subr.bf16.mxu0 %v7125_v38  ;;  %v7194_v37 = vld [vmem:[%s10665_s1 + $0xfc4] ss:$16 sps:$4 sm:$0xff]   ;;  %v7189_v38 = vld [vmem:[%s10665_s1 + $0xdc0] ss:$16 sps:$4 sm:$0xff]  }
  0xb9   :  { %5171 = vmatprep.subr.bf16.mxu1 %v7128_v32  ;;  %v7192_v32 = vld [vmem:[%s10665_s1 + $0xfc0] ss:$16 sps:$4 sm:$0xff]  }
  0xbb   :  { %5131 = vmatpush2.bf16.msra.mxu0 %v7123_v40  ;;  %v7197_v40 = vld [vmem:[%s10665_s1 + $0xda4] ss:$16 sps:$4 sm:$0xff]  }
  0xbc   :  { %5172 = vmatpush2.bf16.msra.mxu1 %v7126_v44  ;;  %5132 = vmatprep.subr.bf16.mxu0 %v7131_v45  ;;  %v7200_v44 = vld [vmem:[%s10665_s1 + $0xfa4] ss:$16 sps:$4 sm:$0xff]   ;;  %v7195_v45 = vld [vmem:[%s10665_s1 + $0xda0] ss:$16 sps:$4 sm:$0xff]  }
  0xbd   :  { %5173 = vmatprep.subr.bf16.mxu1 %v7134_v46  ;;  %v7198_v46 = vld [vmem:[%s10665_s1 + $0xfa0] ss:$16 sps:$4 sm:$0xff]  }
  0xbf   :  { %5133 = vmatpush2.bf16.msra.mxu0 %v7129_v48  ;;  %v7206_v48 = vld [vmem:[%s10665_s1 + $0xf84] ss:$16 sps:$4 sm:$0xff]  }
  0xc0   :  { %5174 = vmatpush2.bf16.msra.mxu1 %v7132_v51  ;;  %5184 = vmatprep.subr.bf16.mxu0 %v7137_v52  ;;  %v7201_v51 = vld [vmem:[%s10665_s1 + $0xd80] ss:$16 sps:$4 sm:$0xff]  }
  0xc1   :  { %5225 = vmatprep.subr.bf16.mxu1 %v7140_v53  ;;  %v7204_v52 = vld [vmem:[%s10665_s1 + $0xf80] ss:$16 sps:$4 sm:$0xff]   ;;  %v7209_v53 = vld [vmem:[%s10665_s1 + $0xd64] ss:$16 sps:$4 sm:$0xff]  }
  0xc2   :  { %5135 = vmatmul.mubr.bf16.vlgmr.msra.gmra.mxu0 %v8701_v50 }
  0xc3   :  { %5176 = vmatmul.mubr.bf16.vlgmr.msra.gmra.mxu1 %v8717_v35  ;;  %5185 = vmatpush1.bf16.msra.mxu0 %v7135_v55  ;;  %v7212_v55 = vld [vmem:[%s10665_s1 + $0xf64] ss:$16 sps:$4 sm:$0xff]  }
  0xc4   :  { %5226 = vmatpush1.bf16.msra.mxu1 %v7138_v56  ;;  %5186 = vmatprep.subr.bf16.mxu0 %v7143_v57  ;;  %v7207_v56 = vld [vmem:[%s10665_s1 + $0xd60] ss:$16 sps:$4 sm:$0xff]  }
  0xc5   :  { %5227 = vmatprep.subr.bf16.mxu1 %v7146_v58  ;;  %5216 = vmatprep.mubr.bf16.mxu0 %v8713_v54  ;;  %v7210_v57 = vld [vmem:[%s10665_s1 + $0xf60] ss:$16 sps:$4 sm:$0xff]   ;;  %v7215_v58 = vld [vmem:[%s10665_s1 + $0xd44] ss:$16 sps:$4 sm:$0xff]  }
  0xc6   :  { %5257 = vmatprep.mubr.bf16.mxu1 %v8733_v59 }
  0xc7   :  { %5187 = vmatpush1.bf16.msra.mxu0 %v7141_v61  ;;  %v7218_v61 = vld [vmem:[%s10665_s1 + $0xf44] ss:$16 sps:$4 sm:$0xff]  }
  0xc8   :  { %5228 = vmatpush1.bf16.msra.mxu1 %v7144_v62  ;;  %5188 = vmatprep.subr.bf16.mxu0 %v7149_v63  ;;  %v7213_v62 = vld [vmem:[%s10665_s1 + $0xd40] ss:$16 sps:$4 sm:$0xff]  }
  0xc9   :  { %5229 = vmatprep.subr.bf16.mxu1 %v7152_v1  ;;  %v7216_v63 = vld [vmem:[%s10665_s1 + $0xf40] ss:$16 sps:$4 sm:$0xff]  }
  0xca   :  { %v8892_v1 = vld [vmem:[%s10666_s0 + $0x10] sm:$0xff] }
  0xcb   :  { %5189 = vmatpush1.bf16.msra.mxu0 %v7147_v2  ;;  %v7221_v2 = vld [vmem:[%s10665_s1 + $0xd24] ss:$16 sps:$4 sm:$0xff]  }
  0xcc   :  { %5230 = vmatpush1.bf16.msra.mxu1 %v7150_v3  ;;  %5190 = vmatprep.subr.bf16.mxu0 %v7155_v4  ;;  %v7224_v3 = vld [vmem:[%s10665_s1 + $0xf24] ss:$16 sps:$4 sm:$0xff]   ;;  %v8902_v4 = vrot.slane %v8892_v1, %v8183_v49 }
  0xcd   :  { %5231 = vmatprep.subr.bf16.mxu1 %v7158_v5  ;;  %v7219_v5 = vld [vmem:[%s10665_s1 + $0xd20] ss:$16 sps:$4 sm:$0xff]  }
  0xcf   :  { %5191 = vmatpush1.bf16.msra.mxu0 %v7153_v7  ;;  %v7222_v7 = vld [vmem:[%s10665_s1 + $0xf20] ss:$16 sps:$4 sm:$0xff]  }
  0xd0   :  { %5232 = vmatpush1.bf16.msra.mxu1 %v7156_v8  ;;  %5192 = vmatprep.subr.bf16.mxu0 %v7161_v9  ;;  %v7227_v8 = vld [vmem:[%s10665_s1 + $0xd04] ss:$16 sps:$4 sm:$0xff]  }
  0xd1   :  { %5233 = vmatprep.subr.bf16.mxu1 %v7164_v10  ;;  %v7230_v9 = vld [vmem:[%s10665_s1 + $0xf04] ss:$16 sps:$4 sm:$0xff]   ;;  %v7225_v10 = vld [vmem:[%s10665_s1 + $0xd00] ss:$16 sps:$4 sm:$0xff]  }
  0xd3   :  { %5193 = vmatpush1.bf16.msra.mxu0 %v7159_v11  ;;  %v942_v11 = vcombine.high %v8902_v4, %v8902_v4 }
  0xd4   :  { %5234 = vmatpush1.bf16.msra.mxu1 %v7162_v12  ;;  %5194 = vmatprep.subr.bf16.mxu0 %v7167_v14  ;;  %v7228_v12 = vld [vmem:[%s10665_s1 + $0xf00] ss:$16 sps:$4 sm:$0xff]  }
  0xd5   :  { %5235 = vmatprep.subr.bf16.mxu1 %v7170_v15  ;;  %v803_v14 = vld [vmem:[%s10667_s2] sm:$0xf]  ;;  %v8929_v15 = vrot.slane %v8680_v39, %v8183_v49 }
  0xd7   :  { %5195 = vmatpush1.bf16.msra.mxu0 %v7165_v16  ;;  %v807_v16 = vsub.s32 0, %v8165_v42  ;;  %v8944_v39 = vcombine.high %v8929_v15, %v8929_v15 }
  0xd8   :  { %5236 = vmatpush1.bf16.msra.mxu1 %v7168_v19  ;;  %5196 = vmatprep.subr.bf16.mxu0 %v7173_v20  ;;  %v7234_v19 = vld [vmem:[%s10665_s1 + $0x10e4] ss:$16 sps:$4 sm:$0xff]  }
  0xd9   :  { %5237 = vmatprep.subr.bf16.mxu1 %v7176_v21  ;;  %v7237_v20 = vld [vmem:[%s10665_s1 + $0x12e4] ss:$16 sps:$4 sm:$0xff]   ;;  %v811_v21 = vsub.s32 1, %v8165_v42 }
  0xdb   :  { %5197 = vmatpush1.bf16.msra.mxu0 %v7171_v22  ;;  %v8940_v22 = vrot.slane %v942_v11, %v8183_v49  ;;  %v7265_v11 = vld [vmem:[%s10665_s1 + $0x1240] ss:$16 sps:$4 sm:$0xff]  }
  0xdc   :  { %5238 = vmatpush1.bf16.msra.mxu1 %v7174_v24  ;;  %5198 = vmatprep.subr.bf16.mxu0 %v7179_v25  ;;  %v7232_v24 = vld [vmem:[%s10665_s1 + $0x10e0] ss:$16 sps:$4 sm:$0xff]  }
  0xdd   :  { %5239 = vmatprep.subr.bf16.mxu1 %v7182_v27  ;;  %v7235_v25 = vld [vmem:[%s10665_s1 + $0x12e0] ss:$16 sps:$4 sm:$0xff]   ;;  %v808_v27 = vrot.slane %v803_v14, %v807_v16 }
  0xde   :  { %v7268_v16 = vld [vmem:[%s10665_s1 + $0x1020] ss:$16 sps:$4 sm:$0xff]  }
  0xdf   :  { %5199 = vmatpush1.bf16.msra.mxu0 %v7177_v28  ;;  %v7240_v28 = vld [vmem:[%s10665_s1 + $0x10c4] ss:$16 sps:$4 sm:$0xff]  }
  0xe0   :  { %5240 = vmatpush1.bf16.msra.mxu1 %v7180_v29  ;;  %5200 = vmatprep.subr.bf16.mxu0 %v7185_v30  ;;  %v7243_v29 = vld [vmem:[%s10665_s1 + $0x12c4] ss:$16 sps:$4 sm:$0xff]   ;;  %v812_v30 = vrot.slane %v803_v14, %v811_v21 }
  0xe1   :  { %5241 = vmatprep.subr.bf16.mxu1 %v7188_v31  ;;  %v8960_v31 = vcombine.high %v8940_v22, %v8940_v22  ;;  %v7273_v14 = vld [vmem:[%s10665_s1 + $0x1224] ss:$16 sps:$4 sm:$0xff]  }
  0xe2   :  { %v7279_v21 = vld [vmem:[%s10665_s1 + $0x1204] ss:$16 sps:$4 sm:$0xff]  }
  0xe3   :  { %5201 = vmatpush2.bf16.msra.mxu0 %v7183_v33 }
  0xe4   :  { %5242 = vmatpush2.bf16.msra.mxu1 %v7186_v34  ;;  %5202 = vmatprep.subr.bf16.mxu0 %v7191_v36  ;;  %v7238_v36 = vld [vmem:[%s10665_s1 + $0x10c0] ss:$16 sps:$4 sm:$0xff]  }
  0xe5   :  { %5243 = vmatprep.subr.bf16.mxu1 %v7194_v37  ;;  %v7241_v37 = vld [vmem:[%s10665_s1 + $0x12c0] ss:$16 sps:$4 sm:$0xff]  }
  0xe7   :  { %5203 = vmatpush2.bf16.msra.mxu0 %v7189_v38 }
  0xe8   :  { %5244 = vmatpush2.bf16.msra.mxu1 %v7192_v32  ;;  %5204 = vmatprep.subr.bf16.mxu0 %v7197_v40 }
  0xe9   :  { %5245 = vmatprep.subr.bf16.mxu1 %v7200_v44  ;;  %v7246_v44 = vld [vmem:[%s10665_s1 + $0x10a4] ss:$16 sps:$4 sm:$0xff]  }
  0xeb   :  { %5205 = vmatpush2.bf16.msra.mxu0 %v7195_v45  ;;  %v7249_v45 = vld [vmem:[%s10665_s1 + $0x12a4] ss:$16 sps:$4 sm:$0xff]  }
  0xec   :  { %5246 = vmatpush2.bf16.msra.mxu1 %v7198_v46  ;;  %5206 = vmatprep.subr.bf16.mxu0 %v7203_v47 }
  0xed   :  { %5247 = vmatprep.subr.bf16.mxu1 %v7206_v48  ;;  %v7244_v48 = vld [vmem:[%s10665_s1 + $0x10a0] ss:$16 sps:$4 sm:$0xff]  }
  0xef   :  { %5207 = vmatpush2.bf16.msra.mxu0 %v7201_v51  ;;  %v7247_v51 = vld [vmem:[%s10665_s1 + $0x12a0] ss:$16 sps:$4 sm:$0xff]  }
  0xf0   :  { %5248 = vmatpush2.bf16.msra.mxu1 %v7204_v52  ;;  %5208 = vmatprep.subr.bf16.mxu0 %v7209_v53 }
  0xf1   :  { %5249 = vmatprep.subr.bf16.mxu1 %v7212_v55 }
  0xf3   :  { %5209 = vmatpush2.bf16.msra.mxu0 %v7207_v56 }
  0xf4   :  { %5250 = vmatpush2.bf16.msra.mxu1 %v7210_v57  ;;  %5210 = vmatprep.subr.bf16.mxu0 %v7215_v58  ;;  %v7252_v58 = vld [vmem:[%s10665_s1 + $0x1084] ss:$16 sps:$4 sm:$0xff]  }
  0xf5   :  { %5251 = vmatprep.subr.bf16.mxu1 %v7218_v61  ;;  %v7255_v61 = vld [vmem:[%s10665_s1 + $0x1284] ss:$16 sps:$4 sm:$0xff]  }
  0xf7   :  { %5211 = vmatpush2.bf16.msra.mxu0 %v7213_v62  ;;  %v7250_v62 = vld [vmem:[%s10665_s1 + $0x1080] ss:$16 sps:$4 sm:$0xff]  }
  0xf8   :  { %5252 = vmatpush2.bf16.msra.mxu1 %v7216_v63  ;;  %5212 = vmatprep.subr.bf16.mxu0 %v7221_v2  ;;  %v7253_v63 = vld [vmem:[%s10665_s1 + $0x1280] ss:$16 sps:$4 sm:$0xff]   ;;  %v7258_v2 = vld [vmem:[%s10665_s1 + $0x1064] ss:$16 sps:$4 sm:$0xff]  }
  0xf9   :  { %5253 = vmatprep.subr.bf16.mxu1 %v7224_v3  ;;  %v7261_v3 = vld [vmem:[%s10665_s1 + $0x1264] ss:$16 sps:$4 sm:$0xff]  }
  0xfb   :  { %5213 = vmatpush2.bf16.msra.mxu0 %v7219_v5  ;;  %v7256_v5 = vld [vmem:[%s10665_s1 + $0x1060] ss:$16 sps:$4 sm:$0xff]  }
  0xfc   :  { %5254 = vmatpush2.bf16.msra.mxu1 %v7222_v7  ;;  %5214 = vmatprep.subr.bf16.mxu0 %v7227_v8  ;;  %v7259_v7 = vld [vmem:[%s10665_s1 + $0x1260] ss:$16 sps:$4 sm:$0xff]   ;;  %v7264_v8 = vld [vmem:[%s10665_s1 + $0x1044] ss:$16 sps:$4 sm:$0xff]  }
  0xfd   :  { %5255 = vmatprep.subr.bf16.mxu1 %v7230_v9  ;;  %v7267_v9 = vld [vmem:[%s10665_s1 + $0x1244] ss:$16 sps:$4 sm:$0xff]  }
  0xff   :  { %5215 = vmatpush2.bf16.msra.mxu0 %v7225_v10  ;;  %v7262_v10 = vld [vmem:[%s10665_s1 + $0x1040] ss:$16 sps:$4 sm:$0xff]  }
 0x100   :  { %5256 = vmatpush2.bf16.msra.mxu1 %v7228_v12  ;;  %5266 = vmatprep.subr.bf16.mxu0 %v7234_v19  ;;  %v7270_v12 = vld [vmem:[%s10665_s1 + $0x1024] ss:$16 sps:$4 sm:$0xff]   ;;  %v7271_v19 = vld [vmem:[%s10665_s1 + $0x1220] ss:$16 sps:$4 sm:$0xff]  }
 0x101   :  { %5307 = vmatprep.subr.bf16.mxu1 %v7237_v20  ;;  %v7276_v20 = vld [vmem:[%s10665_s1 + $0x1004] ss:$16 sps:$4 sm:$0xff]  }
 0x102   :  { %v4972_v33 = vpop.f32.mrf.mxu0  ;;  %5217 = vmatmul.mubr.bf16.vlgmr.msra.gmra.mxu0 %v8929_v15 }
 0x103   :  { %v5013_v34 = vpop.f32.mrf.mxu1  ;;  %5258 = vmatmul.mubr.bf16.vlgmr.msra.gmra.mxu1 %v8944_v39  ;;  %v4973_v38 = vadd.f32 %v4972_v33, %v808_v27  ;;  %5267 = vmatpush1.bf16.msra.mxu0 %v7232_v24  ;;  %v7274_v24 = vld [vmem:[%s10665_s1 + $0x1000] ss:$16 sps:$4 sm:$0xff]   ;;  %v7282_v27 = vld [vmem:[%s10665_s1 + $0x11e4] ss:$16 sps:$4 sm:$0xff]  }
 0x104   :  { %5308 = vmatpush1.bf16.msra.mxu1 %v7235_v25  ;;  %v4974_v32 = vpop.f32.mrf.mxu0  ;;  %5268 = vmatprep.subr.bf16.mxu0 %v7240_v28  ;;  %v7277_v25 = vld [vmem:[%s10665_s1 + $0x1200] ss:$16 sps:$4 sm:$0xff]   ;;  %v7285_v28 = vld [vmem:[%s10665_s1 + $0x13e4] ss:$16 sps:$4 sm:$0xff]  }
 0x105   :  { %v5015_v40 = vpop.f32.mrf.mxu1  ;;  %5309 = vmatprep.subr.bf16.mxu1 %v7243_v29  ;;  %v8976_v46 = vadd.f32 %v5013_v34, %v4973_v38  ;;  %v4975_v47 = vadd.f32 %v4974_v32, %v812_v30  ;;  %5298 = vmatprep.mubr.bf16.mxu0 %v8940_v22  ;;  %v7280_v29 = vld [vmem:[%s10665_s1 + $0x11e0] ss:$16 sps:$4 sm:$0xff]   ;;  %v7288_v33 = vld [vmem:[%s10665_s1 + $0x11c4] ss:$16 sps:$4 sm:$0xff]  }
 0x106   :  { %5339 = vmatprep.mubr.bf16.mxu1 %v8960_v31  ;;  %v4976_v52 = vpop.f32.mrf.mxu0  ;;  %v7283_v30 = vld [vmem:[%s10665_s1 + $0x13e0] ss:$16 sps:$4 sm:$0xff]   ;;  %v7291_v34 = vld [vmem:[%s10665_s1 + $0x13c4] ss:$16 sps:$4 sm:$0xff]  }
 0x107   :  { %v5017_v53 = vpop.f32.mrf.mxu1  ;;  %v8986_v55 = vadd.f32 %v5015_v40, %v4975_v47  ;;  %5269 = vmatpush1.bf16.msra.mxu0 %v7238_v36  ;;  %v7286_v36 = vld [vmem:[%s10665_s1 + $0x11c0] ss:$16 sps:$4 sm:$0xff]   ;;  %v7294_v38 = vld [vmem:[%s10665_s1 + $0x11a4] ss:$16 sps:$4 sm:$0xff]  }
 0x108   :  { %5310 = vmatpush1.bf16.msra.mxu1 %v7241_v37  ;;  %v4977_v56 = vpop.f32.mrf.mxu0  ;;  %5270 = vmatprep.subr.bf16.mxu0 %v7246_v44  ;;  %v7289_v37 = vld [vmem:[%s10665_s1 + $0x13c0] ss:$16 sps:$4 sm:$0xff]   ;;  %v7297_v32 = vld [vmem:[%s10665_s1 + $0x13a4] ss:$16 sps:$4 sm:$0xff]  }
 0x109   :  { %v5018_v57 = vpop.f32.mrf.mxu1  ;;  %5311 = vmatprep.subr.bf16.mxu1 %v7249_v45  ;;  %v7292_v40 = vld [vmem:[%s10665_s1 + $0x11a0] ss:$16 sps:$4 sm:$0xff]   ;;  %v7300_v45 = vld [vmem:[%s10665_s1 + $0x1184] ss:$16 sps:$4 sm:$0xff]  }
 0x10a   :  { %v7295_v44 = vld [vmem:[%s10665_s1 + $0x13a0] ss:$16 sps:$4 sm:$0xff]   ;;  %v7303_v47 = vld [vmem:[%s10665_s1 + $0x1384] ss:$16 sps:$4 sm:$0xff]  }
 0x10b   :  { %5271 = vmatpush1.bf16.msra.mxu0 %v7244_v48  ;;  %v7298_v48 = vld [vmem:[%s10665_s1 + $0x1180] ss:$16 sps:$4 sm:$0xff]   ;;  %v7306_v52 = vld [vmem:[%s10665_s1 + $0x1164] ss:$16 sps:$4 sm:$0xff]  }
 0x10c   :  { %5312 = vmatpush1.bf16.msra.mxu1 %v7247_v51  ;;  %5272 = vmatprep.subr.bf16.mxu0 %v7252_v58  ;;  %v7301_v51 = vld [vmem:[%s10665_s1 + $0x1380] ss:$16 sps:$4 sm:$0xff]   ;;  %v7309_v53 = vld [vmem:[%s10665_s1 + $0x1364] ss:$16 sps:$4 sm:$0xff]  }
 0x10d   :  { %5313 = vmatprep.subr.bf16.mxu1 %v7255_v61  ;;  %v7304_v56 = vld [vmem:[%s10665_s1 + $0x1160] ss:$16 sps:$4 sm:$0xff]   ;;  %v7312_v58 = vld [vmem:[%s10665_s1 + $0x1144] ss:$16 sps:$4 sm:$0xff]  }
 0x10e   :  { %v7307_v57 = vld [vmem:[%s10665_s1 + $0x1360] ss:$16 sps:$4 sm:$0xff]   ;;  %v7315_v61 = vld [vmem:[%s10665_s1 + $0x1344] ss:$16 sps:$4 sm:$0xff]  }
 0x10f   :  { %5273 = vmatpush1.bf16.msra.mxu0 %v7250_v62  ;;  %v927_v62 = vcombine.high %v8892_v1, %v8892_v1  ;;  %v7321_v1 = vld [vmem:[%s10665_s1 + $0x1324] ss:$16 sps:$4 sm:$0xff]  }
 0x110   :  { %5314 = vmatpush1.bf16.msra.mxu1 %v7253_v63  ;;  %5274 = vmatprep.subr.bf16.mxu0 %v7258_v2  ;;  %v7310_v63 = vld [vmem:[%s10665_s1 + $0x1140] ss:$16 sps:$4 sm:$0xff]  }
 0x111   :  { %5315 = vmatprep.subr.bf16.mxu1 %v7261_v3  ;;  %v7313_v2 = vld [vmem:[%s10665_s1 + $0x1340] ss:$16 sps:$4 sm:$0xff]   ;;  %v7318_v3 = vld [vmem:[%s10665_s1 + $0x1124] ss:$16 sps:$4 sm:$0xff]  }
 0x113   :  { %5275 = vmatpush1.bf16.msra.mxu0 %v7256_v5  ;;  %v9129_v5 = vrot.slane %v927_v62, %v8183_v49  ;;  %v7349_v62 = vld [vmem:[%s10665_s1 + $0x1680] ss:$16 sps:$4 sm:$0xff]  }
 0x114   :  { %5316 = vmatpush1.bf16.msra.mxu1 %v7259_v7  ;;  %5276 = vmatprep.subr.bf16.mxu0 %v7264_v8  ;;  %v7316_v7 = vld [vmem:[%s10665_s1 + $0x1120] ss:$16 sps:$4 sm:$0xff]  }
 0x115   :  { %5317 = vmatprep.subr.bf16.mxu1 %v7267_v9  ;;  %v7319_v8 = vld [vmem:[%s10665_s1 + $0x1320] ss:$16 sps:$4 sm:$0xff]   ;;  %v7324_v9 = vld [vmem:[%s10665_s1 + $0x1104] ss:$16 sps:$4 sm:$0xff]  }
 0x117   :  { %5277 = vmatpush1.bf16.msra.mxu0 %v7262_v10  ;;  %v7327_v10 = vld [vmem:[%s10665_s1 + $0x1304] ss:$16 sps:$4 sm:$0xff]  }
 0x118   :  { %5318 = vmatpush1.bf16.msra.mxu1 %v7265_v11  ;;  %5278 = vmatprep.subr.bf16.mxu0 %v7270_v12  ;;  %v943_v11 = vcombine.high %v9129_v5, %v9129_v5  ;;  %v9147_v12 = vrot.slane %v8902_v4, %v8183_v49  ;;  %v7333_v4 = vld [vmem:[%s10665_s1 + $0x16e4] ss:$16 sps:$4 sm:$0xff]  }
 0x119   :  { %5319 = vmatprep.subr.bf16.mxu1 %v7273_v14  ;;  %v7322_v14 = vld [vmem:[%s10665_s1 + $0x1100] ss:$16 sps:$4 sm:$0xff]  }
 0x11b   :  { %5279 = vmatpush1.bf16.msra.mxu0 %v7268_v16  ;;  %v7325_v16 = vld [vmem:[%s10665_s1 + $0x1300] ss:$16 sps:$4 sm:$0xff]  }
 0x11c   :  { %5320 = vmatpush1.bf16.msra.mxu1 %v7271_v19  ;;  %5280 = vmatprep.subr.bf16.mxu0 %v7276_v20  ;;  %v7330_v19 = vld [vmem:[%s10665_s1 + $0x14e4] ss:$16 sps:$4 sm:$0xff]   ;;  %v7328_v20 = vld [vmem:[%s10665_s1 + $0x14e0] ss:$16 sps:$4 sm:$0xff]  }
 0x11d   :  { %5321 = vmatprep.subr.bf16.mxu1 %v7279_v21  ;;  %v7331_v21 = vld [vmem:[%s10665_s1 + $0x16e0] ss:$16 sps:$4 sm:$0xff]  }
 0x11f   :  { %5281 = vmatpush1.bf16.msra.mxu0 %v7274_v24  ;;  %v9168_v24 = vrot.slane %v943_v11, %v8183_v49  ;;  %v7366_v11 = vld [vmem:[%s10665_s1 + $0x1424] ss:$16 sps:$4 sm:$0xff]  }
 0x120   :  { %5322 = vmatpush1.bf16.msra.mxu1 %v7277_v25  ;;  %5282 = vmatprep.subr.bf16.mxu0 %v7282_v27  ;;  %v9172_v25 = vcombine.high %v9147_v12, %v9147_v12  ;;  %v7336_v27 = vld [vmem:[%s10665_s1 + $0x14c4] ss:$16 sps:$4 sm:$0xff]  }
 0x121   :  { %5323 = vmatprep.subr.bf16.mxu1 %v7285_v28  ;;  %v7339_v28 = vld [vmem:[%s10665_s1 + $0x16c4] ss:$16 sps:$4 sm:$0xff]  }
 0x123   :  { %5283 = vmatpush2.bf16.msra.mxu0 %v7280_v29  ;;  %v7334_v29 = vld [vmem:[%s10665_s1 + $0x14c0] ss:$16 sps:$4 sm:$0xff]  }
 0x124   :  { %5324 = vmatpush2.bf16.msra.mxu1 %v7283_v30  ;;  %5284 = vmatprep.subr.bf16.mxu0 %v7288_v33  ;;  %v7337_v30 = vld [vmem:[%s10665_s1 + $0x16c0] ss:$16 sps:$4 sm:$0xff]   ;;  %v9188_v33 = vcombine.high %v9168_v24, %v9168_v24 }
 0x125   :  { %5325 = vmatprep.subr.bf16.mxu1 %v7291_v34 }
 0x127   :  { %5285 = vmatpush2.bf16.msra.mxu0 %v7286_v36 }
 0x128   :  { %5326 = vmatpush2.bf16.msra.mxu1 %v7289_v37  ;;  %5286 = vmatprep.subr.bf16.mxu0 %v7294_v38 }
 0x129   :  { %5327 = vmatprep.subr.bf16.mxu1 %v7297_v32 }
 0x12b   :  { %5287 = vmatpush2.bf16.msra.mxu0 %v7292_v40  ;;  %v7342_v40 = vld [vmem:[%s10665_s1 + $0x14a4] ss:$16 sps:$4 sm:$0xff]  }
 0x12c   :  { %5328 = vmatpush2.bf16.msra.mxu1 %v7295_v44  ;;  %5288 = vmatprep.subr.bf16.mxu0 %v7300_v45  ;;  %v7345_v44 = vld [vmem:[%s10665_s1 + $0x16a4] ss:$16 sps:$4 sm:$0xff]  }
 0x12d   :  { %5329 = vmatprep.subr.bf16.mxu1 %v7303_v47 }
 0x12f   :  { %5289 = vmatpush2.bf16.msra.mxu0 %v7298_v48  ;;  %v7343_v48 = vld [vmem:[%s10665_s1 + $0x16a0] ss:$16 sps:$4 sm:$0xff]  }
 0x130   :  { %5330 = vmatpush2.bf16.msra.mxu1 %v7301_v51  ;;  %5290 = vmatprep.subr.bf16.mxu0 %v7306_v52 }
 0x131   :  { %5331 = vmatprep.subr.bf16.mxu1 %v7309_v53 }
 0x133   :  { %5291 = vmatpush2.bf16.msra.mxu0 %v7304_v56 }
 0x134   :  { %5332 = vmatpush2.bf16.msra.mxu1 %v7307_v57  ;;  %5292 = vmatprep.subr.bf16.mxu0 %v7312_v58  ;;  %v7348_v57 = vld [vmem:[%s10665_s1 + $0x1484] ss:$16 sps:$4 sm:$0xff]  }
 0x135   :  { %5333 = vmatprep.subr.bf16.mxu1 %v7315_v61  ;;  %v7351_v58 = vld [vmem:[%s10665_s1 + $0x1684] ss:$16 sps:$4 sm:$0xff]   ;;  %v7346_v61 = vld [vmem:[%s10665_s1 + $0x1480] ss:$16 sps:$4 sm:$0xff]  }
 0x137   :  { %5293 = vmatpush2.bf16.msra.mxu0 %v7310_v63  ;;  %v7354_v63 = vld [vmem:[%s10665_s1 + $0x1464] ss:$16 sps:$4 sm:$0xff]  }
 0x138   :  { %5334 = vmatpush2.bf16.msra.mxu1 %v7313_v2  ;;  %5294 = vmatprep.subr.bf16.mxu0 %v7318_v3  ;;  %v7357_v2 = vld [vmem:[%s10665_s1 + $0x1664] ss:$16 sps:$4 sm:$0xff]   ;;  %v7352_v3 = vld [vmem:[%s10665_s1 + $0x1460] ss:$16 sps:$4 sm:$0xff]  }
 0x139   :  { %5335 = vmatprep.subr.bf16.mxu1 %v7321_v1  ;;  %v7355_v1 = vld [vmem:[%s10665_s1 + $0x1660] ss:$16 sps:$4 sm:$0xff]  }
 0x13b   :  { %5295 = vmatpush2.bf16.msra.mxu0 %v7316_v7  ;;  %v7360_v7 = vld [vmem:[%s10665_s1 + $0x1444] ss:$16 sps:$4 sm:$0xff]  }
 0x13c   :  { %5336 = vmatpush2.bf16.msra.mxu1 %v7319_v8  ;;  %5296 = vmatprep.subr.bf16.mxu0 %v7324_v9  ;;  %v7363_v8 = vld [vmem:[%s10665_s1 + $0x1644] ss:$16 sps:$4 sm:$0xff]   ;;  %v7358_v9 = vld [vmem:[%s10665_s1 + $0x1440] ss:$16 sps:$4 sm:$0xff]  }
 0x13d   :  { %5337 = vmatprep.subr.bf16.mxu1 %v7327_v10  ;;  %v7361_v10 = vld [vmem:[%s10665_s1 + $0x1640] ss:$16 sps:$4 sm:$0xff]  }
 0x13f   :  { %5297 = vmatpush2.bf16.msra.mxu0 %v7322_v14  ;;  %v7369_v14 = vld [vmem:[%s10665_s1 + $0x1624] ss:$16 sps:$4 sm:$0xff]  }
 0x140   :  { %5338 = vmatpush2.bf16.msra.mxu1 %v7325_v16  ;;  %5348 = vmatprep.subr.bf16.mxu0 %v7330_v19  ;;  %v7364_v16 = vld [vmem:[%s10665_s1 + $0x1420] ss:$16 sps:$4 sm:$0xff]  }
 0x141   :  { %5389 = vmatprep.subr.bf16.mxu1 %v7333_v4  ;;  %v7367_v19 = vld [vmem:[%s10665_s1 + $0x1620] ss:$16 sps:$4 sm:$0xff]   ;;  %v7372_v4 = vld [vmem:[%s10665_s1 + $0x1404] ss:$16 sps:$4 sm:$0xff]  }
 0x142   :  { %v5054_v34 = vpop.f32.mrf.mxu0  ;;  %5299 = vmatmul.mubr.bf16.vlgmr.msra.gmra.mxu0 %v9147_v12 }
 0x143   :  { %v5095_v36 = vpop.f32.mrf.mxu1  ;;  %5340 = vmatmul.mubr.bf16.vlgmr.msra.gmra.mxu1 %v9172_v25  ;;  %v5055_v37 = vadd.f32 %v5054_v34, %v8976_v46  ;;  %5349 = vmatpush1.bf16.msra.mxu0 %v7328_v20  ;;  %v7340_v46 = vld [vmem:[%s10665_s1 + $0x14a0] ss:$16 sps:$4 sm:$0xff]   ;;  %v7375_v20 = vld [vmem:[%s10665_s1 + $0x1604] ss:$16 sps:$4 sm:$0xff]  }
 0x144   :  { %5390 = vmatpush1.bf16.msra.mxu1 %v7331_v21  ;;  %v5056_v38 = vpop.f32.mrf.mxu0  ;;  %5350 = vmatprep.subr.bf16.mxu0 %v7336_v27  ;;  %v7370_v21 = vld [vmem:[%s10665_s1 + $0x1400] ss:$16 sps:$4 sm:$0xff]  }
 0x145   :  { %v5097_v32 = vpop.f32.mrf.mxu1  ;;  %5391 = vmatprep.subr.bf16.mxu1 %v7339_v28  ;;  %v9199_v45 = vadd.f32 %v5095_v36, %v5055_v37  ;;  %v5057_v47 = vadd.f32 %v5056_v38, %v8986_v55  ;;  %5380 = vmatprep.mubr.bf16.mxu0 %v9168_v24  ;;  %v7373_v27 = vld [vmem:[%s10665_s1 + $0x1600] ss:$16 sps:$4 sm:$0xff]   ;;  %v7378_v28 = vld [vmem:[%s10665_s1 + $0x15e4] ss:$16 sps:$4 sm:$0xff]  }
 0x146   :  { %5421 = vmatprep.mubr.bf16.mxu1 %v9188_v33  ;;  %v5058_v51 = vpop.f32.mrf.mxu0  ;;  %v7379_v34 = vld [vmem:[%s10665_s1 + $0x17e0] ss:$16 sps:$4 sm:$0xff]   ;;  %v7384_v36 = vld [vmem:[%s10665_s1 + $0x15c4] ss:$16 sps:$4 sm:$0xff]  }
 0x147   :  { %v5099_v52 = vpop.f32.mrf.mxu1  ;;  %v9210_v53 = vadd.f32 %v5097_v32, %v5057_v47  ;;  %5351 = vmatpush1.bf16.msra.mxu0 %v7334_v29  ;;  %v7381_v29 = vld [vmem:[%s10665_s1 + $0x17e4] ss:$16 sps:$4 sm:$0xff]   ;;  %v7382_v38 = vld [vmem:[%s10665_s1 + $0x15c0] ss:$16 sps:$4 sm:$0xff]  }
 0x148   :  { %5392 = vmatpush1.bf16.msra.mxu1 %v7337_v30  ;;  %v5059_v56 = vpop.f32.mrf.mxu0  ;;  %5352 = vmatprep.subr.bf16.mxu0 %v7342_v40  ;;  %v7376_v30 = vld [vmem:[%s10665_s1 + $0x15e0] ss:$16 sps:$4 sm:$0xff]   ;;  %v7387_v37 = vld [vmem:[%s10665_s1 + $0x17c4] ss:$16 sps:$4 sm:$0xff]  }
 0x149   :  { %v5100_v55 = vpop.f32.mrf.mxu1  ;;  %5393 = vmatprep.subr.bf16.mxu1 %v7345_v44  ;;  %v7385_v32 = vld [vmem:[%s10665_s1 + $0x17c0] ss:$16 sps:$4 sm:$0xff]   ;;  %v7390_v40 = vld [vmem:[%s10665_s1 + $0x15a4] ss:$16 sps:$4 sm:$0xff]  }
 0x14a   :  { %v7393_v44 = vld [vmem:[%s10665_s1 + $0x17a4] ss:$16 sps:$4 sm:$0xff]   ;;  %v7388_v47 = vld [vmem:[%s10665_s1 + $0x15a0] ss:$16 sps:$4 sm:$0xff]  }
 0x14b   :  { %5353 = vmatpush1.bf16.msra.mxu0 %v7340_v46  ;;  %v7391_v46 = vld [vmem:[%s10665_s1 + $0x17a0] ss:$16 sps:$4 sm:$0xff]   ;;  %v7399_v51 = vld [vmem:[%s10665_s1 + $0x1784] ss:$16 sps:$4 sm:$0xff]  }
 0x14c   :  { %5394 = vmatpush1.bf16.msra.mxu1 %v7343_v48  ;;  %5354 = vmatprep.subr.bf16.mxu0 %v7348_v57  ;;  %v7396_v48 = vld [vmem:[%s10665_s1 + $0x1584] ss:$16 sps:$4 sm:$0xff]   ;;  %v7394_v52 = vld [vmem:[%s10665_s1 + $0x1580] ss:$16 sps:$4 sm:$0xff]  }
 0x14d   :  { %5395 = vmatprep.subr.bf16.mxu1 %v7351_v58  ;;  %v7397_v56 = vld [vmem:[%s10665_s1 + $0x1780] ss:$16 sps:$4 sm:$0xff]   ;;  %v7402_v55 = vld [vmem:[%s10665_s1 + $0x1564] ss:$16 sps:$4 sm:$0xff]  }
 0x14e   :  { %v7405_v57 = vld [vmem:[%s10665_s1 + $0x1764] ss:$16 sps:$4 sm:$0xff]   ;;  %v7400_v58 = vld [vmem:[%s10665_s1 + $0x1560] ss:$16 sps:$4 sm:$0xff]  }
 0x14f   :  { %5355 = vmatpush1.bf16.msra.mxu0 %v7346_v61  ;;  %v7403_v61 = vld [vmem:[%s10665_s1 + $0x1760] ss:$16 sps:$4 sm:$0xff]  }
 0x150   :  { %5396 = vmatpush1.bf16.msra.mxu1 %v7349_v62  ;;  %5356 = vmatprep.subr.bf16.mxu0 %v7354_v63  ;;  %v7408_v62 = vld [vmem:[%s10665_s1 + $0x1544] ss:$16 sps:$4 sm:$0xff]  }
 0x151   :  { %5397 = vmatprep.subr.bf16.mxu1 %v7357_v2  ;;  %v7411_v63 = vld [vmem:[%s10665_s1 + $0x1744] ss:$16 sps:$4 sm:$0xff]   ;;  %v7406_v2 = vld [vmem:[%s10665_s1 + $0x1540] ss:$16 sps:$4 sm:$0xff]  }
 0x153   :  { %5357 = vmatpush1.bf16.msra.mxu0 %v7352_v3  ;;  %v7409_v3 = vld [vmem:[%s10665_s1 + $0x1740] ss:$16 sps:$4 sm:$0xff]  }
 0x154   :  { %5398 = vmatpush1.bf16.msra.mxu1 %v7355_v1  ;;  %5358 = vmatprep.subr.bf16.mxu0 %v7360_v7  ;;  %v7414_v1 = vld [vmem:[%s10665_s1 + $0x1524] ss:$16 sps:$4 sm:$0xff]  }
 0x155   :  { %5399 = vmatprep.subr.bf16.mxu1 %v7363_v8  ;;  %v7417_v7 = vld [vmem:[%s10665_s1 + $0x1724] ss:$16 sps:$4 sm:$0xff]   ;;  %v7412_v8 = vld [vmem:[%s10665_s1 + $0x1520] ss:$16 sps:$4 sm:$0xff]  }
 0x157   :  { %5359 = vmatpush1.bf16.msra.mxu0 %v7358_v9  ;;  %v7415_v9 = vld [vmem:[%s10665_s1 + $0x1720] ss:$16 sps:$4 sm:$0xff]  }
 0x158   :  { %5400 = vmatpush1.bf16.msra.mxu1 %v7361_v10  ;;  %5360 = vmatprep.subr.bf16.mxu0 %v7366_v11  ;;  %v7420_v10 = vld [vmem:[%s10665_s1 + $0x1504] ss:$16 sps:$4 sm:$0xff]  }
 0x159   :  { %5401 = vmatprep.subr.bf16.mxu1 %v7369_v14  ;;  %v7423_v11 = vld [vmem:[%s10665_s1 + $0x1704] ss:$16 sps:$4 sm:$0xff]   ;;  %v9364_v14 = vrot.slane %v9129_v5, %v8183_v49  ;;  %v7430_v5 = vld [vmem:[%s10665_s1 + $0xec] ss:$16 sps:$4 sm:$0xff]  }
 0x15b   :  { %5361 = vmatpush1.bf16.msra.mxu0 %v7364_v16  ;;  %v7418_v16 = vld [vmem:[%s10665_s1 + $0x1500] ss:$16 sps:$4 sm:$0xff]  }
 0x15c   :  { %5402 = vmatpush1.bf16.msra.mxu1 %v7367_v19  ;;  %5362 = vmatprep.subr.bf16.mxu0 %v7372_v4  ;;  %v7421_v19 = vld [vmem:[%s10665_s1 + $0x1700] ss:$16 sps:$4 sm:$0xff]   ;;  %v7427_v4 = vld [vmem:[%s10665_s1 + $0x1864] ss:$16 sps:$4 sm:$0xff]  }
 0x15d   :  { %5403 = vmatprep.subr.bf16.mxu1 %v7375_v20  ;;  %v7425_v20 = vld [vmem:[%s10665_s1 + $0x1860] ss:$16 sps:$4 sm:$0xff]  }
 0x15f   :  { %5363 = vmatpush1.bf16.msra.mxu0 %v7370_v21  ;;  %v7428_v21 = vld [vmem:[%s10665_s1 + $0xe8] ss:$16 sps:$4 sm:$0xff]  }
 0x160   :  { %5404 = vmatpush1.bf16.msra.mxu1 %v7373_v27  ;;  %5364 = vmatprep.subr.bf16.mxu0 %v7378_v28  ;;  %v9386_v27 = vcombine.high %v9364_v14, %v9364_v14  ;;  %v7433_v28 = vld [vmem:[%s10665_s1 + $0x1844] ss:$16 sps:$4 sm:$0xff]  }
 0x161   :  { %5405 = vmatprep.subr.bf16.mxu1 %v7381_v29  ;;  %v7436_v29 = vld [vmem:[%s10665_s1 + $0xcc] ss:$16 sps:$4 sm:$0xff]  }
 0x163   :  { %5365 = vmatpush2.bf16.msra.mxu0 %v7376_v30  ;;  %v7431_v30 = vld [vmem:[%s10665_s1 + $0x1840] ss:$16 sps:$4 sm:$0xff]  }
 0x164   :  { %5406 = vmatpush2.bf16.msra.mxu1 %v7379_v34  ;;  %5366 = vmatprep.subr.bf16.mxu0 %v7384_v36  ;;  %v7434_v34 = vld [vmem:[%s10665_s1 + $0xc8] ss:$16 sps:$4 sm:$0xff]  }
 0x165   :  { %5407 = vmatprep.subr.bf16.mxu1 %v7387_v37 }
 0x167   :  { %5367 = vmatpush2.bf16.msra.mxu0 %v7382_v38 }
 0x168   :  { %5408 = vmatpush2.bf16.msra.mxu1 %v7385_v32  ;;  %5368 = vmatprep.subr.bf16.mxu0 %v7390_v40 }
 0x169   :  { %5409 = vmatprep.subr.bf16.mxu1 %v7393_v44  ;;  %v7439_v44 = vld [vmem:[%s10665_s1 + $0x1824] ss:$16 sps:$4 sm:$0xff]  }
 0x16b   :  { %5369 = vmatpush2.bf16.msra.mxu0 %v7388_v47  ;;  %v7442_v47 = vld [vmem:[%s10665_s1 + $0xac] ss:$16 sps:$4 sm:$0xff]  }
 0x16c   :  { %5410 = vmatpush2.bf16.msra.mxu1 %v7391_v46  ;;  %5370 = vmatprep.subr.bf16.mxu0 %v7396_v48 }
 0x16d   :  { %5411 = vmatprep.subr.bf16.mxu1 %v7399_v51  ;;  %v7440_v51 = vld [vmem:[%s10665_s1 + $0xa8] ss:$16 sps:$4 sm:$0xff]  }
 0x16f   :  { %5371 = vmatpush2.bf16.msra.mxu0 %v7394_v52  ;;  %v8027_v52 = vmov 0  }
 0x170   :  { %5412 = vmatpush2.bf16.msra.mxu1 %v7397_v56  ;;  %5372 = vmatprep.subr.bf16.mxu0 %v7402_v55 }
 0x171   :  { %5413 = vmatprep.subr.bf16.mxu1 %v7405_v57 }
 0x173   :  { %5373 = vmatpush2.bf16.msra.mxu0 %v7400_v58 }
 0x174   :  { %5414 = vmatpush2.bf16.msra.mxu1 %v7403_v61  ;;  %5374 = vmatprep.subr.bf16.mxu0 %v7408_v62  ;;  %v7445_v61 = vld [vmem:[%s10665_s1 + $0x1804] ss:$16 sps:$4 sm:$0xff]   ;;  %v7448_v62 = vld [vmem:[%s10665_s1 + $0x8c] ss:$16 sps:$4 sm:$0xff]  }
 0x175   :  { %5415 = vmatprep.subr.bf16.mxu1 %v7411_v63  ;;  %v7446_v63 = vld [vmem:[%s10665_s1 + $0x88] ss:$16 sps:$4 sm:$0xff]  }
 0x177   :  { %5375 = vmatpush2.bf16.msra.mxu0 %v7406_v2  ;;  %v6054_v2 = vld.sshfl [vmem:[%s10666_s0 + $0x18] sm:$0x1 pattern:$0x75316420] }
 0x178   :  { %5416 = vmatpush2.bf16.msra.mxu1 %v7409_v3  ;;  %5376 = vmatprep.subr.bf16.mxu0 %v7414_v1  ;;  %v7451_v3 = vld [vmem:[%s10665_s1 + $0x6c] ss:$16 sps:$4 sm:$0xff]  }
 0x179   :  { %5417 = vmatprep.subr.bf16.mxu1 %v7417_v7  ;;  %v7454_v1 = vld [vmem:[%s10665_s1 + $0x2ec] ss:$16 sps:$4 sm:$0xff]   ;;  %v7449_v7 = vld [vmem:[%s10665_s1 + $0x68] ss:$16 sps:$4 sm:$0xff]  }
 0x17b   :  { %5377 = vmatpush2.bf16.msra.mxu0 %v7412_v8  ;;  %v7452_v8 = vld [vmem:[%s10665_s1 + $0x2e8] ss:$16 sps:$4 sm:$0xff]  }
 0x17c   :  { %5418 = vmatpush2.bf16.msra.mxu1 %v7415_v9  ;;  %5378 = vmatprep.subr.bf16.mxu0 %v7420_v10  ;;  %v9450_v9 = vrot.slane %v6054_v2, %v8183_v49  ;;  %v7457_v10 = vld [vmem:[%s10665_s1 + $0x4c] ss:$16 sps:$4 sm:$0xff]   ;;  %v7500_v2 = vld [vmem:[%s10665_s1 + $0x3e8] ss:$16 sps:$4 sm:$0xff]  }
 0x17d   :  { %5419 = vmatprep.subr.bf16.mxu1 %v7423_v11  ;;  %v7460_v11 = vld [vmem:[%s10665_s1 + $0x2cc] ss:$16 sps:$4 sm:$0xff]  }
 0x17f   :  { %5379 = vmatpush2.bf16.msra.mxu0 %v7418_v16  ;;  %v7455_v16 = vld [vmem:[%s10665_s1 + $0x48] ss:$16 sps:$4 sm:$0xff]  }
 0x180   :  { %5420 = vmatpush2.bf16.msra.mxu1 %v7421_v19  ;;  %5438 = vmatprep.subr.bf16.mxu0 %v7427_v4  ;;  %v7458_v19 = vld [vmem:[%s10665_s1 + $0x2c8] ss:$16 sps:$4 sm:$0xff]   ;;  %v7463_v4 = vld [vmem:[%s10665_s1 + $0x2c] ss:$16 sps:$4 sm:$0xff]  }
 0x181   :  { %5471 = vmatprep.subr.bf16.mxu1 %v7430_v5  ;;  %v7466_v5 = vld [vmem:[%s10665_s1 + $0x2ac] ss:$16 sps:$4 sm:$0xff]  }
 0x182   :  { %v5136_v36 = vpop.f32.mrf.mxu0  ;;  %5381 = vmatmul.mubr.bf16.vlgmr.msra.gmra.mxu0 %v9364_v14 }
 0x183   :  { %v5177_v37 = vpop.f32.mrf.mxu1  ;;  %5422 = vmatmul.mubr.bf16.vlgmr.msra.gmra.mxu1 %v9386_v27  ;;  %v5137_v38 = vadd.f32 %v5136_v36, %v9199_v45  ;;  %5439 = vmatpush1.bf16.msra.mxu0 %v7425_v20  ;;  %v7437_v45 = vld [vmem:[%s10665_s1 + $0x1820] ss:$16 sps:$4 sm:$0xff]   ;;  %v7461_v20 = vld [vmem:[%s10665_s1 + $0x28] ss:$16 sps:$4 sm:$0xff]   ;;  %v7478_v36 = vld [vmem:[%s10665_s1 + $0x26c] ss:$16 sps:$4 sm:$0xff]  }
 0x184   :  { %5472 = vmatpush1.bf16.msra.mxu1 %v7428_v21  ;;  %v5138_v32 = vpop.f32.mrf.mxu0  ;;  %5440 = vmatprep.subr.bf16.mxu0 %v7433_v28  ;;  %v7464_v21 = vld [vmem:[%s10665_s1 + $0x2a8] ss:$16 sps:$4 sm:$0xff]   ;;  %v7469_v28 = vld [vmem:[%s10665_s1 + $0xc] ss:$16 sps:$4 sm:$0xff]  }
 0x185   :  { %v5179_v40 = vpop.f32.mrf.mxu1  ;;  %5473 = vmatprep.subr.bf16.mxu1 %v7436_v29  ;;  %v9409_v46 = vadd.f32 %v5177_v37, %v5137_v38  ;;  %v5139_v48 = vadd.f32 %v5138_v32, %v9210_v53  ;;  %5462 = vmatprep.mubr.bf16.mxu0 %v8027_v52  ;;  %v7467_v29 = vld [vmem:[%s10665_s1 + $0x8] ss:$16 sps:$4 sm:$0xff]   ;;  %v7481_v32 = vld [vmem:[%s10665_s1 + $0x1cc] ss:$16 sps:$4 sm:$0xff]  }
 0x186   :  { %5503 = vmatprep.mubr.bf16.mxu1 %v8211_v60  ;;  %v5140_v56 = vpop.f32.mrf.mxu0  ;;  %v7443_v60 = vld [vmem:[%s10665_s1 + $0x1800] ss:$16 sps:$4 sm:$0xff]   ;;  %v7473_v37 = vld [vmem:[%s10665_s1 + $0x1e8] ss:$16 sps:$4 sm:$0xff]  }
 0x187   :  { %v5181_v55 = vpop.f32.mrf.mxu1  ;;  %v9420_v57 = vadd.f32 %v5179_v40, %v5139_v48  ;;  %5441 = vmatpush1.bf16.msra.mxu0 %v7431_v30  ;;  %v7470_v30 = vld [vmem:[%s10665_s1 + $0x288] ss:$16 sps:$4 sm:$0xff]   ;;  %v7484_v40 = vld [vmem:[%s10665_s1 + $0x24c] ss:$16 sps:$4 sm:$0xff]  }
 0x188   :  { %5474 = vmatpush1.bf16.msra.mxu1 %v7434_v34  ;;  %v5141_v53 = vpop.f32.mrf.mxu0  ;;  %5442 = vmatprep.subr.bf16.mxu0 %v7439_v44  ;;  %v7475_v34 = vld [vmem:[%s10665_s1 + $0x1ec] ss:$16 sps:$4 sm:$0xff]   ;;  %v7476_v38 = vld [vmem:[%s10665_s1 + $0x268] ss:$16 sps:$4 sm:$0xff]  }
 0x189   :  { %v5182_v58 = vpop.f32.mrf.mxu1  ;;  %5475 = vmatprep.subr.bf16.mxu1 %v7442_v47  ;;  %v7479_v44 = vld [vmem:[%s10665_s1 + $0x1c8] ss:$16 sps:$4 sm:$0xff]   ;;  %v7487_v48 = vld [vmem:[%s10665_s1 + $0x1ac] ss:$16 sps:$4 sm:$0xff]  }
 0x18a   :  { %v7482_v47 = vld [vmem:[%s10665_s1 + $0x248] ss:$16 sps:$4 sm:$0xff]   ;;  %v7493_v55 = vld [vmem:[%s10665_s1 + $0x18c] ss:$16 sps:$4 sm:$0xff]  }
 0x18b   :  { %5443 = vmatpush1.bf16.msra.mxu0 %v7437_v45  ;;  %v7490_v45 = vld [vmem:[%s10665_s1 + $0x22c] ss:$16 sps:$4 sm:$0xff]   ;;  %v7488_v56 = vld [vmem:[%s10665_s1 + $0x228] ss:$16 sps:$4 sm:$0xff]  }
 0x18c   :  { %5476 = vmatpush1.bf16.msra.mxu1 %v7440_v51  ;;  %5444 = vmatprep.subr.bf16.mxu0 %v7445_v61  ;;  %v7485_v51 = vld [vmem:[%s10665_s1 + $0x1a8] ss:$16 sps:$4 sm:$0xff]   ;;  %v7496_v53 = vld [vmem:[%s10665_s1 + $0x20c] ss:$16 sps:$4 sm:$0xff]  }
 0x18d   :  { %5477 = vmatprep.subr.bf16.mxu1 %v7448_v62  ;;  %v7491_v58 = vld [vmem:[%s10665_s1 + $0x188] ss:$16 sps:$4 sm:$0xff]   ;;  %v7499_v62 = vld [vmem:[%s10665_s1 + $0x16c] ss:$16 sps:$4 sm:$0xff]  }
 0x18e   :  { %v7494_v61 = vld [vmem:[%s10665_s1 + $0x208] ss:$16 sps:$4 sm:$0xff]  }
 0x18f   :  { %5445 = vmatpush1.bf16.msra.mxu0 %v7443_v60  ;;  %v7502_v60 = vld [vmem:[%s10665_s1 + $0x3ec] ss:$16 sps:$4 sm:$0xff]  }
 0x190   :  { %5478 = vmatpush1.bf16.msra.mxu1 %v7446_v63  ;;  %5512 = vmatprep.subr.bf16.mxu0 %v7454_v1  ;;  %v7497_v63 = vld [vmem:[%s10665_s1 + $0x168] ss:$16 sps:$4 sm:$0xff]   ;;  %v7508_v1 = vld [vmem:[%s10665_s1 + $0x3cc] ss:$16 sps:$4 sm:$0xff]  }
 0x191   :  { %5479 = vmatprep.subr.bf16.mxu1 %v7451_v3  ;;  %v7505_v3 = vld [vmem:[%s10665_s1 + $0x14c] ss:$16 sps:$4 sm:$0xff]  }
 0x192   :  { %6839 = vmatmul.mubr.msk.bf16.vlgmr.msra.gmra.mxu0 %vm4934_vm0, %v9450_v9 }
 0x193   :  { %5513 = vmatpush1.bf16.msra.mxu0 %v7452_v8  ;;  %5544 = vmatprep.mubr.bf16.mxu0 %v8224_v0  ;;  %v7472_v0 = vld [vmem:[%s10665_s1 + $0x28c] ss:$16 sps:$4 sm:$0xff]   ;;  %v7506_v8 = vld [vmem:[%s10665_s1 + $0x3c8] ss:$16 sps:$4 sm:$0xff]  }
 0x194   :  { %5480 = vmatpush1.bf16.msra.mxu1 %v7449_v7  ;;  %5514 = vmatprep.subr.bf16.mxu0 %v7460_v11  ;;  %v7503_v7 = vld [vmem:[%s10665_s1 + $0x148] ss:$16 sps:$4 sm:$0xff]   ;;  %v7514_v11 = vld [vmem:[%s10665_s1 + $0x3ac] ss:$16 sps:$4 sm:$0xff]  }
 0x195   :  { %5481 = vmatprep.subr.bf16.mxu1 %v7457_v10  ;;  %v7511_v10 = vld [vmem:[%s10665_s1 + $0x12c] ss:$16 sps:$4 sm:$0xff]  }
 0x197   :  { %5515 = vmatpush1.bf16.msra.mxu0 %v7458_v19  ;;  %v7512_v19 = vld [vmem:[%s10665_s1 + $0x3a8] ss:$16 sps:$4 sm:$0xff]  }
 0x198   :  { %5482 = vmatpush1.bf16.msra.mxu1 %v7455_v16  ;;  %5516 = vmatprep.subr.bf16.mxu0 %v7466_v5  ;;  %v7509_v16 = vld [vmem:[%s10665_s1 + $0x128] ss:$16 sps:$4 sm:$0xff]   ;;  %v7520_v5 = vld [vmem:[%s10665_s1 + $0x38c] ss:$16 sps:$4 sm:$0xff]  }
 0x199   :  { %5483 = vmatprep.subr.bf16.mxu1 %v7463_v4  ;;  %v7517_v4 = vld [vmem:[%s10665_s1 + $0x10c] ss:$16 sps:$4 sm:$0xff]  }
 0x19b   :  { %5517 = vmatpush1.bf16.msra.mxu0 %v7464_v21  ;;  %v7518_v21 = vld [vmem:[%s10665_s1 + $0x388] ss:$16 sps:$4 sm:$0xff]  }
 0x19c   :  { %5484 = vmatpush1.bf16.msra.mxu1 %v7461_v20  ;;  %5518 = vmatprep.subr.bf16.mxu0 %v7472_v0  ;;  %v7515_v20 = vld [vmem:[%s10665_s1 + $0x108] ss:$16 sps:$4 sm:$0xff]   ;;  %v7526_v0 = vld [vmem:[%s10665_s1 + $0x4ec] ss:$16 sps:$4 sm:$0xff]  }
 0x19d   :  { %5485 = vmatprep.subr.bf16.mxu1 %v7469_v28  ;;  %v7523_v28 = vld [vmem:[%s10665_s1 + $0x36c] ss:$16 sps:$4 sm:$0xff]  }
 0x19f   :  { %5519 = vmatpush1.bf16.msra.mxu0 %v7470_v30  ;;  %v7524_v30 = vld [vmem:[%s10665_s1 + $0x4e8] ss:$16 sps:$4 sm:$0xff]  }
 0x1a0   :  { %5486 = vmatpush1.bf16.msra.mxu1 %v7467_v29  ;;  %5520 = vmatprep.subr.bf16.mxu0 %v7478_v36  ;;  %v7521_v29 = vld [vmem:[%s10665_s1 + $0x368] ss:$16 sps:$4 sm:$0xff]   ;;  %v7532_v36 = vld [vmem:[%s10665_s1 + $0x4cc] ss:$16 sps:$4 sm:$0xff]  }
 0x1a1   :  { %5487 = vmatprep.subr.bf16.mxu1 %v7475_v34  ;;  %v7529_v34 = vld [vmem:[%s10665_s1 + $0x34c] ss:$16 sps:$4 sm:$0xff]  }
 0x1a3   :  { %5521 = vmatpush1.bf16.msra.mxu0 %v7476_v38  ;;  %v7530_v38 = vld [vmem:[%s10665_s1 + $0x4c8] ss:$16 sps:$4 sm:$0xff]  }
 0x1a4   :  { %5488 = vmatpush2.bf16.msra.mxu1 %v7473_v37  ;;  %5522 = vmatprep.subr.bf16.mxu0 %v7484_v40  ;;  %v7527_v37 = vld [vmem:[%s10665_s1 + $0x348] ss:$16 sps:$4 sm:$0xff]  }
 0x1a5   :  { %5489 = vmatprep.subr.bf16.mxu1 %v7481_v32 }
 0x1a7   :  { %5523 = vmatpush1.bf16.msra.mxu0 %v7482_v47 }
 0x1a8   :  { %5490 = vmatpush2.bf16.msra.mxu1 %v7479_v44  ;;  %5524 = vmatprep.subr.bf16.mxu0 %v7490_v45  ;;  %v7535_v45 = vld [vmem:[%s10665_s1 + $0x32c] ss:$16 sps:$4 sm:$0xff]  }
 0x1a9   :  { %5491 = vmatprep.subr.bf16.mxu1 %v7487_v48 }
 0x1ab   :  { %5525 = vmatpush1.bf16.msra.mxu0 %v7488_v56 }
 0x1ac   :  { %5492 = vmatpush2.bf16.msra.mxu1 %v7485_v51  ;;  %5526 = vmatprep.subr.bf16.mxu0 %v7496_v53  ;;  %v7538_v51 = vld [vmem:[%s10665_s1 + $0x4ac] ss:$16 sps:$4 sm:$0xff]  }
 0x1ad   :  { %5493 = vmatprep.subr.bf16.mxu1 %v7493_v55  ;;  %v7536_v55 = vld [vmem:[%s10665_s1 + $0x4a8] ss:$16 sps:$4 sm:$0xff]  }
 0x1af   :  { %5527 = vmatpush1.bf16.msra.mxu0 %v7494_v61 }
 0x1b0   :  { %5494 = vmatpush2.bf16.msra.mxu1 %v7491_v58  ;;  %5528 = vmatprep.subr.bf16.mxu0 %v7502_v60 }
 0x1b1   :  { %5495 = vmatprep.subr.bf16.mxu1 %v7499_v62 }
 0x1b3   :  { %5529 = vmatpush2.bf16.msra.mxu0 %v7500_v2  ;;  %v7542_v2 = vld [vmem:[%s10665_s1 + $0x488] ss:$16 sps:$4 sm:$0xff]  }
 0x1b4   :  { %5496 = vmatpush2.bf16.msra.mxu1 %v7497_v63  ;;  %5530 = vmatprep.subr.bf16.mxu0 %v7508_v1  ;;  %v7544_v63 = vld [vmem:[%s10665_s1 + $0x48c] ss:$16 sps:$4 sm:$0xff]  }
 0x1b5   :  { %5497 = vmatprep.subr.bf16.mxu1 %v7505_v3  ;;  %v7547_v3 = vld [vmem:[%s10665_s1 + $0x46c] ss:$16 sps:$4 sm:$0xff]  }
 0x1b6   :  { %v7550_v1 = vld [vmem:[%s10665_s1 + $0x6ec] ss:$16 sps:$4 sm:$0xff]  }
 0x1b7   :  { %5531 = vmatpush2.bf16.msra.mxu0 %v7506_v8  ;;  %v7548_v8 = vld [vmem:[%s10665_s1 + $0x6e8] ss:$16 sps:$4 sm:$0xff]  }
 0x1b8   :  { %5498 = vmatpush2.bf16.msra.mxu1 %v7503_v7  ;;  %5532 = vmatprep.subr.bf16.mxu0 %v7514_v11  ;;  %v7545_v7 = vld [vmem:[%s10665_s1 + $0x468] ss:$16 sps:$4 sm:$0xff]   ;;  %v7556_v11 = vld [vmem:[%s10665_s1 + $0x6cc] ss:$16 sps:$4 sm:$0xff]  }
 0x1b9   :  { %5499 = vmatprep.subr.bf16.mxu1 %v7511_v10  ;;  %v7553_v10 = vld [vmem:[%s10665_s1 + $0x44c] ss:$16 sps:$4 sm:$0xff]  }
 0x1bb   :  { %5533 = vmatpush2.bf16.msra.mxu0 %v7512_v19  ;;  %v7554_v19 = vld [vmem:[%s10665_s1 + $0x6c8] ss:$16 sps:$4 sm:$0xff]  }
 0x1bc   :  { %5500 = vmatpush2.bf16.msra.mxu1 %v7509_v16  ;;  %5534 = vmatprep.subr.bf16.mxu0 %v7520_v5  ;;  %v7551_v16 = vld [vmem:[%s10665_s1 + $0x448] ss:$16 sps:$4 sm:$0xff]  }
 0x1bd   :  { %5501 = vmatprep.subr.bf16.mxu1 %v7517_v4  ;;  %v7559_v4 = vld [vmem:[%s10665_s1 + $0x42c] ss:$16 sps:$4 sm:$0xff]   ;;  %v7557_v5 = vld [vmem:[%s10665_s1 + $0x428] ss:$16 sps:$4 sm:$0xff]  }
 0x1bf   :  { %5535 = vmatpush2.bf16.msra.mxu0 %v7518_v21  ;;  %v7565_v21 = vld [vmem:[%s10665_s1 + $0x40c] ss:$16 sps:$4 sm:$0xff]  }
 0x1c0   :  { %5502 = vmatpush2.bf16.msra.mxu1 %v7515_v20  ;;  %5536 = vmatprep.subr.bf16.mxu0 %v7523_v28  ;;  %v7560_v20 = vld [vmem:[%s10665_s1 + $0x6a8] ss:$16 sps:$4 sm:$0xff]  }
 0x1c1   :  { %5553 = vmatprep.subr.bf16.mxu1 %v7526_v0  ;;  %v7563_v28 = vld [vmem:[%s10665_s1 + $0x408] ss:$16 sps:$4 sm:$0xff]  }
 0x1c2   :  { %v5218_v32 = vpop.f32.mrf.mxu0  ;;  %v7566_v0 = vld [vmem:[%s10665_s1 + $0x688] ss:$16 sps:$4 sm:$0xff]  }
 0x1c3   :  { %v5259_v40 = vpop.f32.mrf.mxu1  ;;  %5504 = vmatmul.mubr.bf16.vlgmr.msra.gmra.mxu1 %v8261_v13  ;;  %v5219_v44 = vadd.f32 %v5218_v32, %v9409_v46  ;;  %5537 = vmatpush2.bf16.msra.mxu0 %v7521_v29  ;;  %v7533_v46 = vld [vmem:[%s10665_s1 + $0x328] ss:$16 sps:$4 sm:$0xff]   ;;  %v7571_v29 = vld [vmem:[%s10665_s1 + $0x5ec] ss:$16 sps:$4 sm:$0xff]  }
 0x1c4   :  { %5554 = vmatpush1.bf16.msra.mxu1 %v7524_v30  ;;  %v5220_v47 = vpop.f32.mrf.mxu0  ;;  %5538 = vmatprep.subr.bf16.mxu0 %v7529_v34  ;;  %v7574_v30 = vld [vmem:[%s10665_s1 + $0x66c] ss:$16 sps:$4 sm:$0xff]   ;;  %v7569_v34 = vld [vmem:[%s10665_s1 + $0x5e8] ss:$16 sps:$4 sm:$0xff]  }
 0x1c5   :  { %v5261_v48 = vpop.f32.mrf.mxu1  ;;  %5555 = vmatprep.subr.bf16.mxu1 %v7532_v36  ;;  %v9619_v56 = vadd.f32 %v5259_v40, %v5219_v44  ;;  %v5221_v13 = vadd.f32 %v5220_v47, %v9420_v57  ;;  %5585 = vmatprep.mubr.bf16.mxu1 %v8273_v17  ;;  %v7541_v57 = vld [vmem:[%s10665_s1 + $0x30c] ss:$16 sps:$4 sm:$0xff]   ;;  %v7539_v17 = vld [vmem:[%s10665_s1 + $0x308] ss:$16 sps:$4 sm:$0xff]  }
 0x1c6   :  { %v5222_v53 = vpop.f32.mrf.mxu0  ;;  %v7572_v36 = vld [vmem:[%s10665_s1 + $0x668] ss:$16 sps:$4 sm:$0xff]   ;;  %v7583_v44 = vld [vmem:[%s10665_s1 + $0x5ac] ss:$16 sps:$4 sm:$0xff]  }
 0x1c7   :  { %v5263_v58 = vpop.f32.mrf.mxu1  ;;  %v9629_v61 = vadd.f32 %v5261_v48, %v5221_v13  ;;  %5539 = vmatpush2.bf16.msra.mxu0 %v7527_v37  ;;  %v7577_v37 = vld [vmem:[%s10665_s1 + $0x5cc] ss:$16 sps:$4 sm:$0xff]   ;;  %v7575_v32 = vld [vmem:[%s10665_s1 + $0x5c8] ss:$16 sps:$4 sm:$0xff]  }
 0x1c8   :  { %5556 = vmatpush1.bf16.msra.mxu1 %v7530_v38  ;;  %v5223_v62 = vpop.f32.mrf.mxu0  ;;  %5540 = vmatprep.subr.bf16.mxu0 %v7535_v45  ;;  %v7580_v38 = vld [vmem:[%s10665_s1 + $0x64c] ss:$16 sps:$4 sm:$0xff]   ;;  %v7578_v40 = vld [vmem:[%s10665_s1 + $0x648] ss:$16 sps:$4 sm:$0xff]  }
 0x1c9   :  { %v5264_v60 = vpop.f32.mrf.mxu1  ;;  %5557 = vmatprep.subr.bf16.mxu1 %v7538_v51  ;;  %v7586_v47 = vld [vmem:[%s10665_s1 + $0x62c] ss:$16 sps:$4 sm:$0xff]   ;;  %v7581_v48 = vld [vmem:[%s10665_s1 + $0x5a8] ss:$16 sps:$4 sm:$0xff]  }
 0x1ca   :  { %v7584_v45 = vld [vmem:[%s10665_s1 + $0x628] ss:$16 sps:$4 sm:$0xff]   ;;  %v7589_v51 = vld [vmem:[%s10665_s1 + $0x58c] ss:$16 sps:$4 sm:$0xff]  }
 0x1cb   :  { %5541 = vmatpush2.bf16.msra.mxu0 %v7533_v46  ;;  %v7592_v13 = vld [vmem:[%s10665_s1 + $0x60c] ss:$16 sps:$4 sm:$0xff]   ;;  %v7587_v46 = vld [vmem:[%s10665_s1 + $0x588] ss:$16 sps:$4 sm:$0xff]  }
 0x1cc   :  { %5558 = vmatpush1.bf16.msra.mxu1 %v7536_v55  ;;  %5542 = vmatprep.subr.bf16.mxu0 %v7541_v57  ;;  %v7590_v55 = vld [vmem:[%s10665_s1 + $0x608] ss:$16 sps:$4 sm:$0xff]   ;;  %v7595_v53 = vld [vmem:[%s10665_s1 + $0x56c] ss:$16 sps:$4 sm:$0xff]  }
 0x1cd   :  { %5559 = vmatprep.subr.bf16.mxu1 %v7544_v63  ;;  %v7598_v58 = vld [vmem:[%s10665_s1 + $0x7ec] ss:$16 sps:$4 sm:$0xff]   ;;  %v7593_v62 = vld [vmem:[%s10665_s1 + $0x568] ss:$16 sps:$4 sm:$0xff]  }
 0x1ce   :  { %v7596_v60 = vld [vmem:[%s10665_s1 + $0x7e8] ss:$16 sps:$4 sm:$0xff]   ;;  %v7601_v57 = vld [vmem:[%s10665_s1 + $0x54c] ss:$16 sps:$4 sm:$0xff]  }
 0x1cf   :  { %5543 = vmatpush2.bf16.msra.mxu0 %v7539_v17  ;;  %v7604_v63 = vld [vmem:[%s10665_s1 + $0x7cc] ss:$16 sps:$4 sm:$0xff]   ;;  %v7599_v17 = vld [vmem:[%s10665_s1 + $0x548] ss:$16 sps:$4 sm:$0xff]  }
 0x1d0   :  { %5560 = vmatpush1.bf16.msra.mxu1 %v7542_v2  ;;  %5594 = vmatprep.subr.bf16.mxu0 %v7550_v1  ;;  %v7602_v2 = vld [vmem:[%s10665_s1 + $0x7c8] ss:$16 sps:$4 sm:$0xff]   ;;  %v7610_v1 = vld [vmem:[%s10665_s1 + $0x7ac] ss:$16 sps:$4 sm:$0xff]  }
 0x1d1   :  { %5561 = vmatprep.subr.bf16.mxu1 %v7547_v3  ;;  %v7607_v3 = vld [vmem:[%s10665_s1 + $0x52c] ss:$16 sps:$4 sm:$0xff]  }
 0x1d2   :  { %5545 = vmatmul.mubr.bf16.vlgmr.msra.gmra.mxu0 %v8277_v18  ;;  %v7562_v18 = vld [vmem:[%s10665_s1 + $0x6ac] ss:$16 sps:$4 sm:$0xff]  }
 0x1d3   :  { %5595 = vmatpush1.bf16.msra.mxu0 %v7548_v8  ;;  %5626 = vmatprep.mubr.bf16.mxu0 %v8293_v23  ;;  %v7568_v23 = vld [vmem:[%s10665_s1 + $0x68c] ss:$16 sps:$4 sm:$0xff]   ;;  %v7608_v8 = vld [vmem:[%s10665_s1 + $0x7a8] ss:$16 sps:$4 sm:$0xff]  }
 0x1d4   :  { %5562 = vmatpush1.bf16.msra.mxu1 %v7545_v7  ;;  %5596 = vmatprep.subr.bf16.mxu0 %v7556_v11  ;;  %v7605_v7 = vld [vmem:[%s10665_s1 + $0x528] ss:$16 sps:$4 sm:$0xff]   ;;  %v7616_v11 = vld [vmem:[%s10665_s1 + $0x78c] ss:$16 sps:$4 sm:$0xff]  }
 0x1d5   :  { %5563 = vmatprep.subr.bf16.mxu1 %v7553_v10  ;;  %v7613_v10 = vld [vmem:[%s10665_s1 + $0x50c] ss:$16 sps:$4 sm:$0xff]  }
 0x1d7   :  { %5597 = vmatpush1.bf16.msra.mxu0 %v7554_v19  ;;  %v7614_v19 = vld [vmem:[%s10665_s1 + $0x788] ss:$16 sps:$4 sm:$0xff]  }
 0x1d8   :  { %5564 = vmatpush1.bf16.msra.mxu1 %v7551_v16  ;;  %5598 = vmatprep.subr.bf16.mxu0 %v7562_v18  ;;  %v7611_v16 = vld [vmem:[%s10665_s1 + $0x508] ss:$16 sps:$4 sm:$0xff]   ;;  %v7622_v18 = vld [vmem:[%s10665_s1 + $0x8ec] ss:$16 sps:$4 sm:$0xff]  }
 0x1d9   :  { %5565 = vmatprep.subr.bf16.mxu1 %v7559_v4  ;;  %v7619_v4 = vld [vmem:[%s10665_s1 + $0x76c] ss:$16 sps:$4 sm:$0xff]  }
 0x1db   :  { %5599 = vmatpush1.bf16.msra.mxu0 %v7560_v20  ;;  %v7620_v20 = vld [vmem:[%s10665_s1 + $0x8e8] ss:$16 sps:$4 sm:$0xff]  }
 0x1dc   :  { %5566 = vmatpush1.bf16.msra.mxu1 %v7557_v5  ;;  %5600 = vmatprep.subr.bf16.mxu0 %v7568_v23  ;;  %v7617_v5 = vld [vmem:[%s10665_s1 + $0x768] ss:$16 sps:$4 sm:$0xff]   ;;  %v7628_v23 = vld [vmem:[%s10665_s1 + $0x8cc] ss:$16 sps:$4 sm:$0xff]  }
 0x1dd   :  { %5567 = vmatprep.subr.bf16.mxu1 %v7565_v21  ;;  %v7625_v21 = vld [vmem:[%s10665_s1 + $0x74c] ss:$16 sps:$4 sm:$0xff]  }
 0x1df   :  { %5601 = vmatpush1.bf16.msra.mxu0 %v7566_v0 }
 0x1e0   :  { %5568 = vmatpush1.bf16.msra.mxu1 %v7563_v28  ;;  %5602 = vmatprep.subr.bf16.mxu0 %v7574_v30  ;;  %v7623_v30 = vld [vmem:[%s10665_s1 + $0x748] ss:$16 sps:$4 sm:$0xff]  }
 0x1e1   :  { %5569 = vmatprep.subr.bf16.mxu1 %v7571_v29 }
 0x1e3   :  { %5603 = vmatpush1.bf16.msra.mxu0 %v7572_v36 }
 0x1e4   :  { %5570 = vmatpush2.bf16.msra.mxu1 %v7569_v34  ;;  %5604 = vmatprep.subr.bf16.mxu0 %v7580_v38  ;;  %v7626_v34 = vld [vmem:[%s10665_s1 + $0x8c8] ss:$16 sps:$4 sm:$0xff]  }
 0x1e5   :  { %5571 = vmatprep.subr.bf16.mxu1 %v7577_v37 }
 0x1e7   :  { %5605 = vmatpush1.bf16.msra.mxu0 %v7578_v40 }
 0x1e8   :  { %5572 = vmatpush2.bf16.msra.mxu1 %v7575_v32  ;;  %5606 = vmatprep.subr.bf16.mxu0 %v7586_v47 }
 0x1e9   :  { %5573 = vmatprep.subr.bf16.mxu1 %v7583_v44 }
 0x1eb   :  { %5607 = vmatpush1.bf16.msra.mxu0 %v7584_v45  ;;  %v7632_v45 = vld [vmem:[%s10665_s1 + $0x8a8] ss:$16 sps:$4 sm:$0xff]  }
 0x1ec   :  { %5574 = vmatpush2.bf16.msra.mxu1 %v7581_v48  ;;  %5608 = vmatprep.subr.bf16.mxu0 %v7592_v13  ;;  %v7629_v48 = vld [vmem:[%s10665_s1 + $0x728] ss:$16 sps:$4 sm:$0xff]  }
 0x1ed   :  { %5575 = vmatprep.subr.bf16.mxu1 %v7589_v51 }
 0x1ef   :  { %5609 = vmatpush1.bf16.msra.mxu0 %v7590_v55  ;;  %v7638_v55 = vld [vmem:[%s10665_s1 + $0x888] ss:$16 sps:$4 sm:$0xff]  }
 0x1f0   :  { %5576 = vmatpush2.bf16.msra.mxu1 %v7587_v46  ;;  %5610 = vmatprep.subr.bf16.mxu0 %v7598_v58  ;;  %v7635_v46 = vld [vmem:[%s10665_s1 + $0x708] ss:$16 sps:$4 sm:$0xff]   ;;  %v7646_v58 = vld [vmem:[%s10665_s1 + $0xaec] ss:$16 sps:$4 sm:$0xff]  }
 0x1f1   :  { %5577 = vmatprep.subr.bf16.mxu1 %v7595_v53  ;;  %v7643_v53 = vld [vmem:[%s10665_s1 + $0x86c] ss:$16 sps:$4 sm:$0xff]  }
 0x1f3   :  { %5611 = vmatpush2.bf16.msra.mxu0 %v7596_v60  ;;  %v7644_v60 = vld [vmem:[%s10665_s1 + $0xae8] ss:$16 sps:$4 sm:$0xff]  }
 0x1f4   :  { %5578 = vmatpush2.bf16.msra.mxu1 %v7593_v62  ;;  %5612 = vmatprep.subr.bf16.mxu0 %v7604_v63  ;;  %v7641_v62 = vld [vmem:[%s10665_s1 + $0x868] ss:$16 sps:$4 sm:$0xff]   ;;  %v7652_v63 = vld [vmem:[%s10665_s1 + $0xacc] ss:$16 sps:$4 sm:$0xff]  }
 0x1f5   :  { %5579 = vmatprep.subr.bf16.mxu1 %v7601_v57  ;;  %v7649_v57 = vld [vmem:[%s10665_s1 + $0x84c] ss:$16 sps:$4 sm:$0xff]  }
 0x1f7   :  { %5613 = vmatpush2.bf16.msra.mxu0 %v7602_v2  ;;  %v7650_v2 = vld [vmem:[%s10665_s1 + $0xac8] ss:$16 sps:$4 sm:$0xff]  }
 0x1f8   :  { %5580 = vmatpush2.bf16.msra.mxu1 %v7599_v17  ;;  %5614 = vmatprep.subr.bf16.mxu0 %v7610_v1  ;;  %v7647_v17 = vld [vmem:[%s10665_s1 + $0x848] ss:$16 sps:$4 sm:$0xff]  }
 0x1f9   :  { %5581 = vmatprep.subr.bf16.mxu1 %v7607_v3  ;;  %v7655_v3 = vld [vmem:[%s10665_s1 + $0x82c] ss:$16 sps:$4 sm:$0xff]   ;;  %v7653_v1 = vld [vmem:[%s10665_s1 + $0x828] ss:$16 sps:$4 sm:$0xff]  }
 0x1fb   :  { %5615 = vmatpush2.bf16.msra.mxu0 %v7608_v8  ;;  %v7661_v8 = vld [vmem:[%s10665_s1 + $0x80c] ss:$16 sps:$4 sm:$0xff]  }
 0x1fc   :  { %5582 = vmatpush2.bf16.msra.mxu1 %v7605_v7  ;;  %5616 = vmatprep.subr.bf16.mxu0 %v7616_v11  ;;  %v7656_v7 = vld [vmem:[%s10665_s1 + $0xaa8] ss:$16 sps:$4 sm:$0xff]  }
 0x1fd   :  { %5583 = vmatprep.subr.bf16.mxu1 %v7613_v10  ;;  %v7659_v10 = vld [vmem:[%s10665_s1 + $0x808] ss:$16 sps:$4 sm:$0xff]  }
 0x1fe   :  { %v7662_v11 = vld [vmem:[%s10665_s1 + $0xa88] ss:$16 sps:$4 sm:$0xff]  }
 0x1ff   :  { %5617 = vmatpush2.bf16.msra.mxu0 %v7614_v19  ;;  %v7670_v19 = vld [vmem:[%s10665_s1 + $0xa6c] ss:$16 sps:$4 sm:$0xff]  }
 0x200   :  { %5584 = vmatpush2.bf16.msra.mxu1 %v7611_v16  ;;  %5618 = vmatprep.subr.bf16.mxu0 %v7619_v4  ;;  %v7667_v16 = vld [vmem:[%s10665_s1 + $0x9ec] ss:$16 sps:$4 sm:$0xff]   ;;  %v7665_v4 = vld [vmem:[%s10665_s1 + $0x9e8] ss:$16 sps:$4 sm:$0xff]  }
 0x201   :  { %5635 = vmatprep.subr.bf16.mxu1 %v7622_v18  ;;  %v7668_v18 = vld [vmem:[%s10665_s1 + $0xa68] ss:$16 sps:$4 sm:$0xff]  }
 0x202   :  { %v5300_v28 = vpop.f32.mrf.mxu0 }
 0x203   :  { %v5341_v0 = vpop.f32.mrf.mxu1  ;;  %5586 = vmatmul.mubr.bf16.vlgmr.msra.gmra.mxu1 %v8472_v26  ;;  %v5301_v29 = vadd.f32 %v5300_v28, %v9619_v56  ;;  %5619 = vmatpush2.bf16.msra.mxu0 %v7617_v5  ;;  %v7631_v26 = vld [vmem:[%s10665_s1 + $0x72c] ss:$16 sps:$4 sm:$0xff]  }
 0x204   :  { %5636 = vmatpush1.bf16.msra.mxu1 %v7620_v20  ;;  %v5302_v36 = vpop.f32.mrf.mxu0  ;;  %5620 = vmatprep.subr.bf16.mxu0 %v7625_v21  ;;  %v7634_v56 = vld [vmem:[%s10665_s1 + $0x8ac] ss:$16 sps:$4 sm:$0xff]   ;;  %v7671_v21 = vld [vmem:[%s10665_s1 + $0x9c8] ss:$16 sps:$4 sm:$0xff]  }
 0x205   :  { %v5343_v37 = vpop.f32.mrf.mxu1  ;;  %5637 = vmatprep.subr.bf16.mxu1 %v7628_v23  ;;  %v9821_v38 = vadd.f32 %v5341_v0, %v5301_v29  ;;  %v5303_v32 = vadd.f32 %v5302_v36, %v9629_v61  ;;  %5667 = vmatprep.mubr.bf16.mxu1 %v8525_v41  ;;  %v7637_v41 = vld [vmem:[%s10665_s1 + $0x70c] ss:$16 sps:$4 sm:$0xff]   ;;  %v7674_v23 = vld [vmem:[%s10665_s1 + $0xa48] ss:$16 sps:$4 sm:$0xff]  }
 0x206   :  { %v5304_v40 = vpop.f32.mrf.mxu0  ;;  %v7640_v61 = vld [vmem:[%s10665_s1 + $0x88c] ss:$16 sps:$4 sm:$0xff]   ;;  %v7677_v29 = vld [vmem:[%s10665_s1 + $0x9a8] ss:$16 sps:$4 sm:$0xff]  }
 0x207   :  { %v5345_v44 = vpop.f32.mrf.mxu1  ;;  %v9825_v47 = vadd.f32 %v5343_v37, %v5303_v32  ;;  %5621 = vmatpush2.bf16.msra.mxu0 %v7623_v30  ;;  %v7673_v5 = vld [vmem:[%s10665_s1 + $0x9cc] ss:$16 sps:$4 sm:$0xff]   ;;  %v7680_v30 = vld [vmem:[%s10665_s1 + $0xa28] ss:$16 sps:$4 sm:$0xff]  }
 0x208   :  { %5638 = vmatpush1.bf16.msra.mxu1 %v7626_v34  ;;  %v5305_v51 = vpop.f32.mrf.mxu0  ;;  %5622 = vmatprep.subr.bf16.mxu0 %v7631_v26  ;;  %v7676_v20 = vld [vmem:[%s10665_s1 + $0xa4c] ss:$16 sps:$4 sm:$0xff]   ;;  %v7683_v37 = vld [vmem:[%s10665_s1 + $0x988] ss:$16 sps:$4 sm:$0xff]  }
 0x209   :  { %v5346_v13 = vpop.f32.mrf.mxu1  ;;  %5639 = vmatprep.subr.bf16.mxu1 %v7634_v56  ;;  %v7679_v28 = vld [vmem:[%s10665_s1 + $0x9ac] ss:$16 sps:$4 sm:$0xff]   ;;  %v7686_v26 = vld [vmem:[%s10665_s1 + $0xa08] ss:$16 sps:$4 sm:$0xff]  }
 0x20a   :  { %v7682_v0 = vld [vmem:[%s10665_s1 + $0xa2c] ss:$16 sps:$4 sm:$0xff]   ;;  %v7689_v40 = vld [vmem:[%s10665_s1 + $0x968] ss:$16 sps:$4 sm:$0xff]  }
 0x20b   :  { %5623 = vmatpush2.bf16.msra.mxu0 %v7629_v48  ;;  %v7685_v34 = vld [vmem:[%s10665_s1 + $0x98c] ss:$16 sps:$4 sm:$0xff]   ;;  %v7692_v44 = vld [vmem:[%s10665_s1 + $0xbe8] ss:$16 sps:$4 sm:$0xff]  }
 0x20c   :  { %5640 = vmatpush1.bf16.msra.mxu1 %v7632_v45  ;;  %5624 = vmatprep.subr.bf16.mxu0 %v7637_v41  ;;  %v7688_v36 = vld [vmem:[%s10665_s1 + $0xa0c] ss:$16 sps:$4 sm:$0xff]   ;;  %v7695_v51 = vld [vmem:[%s10665_s1 + $0x948] ss:$16 sps:$4 sm:$0xff]  }
 0x20d   :  { %5641 = vmatprep.subr.bf16.mxu1 %v7640_v61  ;;  %v7691_v56 = vld [vmem:[%s10665_s1 + $0x96c] ss:$16 sps:$4 sm:$0xff]   ;;  %v7698_v13 = vld [vmem:[%s10665_s1 + $0xbc8] ss:$16 sps:$4 sm:$0xff]  }
 0x20e   :  { %v7694_v32 = vld [vmem:[%s10665_s1 + $0xbec] ss:$16 sps:$4 sm:$0xff]  }
 0x20f   :  { %5625 = vmatpush2.bf16.msra.mxu0 %v7635_v46  ;;  %v7697_v48 = vld [vmem:[%s10665_s1 + $0x94c] ss:$16 sps:$4 sm:$0xff]   ;;  %v7701_v46 = vld [vmem:[%s10665_s1 + $0x928] ss:$16 sps:$4 sm:$0xff]  }
 0x210   :  { %5642 = vmatpush1.bf16.msra.mxu1 %v7638_v55  ;;  %5676 = vmatprep.subr.bf16.mxu0 %v7646_v58  ;;  %v7700_v45 = vld [vmem:[%s10665_s1 + $0xbcc] ss:$16 sps:$4 sm:$0xff]   ;;  %v7704_v55 = vld [vmem:[%s10665_s1 + $0xba8] ss:$16 sps:$4 sm:$0xff]  }
 0x211   :  { %5643 = vmatprep.subr.bf16.mxu1 %v7643_v53  ;;  %v7703_v41 = vld [vmem:[%s10665_s1 + $0x92c] ss:$16 sps:$4 sm:$0xff]  }
 0x212   :  { %5627 = vmatmul.mubr.bf16.vlgmr.msra.gmra.mxu0 %v8485_v6  ;;  %v7658_v6 = vld [vmem:[%s10665_s1 + $0xaac] ss:$16 sps:$4 sm:$0xff]  }
 0x213   :  { %5677 = vmatpush1.bf16.msra.mxu0 %v7644_v60  ;;  %5708 = vmatprep.mubr.bf16.mxu0 %v8530_v43  ;;  %v7664_v43 = vld [vmem:[%s10665_s1 + $0xa8c] ss:$16 sps:$4 sm:$0xff]   ;;  %v7710_v60 = vld [vmem:[%s10665_s1 + $0xb88] ss:$16 sps:$4 sm:$0xff]  }
 0x214   :  { %5644 = vmatpush1.bf16.msra.mxu1 %v7641_v62  ;;  %5678 = vmatprep.subr.bf16.mxu0 %v7652_v63  ;;  %v7706_v61 = vld [vmem:[%s10665_s1 + $0xbac] ss:$16 sps:$4 sm:$0xff]   ;;  %v7707_v62 = vld [vmem:[%s10665_s1 + $0x908] ss:$16 sps:$4 sm:$0xff]  }
 0x215   :  { %5645 = vmatprep.subr.bf16.mxu1 %v7649_v57  ;;  %v7709_v53 = vld [vmem:[%s10665_s1 + $0x90c] ss:$16 sps:$4 sm:$0xff]  }
 0x216   :  { %v7712_v58 = vld [vmem:[%s10665_s1 + $0xb8c] ss:$16 sps:$4 sm:$0xff]  }
 0x217   :  { %5679 = vmatpush1.bf16.msra.mxu0 %v7650_v2  ;;  %v7715_v57 = vld [vmem:[%s10665_s1 + $0xb6c] ss:$16 sps:$4 sm:$0xff]   ;;  %v7716_v2 = vld [vmem:[%s10665_s1 + $0xce8] ss:$16 sps:$4 sm:$0xff]  }
 0x218   :  { %5646 = vmatpush1.bf16.msra.mxu1 %v7647_v17  ;;  %5680 = vmatprep.subr.bf16.mxu0 %v7658_v6  ;;  %v7718_v63 = vld [vmem:[%s10665_s1 + $0xcec] ss:$16 sps:$4 sm:$0xff]   ;;  %v7713_v17 = vld [vmem:[%s10665_s1 + $0xb68] ss:$16 sps:$4 sm:$0xff]  }
 0x219   :  { %5647 = vmatprep.subr.bf16.mxu1 %v7655_v3  ;;  %v7721_v3 = vld [vmem:[%s10665_s1 + $0xb4c] ss:$16 sps:$4 sm:$0xff]  }
 0x21a   :  { %v7724_v6 = vld [vmem:[%s10665_s1 + $0xccc] ss:$16 sps:$4 sm:$0xff]  }
 0x21b   :  { %5681 = vmatpush1.bf16.msra.mxu0 %v7656_v7 }
 0x21c   :  { %5648 = vmatpush1.bf16.msra.mxu1 %v7653_v1  ;;  %5682 = vmatprep.subr.bf16.mxu0 %v7664_v43  ;;  %v7719_v43 = vld [vmem:[%s10665_s1 + $0xb48] ss:$16 sps:$4 sm:$0xff]  }
 0x21d   :  { %5649 = vmatprep.subr.bf16.mxu1 %v7661_v8 }
 0x21f   :  { %5683 = vmatpush1.bf16.msra.mxu0 %v7662_v11 }
 0x220   :  { %5650 = vmatpush1.bf16.msra.mxu1 %v7659_v10  ;;  %5684 = vmatprep.subr.bf16.mxu0 %v7670_v19  ;;  %v7722_v10 = vld [vmem:[%s10665_s1 + $0xcc8] ss:$16 sps:$4 sm:$0xff]  }
 0x221   :  { %5651 = vmatprep.subr.bf16.mxu1 %v7667_v16 }
 0x223   :  { %5685 = vmatpush1.bf16.msra.mxu0 %v7668_v18 }
 0x224   :  { %5652 = vmatpush2.bf16.msra.mxu1 %v7665_v4  ;;  %5686 = vmatprep.subr.bf16.mxu0 %v7676_v20 }
 0x225   :  { %5653 = vmatprep.subr.bf16.mxu1 %v7673_v5 }
 0x227   :  { %5687 = vmatpush1.bf16.msra.mxu0 %v7674_v23  ;;  %v7728_v23 = vld [vmem:[%s10665_s1 + $0xca8] ss:$16 sps:$4 sm:$0xff]  }
 0x228   :  { %5654 = vmatpush2.bf16.msra.mxu1 %v7671_v21  ;;  %5688 = vmatprep.subr.bf16.mxu0 %v7682_v0  ;;  %v7725_v21 = vld [vmem:[%s10665_s1 + $0xb28] ss:$16 sps:$4 sm:$0xff]  }
 0x229   :  { %5655 = vmatprep.subr.bf16.mxu1 %v7679_v28 }
 0x22b   :  { %5689 = vmatpush1.bf16.msra.mxu0 %v7680_v30  ;;  %v7734_v30 = vld [vmem:[%s10665_s1 + $0xc88] ss:$16 sps:$4 sm:$0xff]  }
 0x22c   :  { %5656 = vmatpush2.bf16.msra.mxu1 %v7677_v29  ;;  %5690 = vmatprep.subr.bf16.mxu0 %v7688_v36  ;;  %v7731_v29 = vld [vmem:[%s10665_s1 + $0xb08] ss:$16 sps:$4 sm:$0xff]   ;;  %v7742_v36 = vld [vmem:[%s10665_s1 + $0xeec] ss:$16 sps:$4 sm:$0xff]  }
 0x22d   :  { %5657 = vmatprep.subr.bf16.mxu1 %v7685_v34  ;;  %v7739_v34 = vld [vmem:[%s10665_s1 + $0xc6c] ss:$16 sps:$4 sm:$0xff]  }
 0x22f   :  { %5691 = vmatpush1.bf16.msra.mxu0 %v7686_v26  ;;  %v7740_v26 = vld [vmem:[%s10665_s1 + $0xee8] ss:$16 sps:$4 sm:$0xff]  }
 0x230   :  { %5658 = vmatpush2.bf16.msra.mxu1 %v7683_v37  ;;  %5692 = vmatprep.subr.bf16.mxu0 %v7694_v32  ;;  %v7737_v37 = vld [vmem:[%s10665_s1 + $0xc68] ss:$16 sps:$4 sm:$0xff]   ;;  %v7748_v32 = vld [vmem:[%s10665_s1 + $0xecc] ss:$16 sps:$4 sm:$0xff]  }
 0x231   :  { %5659 = vmatprep.subr.bf16.mxu1 %v7691_v56  ;;  %v7745_v56 = vld [vmem:[%s10665_s1 + $0xc4c] ss:$16 sps:$4 sm:$0xff]  }
 0x233   :  { %5693 = vmatpush2.bf16.msra.mxu0 %v7692_v44 }
 0x234   :  { %5660 = vmatpush2.bf16.msra.mxu1 %v7689_v40  ;;  %5694 = vmatprep.subr.bf16.mxu0 %v7700_v45  ;;  %v7746_v45 = vld [vmem:[%s10665_s1 + $0xec8] ss:$16 sps:$4 sm:$0xff]  }
 0x235   :  { %5661 = vmatprep.subr.bf16.mxu1 %v7697_v48  ;;  %v7743_v48 = vld [vmem:[%s10665_s1 + $0xc48] ss:$16 sps:$4 sm:$0xff]  }
 0x237   :  { %5695 = vmatpush2.bf16.msra.mxu0 %v7698_v13  ;;  %v7751_v13 = vld [vmem:[%s10665_s1 + $0xc2c] ss:$16 sps:$4 sm:$0xff]  }
 0x238   :  { %5662 = vmatpush2.bf16.msra.mxu1 %v7695_v51  ;;  %5696 = vmatprep.subr.bf16.mxu0 %v7706_v61 }
 0x239   :  { %5663 = vmatprep.subr.bf16.mxu1 %v7703_v41 }
 0x23b   :  { %5697 = vmatpush2.bf16.msra.mxu0 %v7704_v55  ;;  %v7749_v55 = vld [vmem:[%s10665_s1 + $0xc28] ss:$16 sps:$4 sm:$0xff]  }
 0x23c   :  { %5664 = vmatpush2.bf16.msra.mxu1 %v7701_v46  ;;  %5698 = vmatprep.subr.bf16.mxu0 %v7712_v58  ;;  %v7752_v58 = vld [vmem:[%s10665_s1 + $0xea8] ss:$16 sps:$4 sm:$0xff]  }
 0x23d   :  { %5665 = vmatprep.subr.bf16.mxu1 %v7709_v53 }
 0x23f   :  { %5699 = vmatpush2.bf16.msra.mxu0 %v7710_v60  ;;  %v7760_v60 = vld [vmem:[%s10665_s1 + $0xe8c] ss:$16 sps:$4 sm:$0xff]  }
 0x240   :  { %5666 = vmatpush2.bf16.msra.mxu1 %v7707_v62  ;;  %5700 = vmatprep.subr.bf16.mxu0 %v7715_v57 }
 0x241   :  { %5717 = vmatprep.subr.bf16.mxu1 %v7718_v63 }
 0x242   :  { %v5382_v1 = vpop.f32.mrf.mxu0 }
 0x243   :  { %v5423_v7 = vpop.f32.mrf.mxu1  ;;  %5668 = vmatmul.mubr.bf16.vlgmr.msra.gmra.mxu1 %v8701_v50  ;;  %v5383_v8 = vadd.f32 %v5382_v1, %v9821_v38  ;;  %5701 = vmatpush2.bf16.msra.mxu0 %v7713_v17  ;;  %v7727_v50 = vld [vmem:[%s10665_s1 + $0xb2c] ss:$16 sps:$4 sm:$0xff]  }
 0x244   :  { %5718 = vmatpush1.bf16.msra.mxu1 %v7716_v2  ;;  %v5384_v11 = vpop.f32.mrf.mxu0  ;;  %5702 = vmatprep.subr.bf16.mxu0 %v7721_v3  ;;  %v7730_v38 = vld [vmem:[%s10665_s1 + $0xcac] ss:$16 sps:$4 sm:$0xff]   ;;  %v7755_v2 = vld [vmem:[%s10665_s1 + $0xc08] ss:$16 sps:$4 sm:$0xff]  }
 0x245   :  { %v5425_v16 = vpop.f32.mrf.mxu1  ;;  %5719 = vmatprep.subr.bf16.mxu1 %v7724_v6  ;;  %v5424_v19 = vadd.f32 %v5423_v7, %v5383_v8  ;;  %v5385_v4 = vadd.f32 %v5384_v11, %v9825_v47  ;;  %5749 = vmatprep.mubr.bf16.mxu1 %v8713_v54  ;;  %v7733_v54 = vld [vmem:[%s10665_s1 + $0xb0c] ss:$16 sps:$4 sm:$0xff]   ;;  %v7758_v3 = vld [vmem:[%s10665_s1 + $0xe88] ss:$16 sps:$4 sm:$0xff]  }
 0x246   :  { %v5386_v18 = vpop.f32.mrf.mxu0  ;;  %v7736_v47 = vld [vmem:[%s10665_s1 + $0xc8c] ss:$16 sps:$4 sm:$0xff]   ;;  %v7761_v7 = vld [vmem:[%s10665_s1 + $0xde8] ss:$16 sps:$4 sm:$0xff]  }
 0x247   :  { %v5427_v5 = vpop.f32.mrf.mxu1  ;;  %v5426_v20 = vadd.f32 %v5425_v16, %v5385_v4  ;;  %5703 = vmatpush2.bf16.msra.mxu0 %v7719_v43  ;;  %v7763_v6 = vld [vmem:[%s10665_s1 + $0xdec] ss:$16 sps:$4 sm:$0xff]   ;;  %v7764_v8 = vld [vmem:[%s10665_s1 + $0xe68] ss:$16 sps:$4 sm:$0xff]  }
 0x248   :  { %5720 = vmatpush1.bf16.msra.mxu1 %v7722_v10  ;;  %v5387_v28 = vpop.f32.mrf.mxu0  ;;  %5704 = vmatprep.subr.bf16.mxu0 %v7727_v50  ;;  %v7766_v1 = vld [vmem:[%s10665_s1 + $0xe6c] ss:$16 sps:$4 sm:$0xff]   ;;  %v7767_v11 = vld [vmem:[%s10665_s1 + $0xdc8] ss:$16 sps:$4 sm:$0xff]  }
 0x249   :  { %v5428_v0 = vpop.f32.mrf.mxu1  ;;  %5721 = vmatprep.subr.bf16.mxu1 %v7730_v38  ;;  %v7769_v43 = vld [vmem:[%s10665_s1 + $0xdcc] ss:$16 sps:$4 sm:$0xff]   ;;  %v7770_v16 = vld [vmem:[%s10665_s1 + $0xe48] ss:$16 sps:$4 sm:$0xff]  }
 0x24a   :  { %v7772_v10 = vld [vmem:[%s10665_s1 + $0xe4c] ss:$16 sps:$4 sm:$0xff]   ;;  %v7776_v4 = vld [vmem:[%s10665_s1 + $0xe28] ss:$16 sps:$4 sm:$0xff]  }
 0x24b   :  { %5705 = vmatpush2.bf16.msra.mxu0 %v7725_v21  ;;  %v7775_v50 = vld [vmem:[%s10665_s1 + $0xdac] ss:$16 sps:$4 sm:$0xff]   ;;  %v7782_v21 = vld [vmem:[%s10665_s1 + $0xe08] ss:$16 sps:$4 sm:$0xff]  }
 0x24c   :  { %5722 = vmatpush1.bf16.msra.mxu1 %v7728_v23  ;;  %5706 = vmatprep.subr.bf16.mxu0 %v7733_v54  ;;  %v7778_v38 = vld [vmem:[%s10665_s1 + $0xe2c] ss:$16 sps:$4 sm:$0xff]   ;;  %v7785_v0 = vld [vmem:[%s10665_s1 + $0xd68] ss:$16 sps:$4 sm:$0xff]  }
 0x24d   :  { %5723 = vmatprep.subr.bf16.mxu1 %v7736_v47  ;;  %v7781_v18 = vld [vmem:[%s10665_s1 + $0xd8c] ss:$16 sps:$4 sm:$0xff]   ;;  %v7788_v54 = vld [vmem:[%s10665_s1 + $0xfe8] ss:$16 sps:$4 sm:$0xff]  }
 0x24e   :  { %v7784_v5 = vld [vmem:[%s10665_s1 + $0xe0c] ss:$16 sps:$4 sm:$0xff]  }
 0x24f   :  { %5707 = vmatpush2.bf16.msra.mxu0 %v7731_v29  ;;  %v7787_v23 = vld [vmem:[%s10665_s1 + $0xd6c] ss:$16 sps:$4 sm:$0xff]  }
 0x250   :  { %5724 = vmatpush1.bf16.msra.mxu1 %v7734_v30  ;;  %5758 = vmatprep.subr.bf16.mxu0 %v7742_v36  ;;  %v7790_v28 = vld [vmem:[%s10665_s1 + $0xfec] ss:$16 sps:$4 sm:$0xff]   ;;  %v7791_v30 = vld [vmem:[%s10665_s1 + $0xd48] ss:$16 sps:$4 sm:$0xff]  }
 0x251   :  { %5725 = vmatprep.subr.bf16.mxu1 %v7739_v34  ;;  %v7793_v47 = vld [vmem:[%s10665_s1 + $0xd4c] ss:$16 sps:$4 sm:$0xff]   ;;  %v7794_v34 = vld [vmem:[%s10665_s1 + $0xfc8] ss:$16 sps:$4 sm:$0xff]  }
 0x252   :  { %v5464_v40 = vpop.f32.mrf.mxu0  ;;  %5709 = vmatmul.mubr.bf16.vlgmr.msra.gmra.mxu0 %v8717_v35  ;;  %v7754_v35 = vld [vmem:[%s10665_s1 + $0xeac] ss:$16 sps:$4 sm:$0xff]  }
 0x253   :  { %v5465_v44 = vadd.f32 %v5464_v40, %v5424_v19  ;;  %5759 = vmatpush1.bf16.msra.mxu0 %v7740_v26  ;;  %5790 = vmatprep.mubr.bf16.mxu0 %v8733_v59  ;;  %v7757_v59 = vld [vmem:[%s10665_s1 + $0xc0c] ss:$16 sps:$4 sm:$0xff]   ;;  %v7773_v19 = vld [vmem:[%s10665_s1 + $0xda8] ss:$16 sps:$4 sm:$0xff]  }
 0x254   :  { %5726 = vmatpush1.bf16.msra.mxu1 %v7737_v37  ;;  %v5466_v51 = vpop.f32.mrf.mxu0  ;;  %5760 = vmatprep.subr.bf16.mxu0 %v7748_v32  ;;  %v7796_v29 = vld [vmem:[%s10665_s1 + $0xfcc] ss:$16 sps:$4 sm:$0xff]   ;;  %v7797_v26 = vld [vmem:[%s10665_s1 + $0xd28] ss:$16 sps:$4 sm:$0xff]  }
 0x255   :  { %5727 = vmatprep.subr.bf16.mxu1 %v7745_v56  ;;  %v6008_v41 = vmul.f32 0.01, %v5465_v44  ;;  %v5467_v61 = vadd.f32 %v5466_v51, %v5426_v20  ;;  %vm6004_vm1 = vcmp.ge.f32.partialorder %v5465_v44, 0.0  ;;  %v7779_v20 = vld [vmem:[%s10665_s1 + $0xd88] ss:$16 sps:$4 sm:$0xff]  }
 0x256   :  { %v5468_v46 = vpop.f32.mrf.mxu0  ;;  %v7799_v36 = vld [vmem:[%s10665_s1 + $0xd2c] ss:$16 sps:$4 sm:$0xff]   ;;  %v7800_v56 = vld [vmem:[%s10665_s1 + $0xfa8] ss:$16 sps:$4 sm:$0xff]  }
 0x257   :  { %vm6005_vm2 = vcmp.ge.f32.partialorder %v5467_v61, 0.0  ;;  %v6009_v53 = vmul.f32 0.01, %v5467_v61  ;;  %5761 = vmatpush1.bf16.msra.mxu0 %v7746_v45  ;;  %v10087_v57 = vsel %vm6004_vm1, %v5465_v44, %v6008_v41  ;;  %v7802_v37 = vld [vmem:[%s10665_s1 + $0xfac] ss:$16 sps:$4 sm:$0xff]  }
 0x258   :  { %5728 = vmatpush1.bf16.msra.mxu1 %v7743_v48  ;;  %v5469_v62 = vpop.f32.mrf.mxu0  ;;  %5762 = vmatprep.subr.bf16.mxu0 %v7754_v35  ;;  %v7805_v32 = vld [vmem:[%s10665_s1 + $0xd0c] ss:$16 sps:$4 sm:$0xff]   ;;  %v7803_v44 = vld [vmem:[%s10665_s1 + $0xd08] ss:$16 sps:$4 sm:$0xff]  }
 0x259   :  { %5729 = vmatprep.subr.bf16.mxu1 %v7751_v13  ;;  %v10089_v63 = vsel %vm6005_vm2, %v5467_v61, %v6009_v53  ;;  %v7808_v40 = vld [vmem:[%s10665_s1 + $0xf8c] ss:$16 sps:$4 sm:$0xff]   ;;  %v7806_v48 = vld [vmem:[%s10665_s1 + $0xf88] ss:$16 sps:$4 sm:$0xff]  }
 0x25a   :  { %v6841_v17 = vpack.c.bf16 %v10089_v63, %v10087_v57  ;;  %v7811_v45 = vld [vmem:[%s10665_s1 + $0xf6c] ss:$16 sps:$4 sm:$0xff]   ;;  %v7809_v13 = vld [vmem:[%s10665_s1 + $0xf68] ss:$16 sps:$4 sm:$0xff]  }
 0x25b   :  { %5763 = vmatpush1.bf16.msra.mxu0 %v7752_v58  ;;  %v7814_v51 = vld [vmem:[%s10665_s1 + $0x10ec] ss:$16 sps:$4 sm:$0xff]   ;;  %v7812_v35 = vld [vmem:[%s10665_s1 + $0x10e8] ss:$16 sps:$4 sm:$0xff]  }
 0x25c   :  { %5730 = vmatpush1.bf16.msra.mxu1 %v7749_v55  ;;  %5764 = vmatprep.subr.bf16.mxu0 %v7760_v60  ;;  %v7817_v41 = vld [vmem:[%s10665_s1 + $0xf4c] ss:$16 sps:$4 sm:$0xff]   ;;  %v7815_v55 = vld [vmem:[%s10665_s1 + $0xf48] ss:$16 sps:$4 sm:$0xff]  }
 0x25d   :  { %5731 = vmatprep.subr.bf16.mxu1 %v7757_v59  ;;  %v7820_v61 = vld [vmem:[%s10665_s1 + $0x10cc] ss:$16 sps:$4 sm:$0xff]   ;;  %v7818_v53 = vld [vmem:[%s10665_s1 + $0x10c8] ss:$16 sps:$4 sm:$0xff]  }
 0x25e   :  { %v7823_v62 = vld [vmem:[%s10665_s1 + $0xf2c] ss:$16 sps:$4 sm:$0xff]   ;;  %v7821_v60 = vld [vmem:[%s10665_s1 + $0xf28] ss:$16 sps:$4 sm:$0xff]  }
 0x25f   :  { %5765 = vmatpush1.bf16.msra.mxu0 %v7758_v3 }
 0x260   :  { %5732 = vmatpush1.bf16.msra.mxu1 %v7755_v2  ;;  %5766 = vmatprep.subr.bf16.mxu0 %v7766_v1  ;;  %v7824_v2 = vld [vmem:[%s10665_s1 + $0x10a8] ss:$16 sps:$4 sm:$0xff]   ;;  %v815_v1 = vsub.s32 2, %v8165_v42 }
 0x261   :  { %5733 = vmatprep.subr.bf16.mxu1 %v7763_v6  ;;  %v7829_v6 = vld [vmem:[%s10665_s1 + $0xf0c] ss:$16 sps:$4 sm:$0xff]  }
 0x263   :  { %5767 = vmatpush1.bf16.msra.mxu0 %v7764_v8  ;;  %v7827_v8 = vld [vmem:[%s10665_s1 + $0xf08] ss:$16 sps:$4 sm:$0xff]  }
 0x264   :  { %5734 = vmatpush2.bf16.msra.mxu1 %v7761_v7  ;;  %5768 = vmatprep.subr.bf16.mxu0 %v7772_v10  ;;  %v819_v7 = vsub.s32 3, %v8165_v42  ;;  %v7835_v10 = vld [vmem:[%s10665_s1 + $0x106c] ss:$16 sps:$4 sm:$0xff]  }
 0x265   :  { %5735 = vmatprep.subr.bf16.mxu1 %v7769_v43  ;;  %v7830_v43 = vld [vmem:[%s10665_s1 + $0x1088] ss:$16 sps:$4 sm:$0xff]   ;;  %v7838_v42 = vld [vmem:[%s10665_s1 + $0x12ec] ss:$16 sps:$4 sm:$0xff]  }
 0x267   :  { %5769 = vmatpush1.bf16.msra.mxu0 %v7770_v16 }
 0x268   :  { %5736 = vmatpush2.bf16.msra.mxu1 %v7767_v11  ;;  %5770 = vmatprep.subr.bf16.mxu0 %v7778_v38  ;;  %v8025_v11 = vld [vmem:[%s10667_s2] sm:$0xf]  ;;  %v7833_v38 = vld [vmem:[%s10665_s1 + $0x1068] ss:$16 sps:$4 sm:$0xff]  }
 0x269   :  { %5737 = vmatprep.subr.bf16.mxu1 %v7775_v50  ;;  %v816_v16 = vrot.slane %v8025_v11, %v815_v1  ;;  %v820_v50 = vrot.slane %v8025_v11, %v819_v7  ;;  %v7892_v1 = vld [vmem:[%s10665_s1 + $0x13cc] ss:$16 sps:$4 sm:$0xff]   ;;  %v7887_v7 = vld [vmem:[%s10665_s1 + $0x1148] ss:$16 sps:$4 sm:$0xff]  }
 0x26a   :  { %v7896_v11 = vld [vmem:[%s10665_s1 + $0x13a8] ss:$16 sps:$4 sm:$0xff]  }
 0x26b   :  { %5771 = vmatpush1.bf16.msra.mxu0 %v7776_v4  ;;  %v7841_v4 = vld [vmem:[%s10665_s1 + $0x104c] ss:$16 sps:$4 sm:$0xff]  }
 0x26c   :  { %5738 = vmatpush2.bf16.msra.mxu1 %v7773_v19  ;;  %5772 = vmatprep.subr.bf16.mxu0 %v7784_v5  ;;  %v7836_v19 = vld [vmem:[%s10665_s1 + $0x12e8] ss:$16 sps:$4 sm:$0xff]  }
 0x26d   :  { %5739 = vmatprep.subr.bf16.mxu1 %v7781_v18  ;;  %v7844_v18 = vld [vmem:[%s10665_s1 + $0x12cc] ss:$16 sps:$4 sm:$0xff]  }
 0x26f   :  { %5773 = vmatpush1.bf16.msra.mxu0 %v7782_v21 }
 0x270   :  { %5740 = vmatpush2.bf16.msra.mxu1 %v7779_v20  ;;  %5774 = vmatprep.subr.bf16.mxu0 %v7790_v28  ;;  %v7839_v28 = vld [vmem:[%s10665_s1 + $0x1048] ss:$16 sps:$4 sm:$0xff]  }
 0x271   :  { %5741 = vmatprep.subr.bf16.mxu1 %v7787_v23 }
 0x273   :  { %5775 = vmatpush2.bf16.msra.mxu0 %v7788_v54 }
 0x274   :  { %5742 = vmatpush2.bf16.msra.mxu1 %v7785_v0  ;;  %5776 = vmatprep.subr.bf16.mxu0 %v7796_v29  ;;  %v7842_v0 = vld [vmem:[%s10665_s1 + $0x12c8] ss:$16 sps:$4 sm:$0xff]  }
 0x275   :  { %5743 = vmatprep.subr.bf16.mxu1 %v7793_v47  ;;  %v7850_v47 = vld [vmem:[%s10665_s1 + $0x12ac] ss:$16 sps:$4 sm:$0xff]  }
 0x277   :  { %5777 = vmatpush2.bf16.msra.mxu0 %v7794_v34  ;;  %v7845_v34 = vld [vmem:[%s10665_s1 + $0x1028] ss:$16 sps:$4 sm:$0xff]  }
 0x278   :  { %5744 = vmatpush2.bf16.msra.mxu1 %v7791_v30  ;;  %5778 = vmatprep.subr.bf16.mxu0 %v7802_v37 }
 0x279   :  { %5745 = vmatprep.subr.bf16.mxu1 %v7799_v36  ;;  %v7848_v36 = vld [vmem:[%s10665_s1 + $0x12a8] ss:$16 sps:$4 sm:$0xff]  }
 0x27b   :  { %5779 = vmatpush2.bf16.msra.mxu0 %v7800_v56  ;;  %v7851_v56 = vld [vmem:[%s10665_s1 + $0x1008] ss:$16 sps:$4 sm:$0xff]  }
 0x27c   :  { %5746 = vmatpush2.bf16.msra.mxu1 %v7797_v26  ;;  %5780 = vmatprep.subr.bf16.mxu0 %v7808_v40  ;;  %v7853_v26 = vld [vmem:[%s10665_s1 + $0x100c] ss:$16 sps:$4 sm:$0xff]  }
 0x27d   :  { %5747 = vmatprep.subr.bf16.mxu1 %v7805_v32  ;;  %v7854_v32 = vld [vmem:[%s10665_s1 + $0x1288] ss:$16 sps:$4 sm:$0xff]   ;;  %v7859_v40 = vld [vmem:[%s10665_s1 + $0x11ec] ss:$16 sps:$4 sm:$0xff]  }
 0x27f   :  { %5781 = vmatpush2.bf16.msra.mxu0 %v7806_v48  ;;  %v7857_v48 = vld [vmem:[%s10665_s1 + $0x11e8] ss:$16 sps:$4 sm:$0xff]  }
 0x280   :  { %5748 = vmatpush2.bf16.msra.mxu1 %v7803_v44  ;;  %5782 = vmatprep.subr.bf16.mxu0 %v7811_v45  ;;  %v7862_v44 = vld [vmem:[%s10665_s1 + $0x126c] ss:$16 sps:$4 sm:$0xff]   ;;  %v7860_v45 = vld [vmem:[%s10665_s1 + $0x1268] ss:$16 sps:$4 sm:$0xff]  }
 0x281   :  { %5799 = vmatprep.subr.bf16.mxu1 %v7814_v51  ;;  %v7865_v51 = vld [vmem:[%s10665_s1 + $0x11cc] ss:$16 sps:$4 sm:$0xff]  }
 0x283   :  { %v5505_v46 = vpop.f32.mrf.mxu1  ;;  %5750 = vmatmul.mubr.bf16.vlgmr.msra.gmra.mxu1 %v8929_v15  ;;  %5783 = vmatpush2.bf16.msra.mxu0 %v7809_v13  ;;  %v7826_v15 = vld [vmem:[%s10665_s1 + $0x10ac] ss:$16 sps:$4 sm:$0xff]  }
 0x284   :  { %5800 = vmatpush1.bf16.msra.mxu1 %v7812_v35  ;;  %5784 = vmatprep.subr.bf16.mxu0 %v7817_v41  ;;  %v5506_v5 = vadd.f32 %v5505_v46, %v816_v16  ;;  %v7868_v13 = vld [vmem:[%s10665_s1 + $0x124c] ss:$16 sps:$4 sm:$0xff]   ;;  %v7863_v35 = vld [vmem:[%s10665_s1 + $0x11c8] ss:$16 sps:$4 sm:$0xff]  }
 0x285   :  { %v5507_v58 = vpop.f32.mrf.mxu1  ;;  %5801 = vmatprep.subr.bf16.mxu1 %v7820_v61  ;;  %5831 = vmatprep.mubr.bf16.mxu1 %v8940_v22  ;;  %v7832_v22 = vld [vmem:[%s10665_s1 + $0x108c] ss:$16 sps:$4 sm:$0xff]   ;;  %v7866_v41 = vld [vmem:[%s10665_s1 + $0x1248] ss:$16 sps:$4 sm:$0xff]  }
 0x286   :  { %v5508_v21 = vadd.f32 %v5507_v58, %v820_v50  ;;  %v7871_v61 = vld [vmem:[%s10665_s1 + $0x11ac] ss:$16 sps:$4 sm:$0xff]  }
 0x287   :  { %v5509_v59 = vpop.f32.mrf.mxu1  ;;  %5785 = vmatpush2.bf16.msra.mxu0 %v7815_v55  ;;  %v7874_v46 = vld [vmem:[%s10665_s1 + $0x122c] ss:$16 sps:$4 sm:$0xff]   ;;  %v7869_v55 = vld [vmem:[%s10665_s1 + $0x11a8] ss:$16 sps:$4 sm:$0xff]  }
 0x288   :  { %5802 = vmatpush1.bf16.msra.mxu1 %v7818_v53  ;;  %5786 = vmatprep.subr.bf16.mxu0 %v7823_v62  ;;  %v7872_v53 = vld [vmem:[%s10665_s1 + $0x1228] ss:$16 sps:$4 sm:$0xff]   ;;  %v7877_v58 = vld [vmem:[%s10665_s1 + $0x118c] ss:$16 sps:$4 sm:$0xff]  }
 0x289   :  { %v5510_v3 = vpop.f32.mrf.mxu1  ;;  %5803 = vmatprep.subr.bf16.mxu1 %v7826_v15  ;;  %v7880_v62 = vld [vmem:[%s10665_s1 + $0x120c] ss:$16 sps:$4 sm:$0xff]   ;;  %v7875_v15 = vld [vmem:[%s10665_s1 + $0x1188] ss:$16 sps:$4 sm:$0xff]  }
 0x28a   :  { %v7878_v59 = vld [vmem:[%s10665_s1 + $0x1208] ss:$16 sps:$4 sm:$0xff]   ;;  %v7901_v16 = vld [vmem:[%s10665_s1 + $0x110c] ss:$16 sps:$4 sm:$0xff]  }
 0x28b   :  { %5787 = vmatpush2.bf16.msra.mxu0 %v7821_v60  ;;  %v7883_v60 = vld [vmem:[%s10665_s1 + $0x116c] ss:$16 sps:$4 sm:$0xff]   ;;  %v7881_v3 = vld [vmem:[%s10665_s1 + $0x1168] ss:$16 sps:$4 sm:$0xff]  }
 0x28c   :  { %5804 = vmatpush1.bf16.msra.mxu1 %v7824_v2  ;;  %5788 = vmatprep.subr.bf16.mxu0 %v7829_v6  ;;  %v7886_v2 = vld [vmem:[%s10665_s1 + $0x13ec] ss:$16 sps:$4 sm:$0xff]   ;;  %v7884_v6 = vld [vmem:[%s10665_s1 + $0x13e8] ss:$16 sps:$4 sm:$0xff]  }
 0x28d   :  { %5805 = vmatprep.subr.bf16.mxu1 %v7832_v22  ;;  %v7889_v22 = vld [vmem:[%s10665_s1 + $0x114c] ss:$16 sps:$4 sm:$0xff]  }
 0x28e   :  { %v7904_v50 = vld [vmem:[%s10665_s1 + $0x138c] ss:$16 sps:$4 sm:$0xff]  }
 0x28f   :  { %5789 = vmatpush2.bf16.msra.mxu0 %v7827_v8  ;;  %v7890_v8 = vld [vmem:[%s10665_s1 + $0x13c8] ss:$16 sps:$4 sm:$0xff]  }
 0x290   :  { %5806 = vmatpush1.bf16.msra.mxu1 %v7830_v43  ;;  %5840 = vmatprep.subr.bf16.mxu0 %v7838_v42  ;;  %v7895_v43 = vld [vmem:[%s10665_s1 + $0x112c] ss:$16 sps:$4 sm:$0xff]   ;;  %v7893_v42 = vld [vmem:[%s10665_s1 + $0x1128] ss:$16 sps:$4 sm:$0xff]  }
 0x291   :  { %5807 = vmatprep.subr.bf16.mxu1 %v7835_v10  ;;  %v7898_v10 = vld [vmem:[%s10665_s1 + $0x13ac] ss:$16 sps:$4 sm:$0xff]  }
 0x292   :  { %v5546_v20 = vpop.f32.mrf.mxu0  ;;  %5791 = vmatmul.mubr.bf16.vlgmr.msra.gmra.mxu0 %v8944_v39  ;;  %v7847_v39 = vld [vmem:[%s10665_s1 + $0x102c] ss:$16 sps:$4 sm:$0xff]  }
 0x293   :  { %v10269_v23 = vadd.f32 %v5546_v20, %v5506_v5  ;;  %5841 = vmatpush1.bf16.msra.mxu0 %v7836_v19  ;;  %5872 = vmatprep.mubr.bf16.mxu0 %v8960_v31  ;;  %v7856_v31 = vld [vmem:[%s10665_s1 + $0x128c] ss:$16 sps:$4 sm:$0xff]   ;;  %v7902_v19 = vld [vmem:[%s10665_s1 + $0x1388] ss:$16 sps:$4 sm:$0xff]  }
 0x294   :  { %5808 = vmatpush1.bf16.msra.mxu1 %v7833_v38  ;;  %v5548_v54 = vpop.f32.mrf.mxu0  ;;  %5842 = vmatprep.subr.bf16.mxu0 %v7844_v18  ;;  %v7899_v38 = vld [vmem:[%s10665_s1 + $0x1108] ss:$16 sps:$4 sm:$0xff]   ;;  %v7910_v18 = vld [vmem:[%s10665_s1 + $0x14ec] ss:$16 sps:$4 sm:$0xff]  }
 0x295   :  { %5809 = vmatprep.subr.bf16.mxu1 %v7841_v4  ;;  %v10283_v29 = vadd.f32 %v5548_v54, %v5508_v21  ;;  %v7907_v4 = vld [vmem:[%s10665_s1 + $0x136c] ss:$16 sps:$4 sm:$0xff]   ;;  %v7905_v5 = vld [vmem:[%s10665_s1 + $0x1368] ss:$16 sps:$4 sm:$0xff]  }
 0x296   :  { %v5550_v30 = vpop.f32.mrf.mxu0  ;;  %v7908_v20 = vld [vmem:[%s10665_s1 + $0x14e8] ss:$16 sps:$4 sm:$0xff]   ;;  %v7913_v21 = vld [vmem:[%s10665_s1 + $0x134c] ss:$16 sps:$4 sm:$0xff]  }
 0x297   :  { %5843 = vmatpush1.bf16.msra.mxu0 %v7842_v0 }
 0x298   :  { %5810 = vmatpush1.bf16.msra.mxu1 %v7839_v28  ;;  %v5551_v37 = vpop.f32.mrf.mxu0  ;;  %5844 = vmatprep.subr.bf16.mxu0 %v7850_v47  ;;  %v7916_v28 = vld [vmem:[%s10665_s1 + $0x14cc] ss:$16 sps:$4 sm:$0xff]   ;;  %v7914_v47 = vld [vmem:[%s10665_s1 + $0x14c8] ss:$16 sps:$4 sm:$0xff]  }
 0x299   :  { %5811 = vmatprep.subr.bf16.mxu1 %v7847_v39  ;;  %v7911_v39 = vld [vmem:[%s10665_s1 + $0x1348] ss:$16 sps:$4 sm:$0xff]  }
 0x29a   :  { %v7917_v37 = vld [vmem:[%s10665_s1 + $0x1328] ss:$16 sps:$4 sm:$0xff]  }
 0x29b   :  { %5845 = vmatpush1.bf16.msra.mxu0 %v7848_v36 }
 0x29c   :  { %5812 = vmatpush1.bf16.msra.mxu1 %v7845_v34  ;;  %5846 = vmatprep.subr.bf16.mxu0 %v7856_v31  ;;  %v7919_v34 = vld [vmem:[%s10665_s1 + $0x132c] ss:$16 sps:$4 sm:$0xff]  }
 0x29d   :  { %5813 = vmatprep.subr.bf16.mxu1 %v7853_v26  ;;  %v7920_v26 = vld [vmem:[%s10665_s1 + $0x14a8] ss:$16 sps:$4 sm:$0xff]  }
 0x29f   :  { %5847 = vmatpush1.bf16.msra.mxu0 %v7854_v32  ;;  %v7926_v32 = vld [vmem:[%s10665_s1 + $0x1488] ss:$16 sps:$4 sm:$0xff]  }
 0x2a0   :  { %5814 = vmatpush1.bf16.msra.mxu1 %v7851_v56  ;;  %5848 = vmatprep.subr.bf16.mxu0 %v7862_v44  ;;  %v7923_v56 = vld [vmem:[%s10665_s1 + $0x1308] ss:$16 sps:$4 sm:$0xff]   ;;  %v7934_v44 = vld [vmem:[%s10665_s1 + $0x16ec] ss:$16 sps:$4 sm:$0xff]  }
 0x2a1   :  { %5815 = vmatprep.subr.bf16.mxu1 %v7859_v40  ;;  %v7931_v40 = vld [vmem:[%s10665_s1 + $0x146c] ss:$16 sps:$4 sm:$0xff]  }
 0x2a3   :  { %5849 = vmatpush1.bf16.msra.mxu0 %v7860_v45  ;;  %v7932_v45 = vld [vmem:[%s10665_s1 + $0x16e8] ss:$16 sps:$4 sm:$0xff]  }
 0x2a4   :  { %5816 = vmatpush2.bf16.msra.mxu1 %v7857_v48  ;;  %5850 = vmatprep.subr.bf16.mxu0 %v7868_v13  ;;  %v7929_v48 = vld [vmem:[%s10665_s1 + $0x1468] ss:$16 sps:$4 sm:$0xff]   ;;  %v7940_v13 = vld [vmem:[%s10665_s1 + $0x16cc] ss:$16 sps:$4 sm:$0xff]  }
 0x2a5   :  { %5817 = vmatprep.subr.bf16.mxu1 %v7865_v51  ;;  %v7937_v51 = vld [vmem:[%s10665_s1 + $0x144c] ss:$16 sps:$4 sm:$0xff]  }
 0x2a7   :  { %5851 = vmatpush1.bf16.msra.mxu0 %v7866_v41 }
 0x2a8   :  { %5818 = vmatpush2.bf16.msra.mxu1 %v7863_v35  ;;  %5852 = vmatprep.subr.bf16.mxu0 %v7874_v46  ;;  %v7938_v46 = vld [vmem:[%s10665_s1 + $0x16c8] ss:$16 sps:$4 sm:$0xff]  }
 0x2a9   :  { %5819 = vmatprep.subr.bf16.mxu1 %v7871_v61  ;;  %v7935_v61 = vld [vmem:[%s10665_s1 + $0x1448] ss:$16 sps:$4 sm:$0xff]  }
 0x2ab   :  { %5853 = vmatpush1.bf16.msra.mxu0 %v7872_v53  ;;  %v7943_v53 = vld [vmem:[%s10665_s1 + $0x142c] ss:$16 sps:$4 sm:$0xff]  }
 0x2ac   :  { %5820 = vmatpush2.bf16.msra.mxu1 %v7869_v55  ;;  %5854 = vmatprep.subr.bf16.mxu0 %v7880_v62 }
 0x2ad   :  { %5821 = vmatprep.subr.bf16.mxu1 %v7877_v58 }
 0x2af   :  { %5855 = vmatpush1.bf16.msra.mxu0 %v7878_v59  ;;  %v7944_v59 = vld [vmem:[%s10665_s1 + $0x16a8] ss:$16 sps:$4 sm:$0xff]  }
 0x2b0   :  { %5822 = vmatpush2.bf16.msra.mxu1 %v7875_v15  ;;  %5856 = vmatprep.subr.bf16.mxu0 %v7886_v2  ;;  %v7941_v15 = vld [vmem:[%s10665_s1 + $0x1428] ss:$16 sps:$4 sm:$0xff]   ;;  %v7949_v2 = vld [vmem:[%s10665_s1 + $0x140c] ss:$16 sps:$4 sm:$0xff]  }
 0x2b1   :  { %5823 = vmatprep.subr.bf16.mxu1 %v7883_v60 }
 0x2b3   :  { %5857 = vmatpush2.bf16.msra.mxu0 %v7884_v6  ;;  %v7950_v6 = vld [vmem:[%s10665_s1 + $0x1688] ss:$16 sps:$4 sm:$0xff]  }
 0x2b4   :  { %5824 = vmatpush2.bf16.msra.mxu1 %v7881_v3  ;;  %5858 = vmatprep.subr.bf16.mxu0 %v7892_v1  ;;  %v7947_v3 = vld [vmem:[%s10665_s1 + $0x1408] ss:$16 sps:$4 sm:$0xff]   ;;  %v7958_v1 = vld [vmem:[%s10665_s1 + $0x166c] ss:$16 sps:$4 sm:$0xff]  }
 0x2b5   :  { %5825 = vmatprep.subr.bf16.mxu1 %v7889_v22  ;;  %v7955_v22 = vld [vmem:[%s10665_s1 + $0x15ec] ss:$16 sps:$4 sm:$0xff]  }
 0x2b7   :  { %5859 = vmatpush2.bf16.msra.mxu0 %v7890_v8  ;;  %v7956_v8 = vld [vmem:[%s10665_s1 + $0x1668] ss:$16 sps:$4 sm:$0xff]  }
 0x2b8   :  { %5826 = vmatpush2.bf16.msra.mxu1 %v7887_v7  ;;  %5860 = vmatprep.subr.bf16.mxu0 %v7898_v10  ;;  %v7953_v7 = vld [vmem:[%s10665_s1 + $0x15e8] ss:$16 sps:$4 sm:$0xff]   ;;  %v7964_v10 = vld [vmem:[%s10665_s1 + $0x164c] ss:$16 sps:$4 sm:$0xff]  }
 0x2b9   :  { %5827 = vmatprep.subr.bf16.mxu1 %v7895_v43  ;;  %v7961_v43 = vld [vmem:[%s10665_s1 + $0x15cc] ss:$16 sps:$4 sm:$0xff]  }
 0x2bb   :  { %5861 = vmatpush2.bf16.msra.mxu0 %v7896_v11  ;;  %v7962_v11 = vld [vmem:[%s10665_s1 + $0x1648] ss:$16 sps:$4 sm:$0xff]  }
 0x2bc   :  { %5828 = vmatpush2.bf16.msra.mxu1 %v7893_v42  ;;  %5862 = vmatprep.subr.bf16.mxu0 %v7904_v50  ;;  %v7959_v42 = vld [vmem:[%s10665_s1 + $0x15c8] ss:$16 sps:$4 sm:$0xff]   ;;  %v7970_v50 = vld [vmem:[%s10665_s1 + $0x162c] ss:$16 sps:$4 sm:$0xff]  }
 0x2bd   :  { %5829 = vmatprep.subr.bf16.mxu1 %v7901_v16  ;;  %v7967_v16 = vld [vmem:[%s10665_s1 + $0x15ac] ss:$16 sps:$4 sm:$0xff]  }
 0x2bf   :  { %5863 = vmatpush2.bf16.msra.mxu0 %v7902_v19  ;;  %v7968_v19 = vld [vmem:[%s10665_s1 + $0x1628] ss:$16 sps:$4 sm:$0xff]  }
 0x2c0   :  { %5830 = vmatpush2.bf16.msra.mxu1 %v7899_v38  ;;  %5864 = vmatprep.subr.bf16.mxu0 %v7907_v4  ;;  %v7965_v38 = vld [vmem:[%s10665_s1 + $0x15a8] ss:$16 sps:$4 sm:$0xff]   ;;  %v7973_v4 = vld [vmem:[%s10665_s1 + $0x158c] ss:$16 sps:$4 sm:$0xff]  }
 0x2c1   :  { %5881 = vmatprep.subr.bf16.mxu1 %v7910_v18  ;;  %v7976_v18 = vld [vmem:[%s10665_s1 + $0x160c] ss:$16 sps:$4 sm:$0xff]  }
 0x2c3   :  { %v5587_v0 = vpop.f32.mrf.mxu1  ;;  %5832 = vmatmul.mubr.bf16.vlgmr.msra.gmra.mxu1 %v9147_v12  ;;  %5865 = vmatpush2.bf16.msra.mxu0 %v7905_v5  ;;  %v7922_v12 = vld [vmem:[%s10665_s1 + $0x14ac] ss:$16 sps:$4 sm:$0xff]   ;;  %v7971_v5 = vld [vmem:[%s10665_s1 + $0x1588] ss:$16 sps:$4 sm:$0xff]  }
 0x2c4   :  { %v5588_v54 = vadd.f32 %v5587_v0, %v10269_v23  ;;  %5882 = vmatpush1.bf16.msra.mxu1 %v7908_v20  ;;  %5866 = vmatprep.subr.bf16.mxu0 %v7913_v21  ;;  %v7974_v20 = vld [vmem:[%s10665_s1 + $0x1608] ss:$16 sps:$4 sm:$0xff]   ;;  %v7979_v21 = vld [vmem:[%s10665_s1 + $0x156c] ss:$16 sps:$4 sm:$0xff]  }
 0x2c5   :  { %v5589_v30 = vpop.f32.mrf.mxu1  ;;  %5883 = vmatprep.subr.bf16.mxu1 %v7916_v28  ;;  %5913 = vmatprep.mubr.bf16.mxu1 %v9168_v24  ;;  %v7928_v24 = vld [vmem:[%s10665_s1 + $0x148c] ss:$16 sps:$4 sm:$0xff]   ;;  %v7977_v0 = vld [vmem:[%s10665_s1 + $0x1568] ss:$16 sps:$4 sm:$0xff]  }
 0x2c6   :  { %v5590_v23 = vadd.f32 %v5589_v30, %v10283_v29  ;;  %v7925_v29 = vld [vmem:[%s10665_s1 + $0x130c] ss:$16 sps:$4 sm:$0xff]   ;;  %v7983_v30 = vld [vmem:[%s10665_s1 + $0x1548] ss:$16 sps:$4 sm:$0xff]  }
 0x2c7   :  { %v5591_v36 = vpop.f32.mrf.mxu1  ;;  %5867 = vmatpush2.bf16.msra.mxu0 %v7911_v39  ;;  %v7982_v28 = vld [vmem:[%s10665_s1 + $0x17ec] ss:$16 sps:$4 sm:$0xff]  }
 0x2c8   :  { %5884 = vmatpush1.bf16.msra.mxu1 %v7914_v47  ;;  %5868 = vmatprep.subr.bf16.mxu0 %v7919_v34  ;;  %v7985_v39 = vld [vmem:[%s10665_s1 + $0x154c] ss:$16 sps:$4 sm:$0xff]   ;;  %v7986_v34 = vld [vmem:[%s10665_s1 + $0x17c8] ss:$16 sps:$4 sm:$0xff]  }
 0x2c9   :  { %v5592_v31 = vpop.f32.mrf.mxu1  ;;  %5885 = vmatprep.subr.bf16.mxu1 %v7922_v12  ;;  %v7988_v47 = vld [vmem:[%s10665_s1 + $0x17cc] ss:$16 sps:$4 sm:$0xff]   ;;  %v7989_v36 = vld [vmem:[%s10665_s1 + $0x1528] ss:$16 sps:$4 sm:$0xff]  }
 0x2ca   :  { %v7991_v12 = vld [vmem:[%s10665_s1 + $0x152c] ss:$16 sps:$4 sm:$0xff]  }
 0x2cb   :  { %5869 = vmatpush2.bf16.msra.mxu0 %v7917_v37  ;;  %v7992_v37 = vld [vmem:[%s10665_s1 + $0x17a8] ss:$16 sps:$4 sm:$0xff]   ;;  %v8000_v31 = vld [vmem:[%s10665_s1 + $0x178c] ss:$16 sps:$4 sm:$0xff]  }
 0x2cc   :  { %5886 = vmatpush1.bf16.msra.mxu1 %v7920_v26  ;;  %5870 = vmatprep.subr.bf16.mxu0 %v7925_v29  ;;  %v7997_v26 = vld [vmem:[%s10665_s1 + $0x150c] ss:$16 sps:$4 sm:$0xff]   ;;  %v7995_v29 = vld [vmem:[%s10665_s1 + $0x1508] ss:$16 sps:$4 sm:$0xff]  }
 0x2cd   :  { %5887 = vmatprep.subr.bf16.mxu1 %v7928_v24  ;;  %v7998_v24 = vld [vmem:[%s10665_s1 + $0x1788] ss:$16 sps:$4 sm:$0xff]  }
 0x2cf   :  { %5871 = vmatpush2.bf16.msra.mxu0 %v7923_v56  ;;  %v8003_v56 = vld [vmem:[%s10665_s1 + $0x176c] ss:$16 sps:$4 sm:$0xff]  }
 0x2d0   :  { %5888 = vmatpush1.bf16.msra.mxu1 %v7926_v32  ;;  %5922 = vmatprep.subr.bf16.mxu0 %v7934_v44  ;;  %v8006_v32 = vld [vmem:[%s10665_s1 + $0x186c] ss:$16 sps:$4 sm:$0xff]   ;;  %v8004_v44 = vld [vmem:[%s10665_s1 + $0x1868] ss:$16 sps:$4 sm:$0xff]  }
 0x2d1   :  { %5889 = vmatprep.subr.bf16.mxu1 %v7931_v40  ;;  %v8001_v40 = vld [vmem:[%s10665_s1 + $0x1768] ss:$16 sps:$4 sm:$0xff]  }
 0x2d2   :  { %v5628_v35 = vpop.f32.mrf.mxu0  ;;  %5873 = vmatmul.mubr.bf16.vlgmr.msra.gmra.mxu0 %v9172_v25  ;;  %v7946_v25 = vld [vmem:[%s10665_s1 + $0x16ac] ss:$16 sps:$4 sm:$0xff]  }
 0x2d3   :  { %v10471_v41 = vadd.f32 %v5628_v35, %v5588_v54  ;;  %5923 = vmatpush1.bf16.msra.mxu0 %v7932_v45  ;;  %5954 = vmatprep.mubr.bf16.mxu0 %v9188_v33  ;;  %v7952_v33 = vld [vmem:[%s10665_s1 + $0x168c] ss:$16 sps:$4 sm:$0xff]   ;;  %v7980_v54 = vld [vmem:[%s10665_s1 + $0x17e8] ss:$16 sps:$4 sm:$0xff]  }
 0x2d4   :  { %5890 = vmatpush1.bf16.msra.mxu1 %v7929_v48  ;;  %v5630_v55 = vpop.f32.mrf.mxu0  ;;  %5924 = vmatprep.subr.bf16.mxu0 %v7940_v13  ;;  %v8009_v48 = vld [vmem:[%s10665_s1 + $0x174c] ss:$16 sps:$4 sm:$0xff]   ;;  %v8007_v35 = vld [vmem:[%s10665_s1 + $0x1748] ss:$16 sps:$4 sm:$0xff]  }
 0x2d5   :  { %5891 = vmatprep.subr.bf16.mxu1 %v7937_v51  ;;  %v10485_v58 = vadd.f32 %v5630_v55, %v5590_v23  ;;  %v7994_v23 = vld [vmem:[%s10665_s1 + $0x17ac] ss:$16 sps:$4 sm:$0xff]  }
 0x2d6   :  { %v5632_v62 = vpop.f32.mrf.mxu0  ;;  %v8012_v45 = vld [vmem:[%s10665_s1 + $0x184c] ss:$16 sps:$4 sm:$0xff]  }
 0x2d7   :  { %5925 = vmatpush1.bf16.msra.mxu0 %v7938_v46  ;;  %v8015_v55 = vld [vmem:[%s10665_s1 + $0x172c] ss:$16 sps:$4 sm:$0xff]   ;;  %v8016_v62 = vld [vmem:[%s10665_s1 + $0x1828] ss:$16 sps:$4 sm:$0xff]  }
 0x2d8   :  { %5892 = vmatpush1.bf16.msra.mxu1 %v7935_v61  ;;  %v5633_v60 = vpop.f32.mrf.mxu0  ;;  %5926 = vmatprep.subr.bf16.mxu0 %v7946_v25  ;;  %v8010_v61 = vld [vmem:[%s10665_s1 + $0x1848] ss:$16 sps:$4 sm:$0xff]  }
 0x2d9   :  { %5893 = vmatprep.subr.bf16.mxu1 %v7943_v53  ;;  %v8013_v25 = vld [vmem:[%s10665_s1 + $0x1728] ss:$16 sps:$4 sm:$0xff]  }
 0x2da   :  { %v8022_v60 = vld [vmem:[%s10665_s1 + $0x1808] ss:$16 sps:$4 sm:$0xff]  }
 0x2db   :  { %5927 = vmatpush1.bf16.msra.mxu0 %v7944_v59  ;;  %v8019_v59 = vld [vmem:[%s10665_s1 + $0x1708] ss:$16 sps:$4 sm:$0xff]  }
 0x2dc   :  { %5894 = vmatpush1.bf16.msra.mxu1 %v7941_v15  ;;  %5928 = vmatprep.subr.bf16.mxu0 %v7952_v33 }
 0x2dd   :  { %5895 = vmatprep.subr.bf16.mxu1 %v7949_v2 }
 0x2df   :  { %5929 = vmatpush1.bf16.msra.mxu0 %v7950_v6 }
 0x2e0   :  { %5896 = vmatpush1.bf16.msra.mxu1 %v7947_v3  ;;  %5930 = vmatprep.subr.bf16.mxu0 %v7958_v1 }
 0x2e1   :  { %5897 = vmatprep.subr.bf16.mxu1 %v7955_v22 }
 0x2e3   :  { %5931 = vmatpush1.bf16.msra.mxu0 %v7956_v8 }
 0x2e4   :  { %5898 = vmatpush2.bf16.msra.mxu1 %v7953_v7  ;;  %5932 = vmatprep.subr.bf16.mxu0 %v7964_v10 }
 0x2e5   :  { %5899 = vmatprep.subr.bf16.mxu1 %v7961_v43 }
 0x2e7   :  { %5933 = vmatpush1.bf16.msra.mxu0 %v7962_v11 }
 0x2e8   :  { %5900 = vmatpush2.bf16.msra.mxu1 %v7959_v42  ;;  %5934 = vmatprep.subr.bf16.mxu0 %v7970_v50 }
 0x2e9   :  { %5901 = vmatprep.subr.bf16.mxu1 %v7967_v16 }
 0x2eb   :  { %5935 = vmatpush1.bf16.msra.mxu0 %v7968_v19 }
 0x2ec   :  { %5902 = vmatpush2.bf16.msra.mxu1 %v7965_v38  ;;  %5936 = vmatprep.subr.bf16.mxu0 %v7976_v18 }
 0x2ed   :  { %5903 = vmatprep.subr.bf16.mxu1 %v7973_v4 }
 0x2ef   :  { %5937 = vmatpush1.bf16.msra.mxu0 %v7974_v20 }
 0x2f0   :  { %5904 = vmatpush2.bf16.msra.mxu1 %v7971_v5  ;;  %5938 = vmatprep.subr.bf16.mxu0 %v7982_v28 }
 0x2f1   :  { %5905 = vmatprep.subr.bf16.mxu1 %v7979_v21 }
 0x2f3   :  { %5939 = vmatpush2.bf16.msra.mxu0 %v7980_v54 }
 0x2f4   :  { %5906 = vmatpush2.bf16.msra.mxu1 %v7977_v0  ;;  %5940 = vmatprep.subr.bf16.mxu0 %v7988_v47 }
 0x2f5   :  { %5907 = vmatprep.subr.bf16.mxu1 %v7985_v39 }
 0x2f7   :  { %5941 = vmatpush2.bf16.msra.mxu0 %v7986_v34 }
 0x2f8   :  { %5908 = vmatpush2.bf16.msra.mxu1 %v7983_v30  ;;  %5942 = vmatprep.subr.bf16.mxu0 %v7994_v23 }
 0x2f9   :  { %5909 = vmatprep.subr.bf16.mxu1 %v7991_v12 }
 0x2fb   :  { %5943 = vmatpush2.bf16.msra.mxu0 %v7992_v37 }
 0x2fc   :  { %5910 = vmatpush2.bf16.msra.mxu1 %v7989_v36  ;;  %5944 = vmatprep.subr.bf16.mxu0 %v8000_v31 }
 0x2fd   :  { %5911 = vmatprep.subr.bf16.mxu1 %v7997_v26 }
 0x2ff   :  { %5945 = vmatpush2.bf16.msra.mxu0 %v7998_v24 }
 0x300   :  { %5912 = vmatpush2.bf16.msra.mxu1 %v7995_v29  ;;  %5946 = vmatprep.subr.bf16.mxu0 %v8003_v56 }
 0x301   :  { %5971 = vmatprep.subr.bf16.mxu1 %v8006_v32 }
 0x303   :  { %v5669_v51 = vpop.f32.mrf.mxu1  ;;  %5914 = vmatmul.mubr.bf16.vlgmr.msra.gmra.mxu1 %v9364_v14  ;;  %5947 = vmatpush2.bf16.msra.mxu0 %v8001_v40  ;;  %v8018_v14 = vld [vmem:[%s10665_s1 + $0x182c] ss:$16 sps:$4 sm:$0xff]  }
 0x304   :  { %v5670_v13 = vadd.f32 %v5669_v51, %v10471_v41  ;;  %5972 = vmatpush1.bf16.msra.mxu1 %v8004_v44  ;;  %5948 = vmatprep.subr.bf16.mxu0 %v8009_v48 }
 0x305   :  { %v5671_v46 = vpop.f32.mrf.mxu1  ;;  %5973 = vmatprep.subr.bf16.mxu1 %v8012_v45  ;;  %5995 = vmatprep.mubr.bf16.mxu1 %v8027_v52  ;;  %v8024_v52 = vld [vmem:[%s10665_s1 + $0x180c] ss:$16 sps:$4 sm:$0xff]  }
 0x306   :  { %v5672_v41 = vadd.f32 %v5671_v46, %v10485_v58  ;;  %v8021_v58 = vld [vmem:[%s10665_s1 + $0x170c] ss:$16 sps:$4 sm:$0xff]  }
 0x307   :  { %v5673_v53 = vpop.f32.mrf.mxu1  ;;  %5949 = vmatpush2.bf16.msra.mxu0 %v8007_v35 }
 0x308   :  { %5974 = vmatpush1.bf16.msra.mxu1 %v8010_v61  ;;  %5950 = vmatprep.subr.bf16.mxu0 %v8015_v55 }
 0x309   :  { %v5674_v15 = vpop.f32.mrf.mxu1  ;;  %5975 = vmatprep.subr.bf16.mxu1 %v8018_v14 }
 0x30b   :  { %5951 = vmatpush2.bf16.msra.mxu0 %v8013_v25  ;;  %v6032_v25 = vrot.slane %v6841_v17, %v8183_v49 }
 0x30c   :  { %5976 = vmatpush1.bf16.msra.mxu1 %v8016_v62  ;;  %5952 = vmatprep.subr.bf16.mxu0 %v8021_v58 }
 0x30d   :  { %5977 = vmatprep.subr.bf16.mxu1 %v8024_v52 }
 0x30f   :  { %5953 = vmatpush2.bf16.msra.mxu0 %v8019_v59 }
 0x310   :  { %5978 = vmatpush1.bf16.msra.mxu1 %v8022_v60 }
 0x312   :  { %v5710_v2 = vpop.f32.mrf.mxu0  ;;  %5955 = vmatmul.mubr.bf16.vlgmr.msra.gmra.mxu0 %v9386_v27 }
 0x313   :  { %6840 = vmatmul.mubr.msk.bf16.vlgmr.msra.gmra.mxu1 %vm4934_vm0, %v9450_v9  ;;  %v5711_v33 = vadd.f32 %v5710_v2, %v5670_v13 }
 0x314   :  { %v5712_v3 = vpop.f32.mrf.mxu0 }
 0x315   :  { %v5713_v6 = vadd.f32 %v5712_v3, %v5672_v41 }
 0x316   :  { %v5714_v22 = vpop.f32.mrf.mxu0 }
 0x318   :  { %v5715_v1 = vpop.f32.mrf.mxu0 }
 0x343   :  { %v5751_v7 = vpop.f32.mrf.mxu1 }
 0x344   :  { %v5752_v8 = vadd.f32 %v5751_v7, %v5711_v33 }
 0x345   :  { %v5753_v43 = vpop.f32.mrf.mxu1 }
 0x346   :  { %v5754_v10 = vadd.f32 %v5753_v43, %v5713_v6 }
 0x347   :  { %v5755_v42 = vpop.f32.mrf.mxu1 }
 0x349   :  { %v5756_v11 = vpop.f32.mrf.mxu1 }
 0x352   :  { %v5792_v16 = vpop.f32.mrf.mxu0 }
 0x353   :  { %v5793_v50 = vadd.f32 %v5792_v16, %v5752_v8 }
 0x354   :  { %v5794_v38 = vpop.f32.mrf.mxu0 }
 0x355   :  { %v5795_v19 = vadd.f32 %v5794_v38, %v5754_v10 }
 0x356   :  { %v5796_v4 = vpop.f32.mrf.mxu0 }
 0x358   :  { %v5797_v27 = vpop.f32.mrf.mxu0 }
 0x383   :  { %v5833_v18 = vpop.f32.mrf.mxu1 }
 0x384   :  { %v5834_v5 = vadd.f32 %v5833_v18, %v5793_v50 }
 0x385   :  { %v5835_v9 = vpop.f32.mrf.mxu1 }
 0x386   :  { %v5836_v20 = vadd.f32 %v5835_v9, %v5795_v19 }
 0x387   :  { %v5837_v21 = vpop.f32.mrf.mxu1 }
 0x389   :  { %v5838_v28 = vpop.f32.mrf.mxu1 }
 0x392   :  { %v5874_v0 = vpop.f32.mrf.mxu0 }
 0x393   :  { %v5875_v36 = vadd.f32 %v5874_v0, %v5834_v5 }
 0x394   :  { %v5876_v54 = vpop.f32.mrf.mxu0 }
 0x395   :  { %v5877_v37 = vadd.f32 %v5876_v54, %v5836_v20 }
 0x396   :  { %v5878_v39 = vpop.f32.mrf.mxu0 }
 0x398   :  { %v5879_v47 = vpop.f32.mrf.mxu0 }
 0x3c3   :  { %v5915_v30 = vpop.f32.mrf.mxu1 }
 0x3c4   :  { %v5916_v26 = vadd.f32 %v5915_v30, %v5875_v36 }
 0x3c5   :  { %v5917_v34 = vpop.f32.mrf.mxu1 }
 0x3c6   :  { %v5918_v24 = vadd.f32 %v5917_v34, %v5877_v37 }
 0x3c7   :  { %v5919_v12 = vpop.f32.mrf.mxu1 }
 0x3c9   :  { %v5920_v23 = vpop.f32.mrf.mxu1 }
 0x3d2   :  { %v5956_v31 = vpop.f32.mrf.mxu0 }
 0x3d3   :  { %v5997_v29 = vpop.f32.mrf.mxu1  ;;  %v5957_v56 = vadd.f32 %v5956_v31, %v5916_v26 }
 0x3d4   :  { %v5958_v32 = vpop.f32.mrf.mxu0 }
 0x3d5   :  { %v5999_v40 = vpop.f32.mrf.mxu1  ;;  %v5998_v44 = vadd.f32 %v5997_v29, %v5957_v56  ;;  %v5959_v48 = vadd.f32 %v5958_v32, %v5918_v24 }
 0x3d6   :  { %v5960_v45 = vpop.f32.mrf.mxu0 }
 0x3d7   :  { %v6001_v51 = vpop.f32.mrf.mxu1  ;;  %v6010_v13 = vmul.f32 0.01, %v5998_v44  ;;  %v6000_v35 = vadd.f32 %v5999_v40, %v5959_v48  ;;  %vm6006_vm3 = vcmp.ge.f32.partialorder %v5998_v44, 0.0 }
 0x3d8   :  { %v5961_v61 = vpop.f32.mrf.mxu0 }
 0x3d9   :  { %v6002_v46 = vpop.f32.mrf.mxu1  ;;  %vm6007_vm4 = vcmp.ge.f32.partialorder %v6000_v35, 0.0  ;;  %v6011_v55 = vmul.f32 0.01, %v6000_v35  ;;  %v6014_v14 = vsel %vm6006_vm3, %v5998_v44, %v6010_v13 }
 0x3db   :  { %v6015_v41 = vsel %vm6007_vm4, %v6000_v35, %v6011_v55 }
 0x3dc   :  { %v6842_v53 = vpack.c.bf16 %v6015_v41, %v6014_v14 }
 0x3de   :  { %v6039_v62 = vrot.slane %v6842_v53, %v8183_v49 }
 0x3e0   :  { %v6040_v15 = vcombine.low %v6032_v25, %v6039_v62 }
 0x3e2   :  { %6843 = vst.sshfl [vmem:[%s10668_s3] sm:$0x55 pattern:$0x73625140] %v6040_v15 }

</bundles_post_ra>
